<compile_context>
chip_gen: v7x
topology: tpu7x:2x2x1
jax: 0.10.0
libtpu: 0.0.40
codegen_flags: <defaults>
</compile_context>

<pallas_src>
import functools

import jax
import jax.numpy as jnp
import numpy as np
from jax.experimental import pallas as pl
from jax.experimental.pallas import tpu as pltpu

# ----- synthetic block / global params (MBConv, eval mode) -----
N_BATCH = 2
IN_FILTERS = 8
OUT_FILTERS = 8
EXPAND_RATIO = 6
KERNEL_SIZE = 3
STRIDE = 1
SE_RATIO = 0.25
IMG = 16
BN_EPS = 1e-3

EXP_FILTERS = IN_FILTERS * EXPAND_RATIO            # 48
SE_FILTERS = max(1, int(IN_FILTERS * SE_RATIO))    # 2

B_TILE = 2        # samples packed into the lane axis per grid step
SEG_COLS = 8      # SE / segment matmul width padded to a full sublane group
CHAN_COLS = 16    # packed per-channel operand width (lane-padded to 128 anyway)

# column layout of the packed per-channel operand (Cexp, CHAN_COLS)
_C_BN0 = 0        # bn0 shift
_C_BN1 = 1        # bn1 shift
_C_SEB = 2        # SE expand bias
_C_BN2 = 3        # bn2 shift (first OUT_FILTERS rows valid)
_C_DW0 = 4        # 9 depthwise taps (bn1 scale folded), tap index = (dh+1)*3 + (dw+1)


# ---------------------------------------------------------------------------
# Fused MBConv kernel (one batch TILE of B_TILE samples per grid step)
# ---------------------------------------------------------------------------

def _mbconv_fused_kernel(x_ref, we_ref, chan_ref, wser_ref, bser_ref, wsee_ref,
                         wp_ref, seg_ref, segt_ref, rc_ref, o_ref,
                         *, H, W, cout, add_residual):
    P = H * W
    NPT = x_ref.shape[-1]                                # B_TILE * H * W (lane axis)
    inv_p = 1.0 / P

    x = x_ref[...]                                       # (Cin, NPT), lane-dense
    chan = chan_ref[...]                                 # (Cexp, CHAN_COLS)
    rows = rc_ref[0:1, :]                                # (1, NPT) row index within image
    cols = rc_ref[1:2, :]                                # (1, NPT) col index within image

    # ---- expand 1x1 conv (BN0 scale pre-folded) + shift + swish ----
    h = jnp.dot(we_ref[...], x, preferred_element_type=jnp.float32)      # (Cexp, NPT)
    h = h + chan[:, _C_BN0:_C_BN0 + 1]
    h = h * jax.nn.sigmoid(h)

    # ---- depthwise 3x3, stride 1, 'same' zero padding (BN1 scale pre-folded) ----
    # Shifted taps via XLU rolls on the lane axis.  Horizontal image-row wrap is handled by
    # zeroing invalid SOURCE columns (2 selects, shared by all dh); vertical / cross-sample
    # wrap is handled by zeroing invalid DEST rows per dh band (2 selects).
    def tap_w(dh, dw):
        c = _C_DW0 + (dh + 1) * 3 + (dw + 1)
        return chan[:, c:c + 1]                           # (Cexp, 1) per-channel weight

    def rolled(src, s0):                                  # tap[p] = src[p + s0] (circular)
        return src if s0 == 0 else pltpu.roll(src, shift=(-s0) % NPT, axis=1)

    h_l = jnp.where(cols > 0, h, 0.0)                     # valid sources for dw = +1 taps
    h_r = jnp.where(cols < (W - 1), h, 0.0)               # valid sources for dw = -1 taps
    acc = None
    for dh in (-1, 0, 1):                                 # static unroll, 9 taps total
        band = (rolled(h_r, dh * W - 1) * tap_w(dh, -1)
                + rolled(h, dh * W) * tap_w(dh, 0)
                + rolled(h_l, dh * W + 1) * tap_w(dh, 1))
        if dh == -1:
            band = jnp.where(rows > 0, band, 0.0)
        elif dh == 1:
            band = jnp.where(rows < (H - 1), band, 0.0)
        acc = band if acc is None else acc + band
    h = acc + chan[:, _C_BN1:_C_BN1 + 1]
    h = h * jax.nn.sigmoid(h)

    # ---- squeeze-and-excitation (per-sample handling via one-hot segment matmuls) ----
    pooled = jnp.dot(h, segt_ref[...], preferred_element_type=jnp.float32) * inv_p   # (Cexp, SEG)
    s = jnp.dot(wser_ref[...], pooled, preferred_element_type=jnp.float32) + bser_ref[...]
    s = s * jax.nn.sigmoid(s)                                                        # (SEG, SEG)
    g = jnp.dot(wsee_ref[...], s, preferred_element_type=jnp.float32) + chan[:, _C_SEB:_C_SEB + 1]
    gate = jnp.dot(jax.nn.sigmoid(g), seg_ref[...],
                   preferred_element_type=jnp.float32)                               # (Cexp, NPT)
    hg = h * gate

    # ---- project 1x1 conv (BN2 scale pre-folded) + shift + identity residual ----
    y = jnp.dot(wp_ref[...], hg, preferred_element_type=jnp.float32)     # (Cout, NPT)
    y = y + chan[0:cout, _C_BN2:_C_BN2 + 1]
    if add_residual:                                      # id_skip: stride==1 and Cin==Cout
        y = y + x
    o_ref[...] = y.astype(o_ref.dtype)


# ---------------------------------------------------------------------------
# pallas_call wrapper (NCHW in / NCHW out)
# ---------------------------------------------------------------------------

def _rep_spec(shape):
    nd = len(shape)
    return pl.BlockSpec(shape, lambda t, _nd=nd: (0,) * _nd)


def mbconv_forward(x_nchw, p):
    N, Cin, H, W = x_nchw.shape
    P = H * W
    Cexp, Cout = EXP_FILTERS, OUT_FILTERS
    assert N % B_TILE == 0, "batch must be a multiple of B_TILE"
    NT = N // B_TILE
    NPT = B_TILE * P
    f32 = jnp.float32

    # --- fold BN scales into conv weights (host-side, tiny, traced once under jit) ---
    w_expand = (p["w_expand"] * p["bn0_scale"][:, None]).astype(f32)          # (Cexp, Cin)
    w_proj = (p["w_proj"] * p["bn2_scale"][:, None]).astype(f32)              # (Cout, Cexp)
    w_dw = (p["w_dw"] * p["bn1_scale"][None, None, :]).reshape(9, Cexp)       # (9, Cexp)

    # --- single packed lane-dense per-channel operand ---
    chan = jnp.zeros((Cexp, CHAN_COLS), f32)
    chan = chan.at[:, _C_BN0].set(p["bn0_shift"])
    chan = chan.at[:, _C_BN1].set(p["bn1_shift"])
    chan = chan.at[:, _C_SEB].set(p["b_se_e"])
    chan = chan.at[:Cout, _C_BN2].set(p["bn2_shift"])
    chan = chan.at[:, _C_DW0:_C_DW0 + 9].set(w_dw.T)

    # --- SE weights zero-padded to a full sublane group (pads are exact no-ops) ---
    w_se_r = jnp.zeros((SEG_COLS, Cexp), f32).at[:SE_FILTERS].set(p["w_se_r"].T)
    b_se_r = jnp.zeros((SEG_COLS, 1), f32).at[:SE_FILTERS, 0].set(p["b_se_r"])
    w_se_e = jnp.zeros((Cexp, SEG_COLS), f32).at[:, :SE_FILTERS].set(p["w_se_e"])

    # --- static segment / boundary-index operands (compile-time constants) ---
    seg_np = np.zeros((SEG_COLS, NPT), np.float32)
    for b in range(B_TILE):
        seg_np[b, b * P:(b + 1) * P] = 1.0
    seg = jnp.asarray(seg_np)                      # (SEG_COLS, NPT) one-hot sample rows
    seg_t = jnp.asarray(seg_np.T)                  # (NPT, SEG_COLS)
    pos = np.arange(NPT, dtype=np.int32)
    rc = jnp.asarray(np.stack([(pos % P) // W, pos % W]).astype(np.int32))    # (2, NPT)

    # --- pack B_TILE samples along the lane axis: (NT, Cin, B_TILE*P) ---
    xp = (x_nchw.astype(f32).reshape(NT, B_TILE, Cin, P)
          .transpose(0, 2, 1, 3).reshape(NT, Cin, NPT))

    operands = (xp, w_expand, chan, w_se_r, b_se_r, w_se_e, w_proj, seg, seg_t, rc)
    in_specs = [pl.BlockSpec((pl.Squeezed(), Cin, NPT), lambda t: (t, 0, 0))] + \
               [_rep_spec(op.shape) for op in operands[1:]]

    add_residual = (STRIDE == 1 and Cin == Cout)   # MBConv id_skip condition
    out = pl.pallas_call(
        functools.partial(_mbconv_fused_kernel, H=H, W=W, cout=Cout,
                          add_residual=add_residual),
        out_shape=jax.ShapeDtypeStruct((NT, Cout, NPT), f32),
        grid=(NT,),
        in_specs=in_specs,
        out_specs=pl.BlockSpec((pl.Squeezed(), Cout, NPT), lambda t: (t, 0, 0)),
        compiler_params=pltpu.CompilerParams(dimension_semantics=("parallel",)),
    )(*operands)

    return (out.reshape(NT, Cout, B_TILE, P).transpose(0, 2, 1, 3)
            .reshape(N, Cout, H, W))


# ---------------------------------------------------------------------------
# deterministic parameter init + pure-JAX reference
# ---------------------------------------------------------------------------

def init_params(key):
    ks = jax.random.split(key, 10)

    def nrm(k, shape, s=0.1):
        return jax.random.normal(k, shape, jnp.float32) * s

    def bn(k, c):
        k1, k2, k3, k4 = jax.random.split(k, 4)
        gamma = 1.0 + nrm(k1, (c,))
        beta = nrm(k2, (c,))
        mean = nrm(k3, (c,))
        var = 1.0 + jnp.abs(nrm(k4, (c,)))
        scale = gamma / jnp.sqrt(var + BN_EPS)
        shift = beta - mean * scale
        return scale, shift

    bn0_scale, bn0_shift = bn(ks[7], EXP_FILTERS)
    bn1_scale, bn1_shift = bn(ks[8], EXP_FILTERS)
    bn2_scale, bn2_shift = bn(ks[9], OUT_FILTERS)
    return dict(
        w_expand=nrm(ks[0], (EXP_FILTERS, IN_FILTERS)),            # torch (oup, inp, 1, 1) squeezed
        w_dw=nrm(ks[1], (KERNEL_SIZE, KERNEL_SIZE, EXP_FILTERS)),  # torch (oup, 1, k, k) -> (k, k, C)
        w_se_r=nrm(ks[2], (EXP_FILTERS, SE_FILTERS)),              # torch (se, exp, 1, 1) transposed
        b_se_r=nrm(ks[3], (SE_FILTERS,)),
        w_se_e=nrm(ks[4], (EXP_FILTERS, SE_FILTERS)),              # torch (exp, se, 1, 1) squeezed
        b_se_e=nrm(ks[5], (EXP_FILTERS,)),
        w_proj=nrm(ks[6], (OUT_FILTERS, EXP_FILTERS)),             # torch (out, exp, 1, 1) squeezed
        bn0_scale=bn0_scale, bn0_shift=bn0_shift,
        bn1_scale=bn1_scale, bn1_shift=bn1_shift,
        bn2_scale=bn2_scale, bn2_shift=bn2_shift,
    )


def ref_forward(x_nchw, p):
    x = x_nchw.astype(jnp.float32)
    N, Cin, H, W = x.shape
    P = H * W
    xf = x.reshape(N, Cin, P)
    # expand 1x1 + BN0 + swish
    h = jnp.einsum("oc,ncp->nop", p["w_expand"], xf)
    h = h * p["bn0_scale"][None, :, None] + p["bn0_shift"][None, :, None]
    h = h * jax.nn.sigmoid(h)
    # depthwise 3x3, stride 1, 'same' zero padding + BN1 + swish
    hs = h.reshape(N, -1, H, W)
    hp = jnp.pad(hs, ((0, 0), (0, 0), (1, 1), (1, 1)))
    acc = jnp.zeros_like(hs)
    for ki in range(KERNEL_SIZE):
        for kj in range(KERNEL_SIZE):
            acc = acc + hp[:, :, ki:ki + H, kj:kj + W] * p["w_dw"][ki, kj][None, :, None, None]
    h = acc * p["bn1_scale"][None, :, None, None] + p["bn1_shift"][None, :, None, None]
    h = h * jax.nn.sigmoid(h)
    # squeeze-and-excitation
    pooled = jnp.mean(h, axis=(2, 3))                              # (N, Cexp)
    s = pooled @ p["w_se_r"] + p["b_se_r"]
    s = s * jax.nn.sigmoid(s)
    g = s @ p["w_se_e"].T + p["b_se_e"]
    h = h * jax.nn.sigmoid(g)[:, :, None, None]
    # project 1x1 + BN2 + identity residual
    y = jnp.einsum("oc,ncp->nop", p["w_proj"], h.reshape(N, -1, P))
    y = y * p["bn2_scale"][None, :, None] + p["bn2_shift"][None, :, None]
    y = y + xf
    return y.reshape(N, -1, H, W)


if __name__ == "__main__":
    key = jax.random.PRNGKey(0)
    kx, kp = jax.random.split(key)
    x = jax.random.normal(kx, (N_BATCH, IN_FILTERS, IMG, IMG), jnp.float32)
    params = init_params(kp)

    out = jax.jit(mbconv_forward)(x, params)
    out = jax.block_until_ready(out)

    ref = ref_forward(x, params)
    np.testing.assert_allclose(np.asarray(out), np.asarray(ref), rtol=2e-3, atol=2e-3)
    print("KERNEL_OK")
</pallas_src>

<mosaic_0001>
module attributes {stable_mosaic.version = 11 : i64} {
  func.func @_mbconv_fused_kernel(%arg0: i32, %arg1: memref<1x8x512xf32, #tpu.memory_space<vmem>>, %arg2: memref<48x8xf32, #tpu.memory_space<vmem>>, %arg3: memref<48x16xf32, #tpu.memory_space<vmem>>, %arg4: memref<8x48xf32, #tpu.memory_space<vmem>>, %arg5: memref<8x1xf32, #tpu.memory_space<vmem>>, %arg6: memref<48x8xf32, #tpu.memory_space<vmem>>, %arg7: memref<8x48xf32, #tpu.memory_space<vmem>>, %arg8: memref<8x512xf32, #tpu.memory_space<vmem>>, %arg9: memref<512x8xf32, #tpu.memory_space<vmem>>, %arg10: memref<2x512xi32, #tpu.memory_space<vmem>>, %arg11: memref<1x8x512xf32, #tpu.memory_space<vmem>>) attributes {dimension_semantics = [#tpu.dimension_semantics<parallel>], iteration_bounds = array<i64: 1>, scalar_prefetch = 0 : i64, scratch_operands = 0 : i64, tpu.core_type = #tpu.core_type<tc>, window_params = [{transform_indices = @transform_0, window_bounds = array<i64: 1, 8, 512>}, {pipeline_mode = #tpu.pipeline_mode<synchronous>, transform_indices = @transform_1, window_bounds = array<i64: 48, 8>}, {pipeline_mode = #tpu.pipeline_mode<synchronous>, transform_indices = @transform_2, window_bounds = array<i64: 48, 16>}, {pipeline_mode = #tpu.pipeline_mode<synchronous>, transform_indices = @transform_3, window_bounds = array<i64: 8, 48>}, {pipeline_mode = #tpu.pipeline_mode<synchronous>, transform_indices = @transform_4, window_bounds = array<i64: 8, 1>}, {pipeline_mode = #tpu.pipeline_mode<synchronous>, transform_indices = @transform_5, window_bounds = array<i64: 48, 8>}, {pipeline_mode = #tpu.pipeline_mode<synchronous>, transform_indices = @transform_6, window_bounds = array<i64: 8, 48>}, {pipeline_mode = #tpu.pipeline_mode<synchronous>, transform_indices = @transform_7, window_bounds = array<i64: 8, 512>}, {pipeline_mode = #tpu.pipeline_mode<synchronous>, transform_indices = @transform_8, window_bounds = array<i64: 512, 8>}, {pipeline_mode = #tpu.pipeline_mode<synchronous>, transform_indices = @transform_9, window_bounds = array<i64: 2, 512>}, {transform_indices = @transform_10, window_bounds = array<i64: 1, 8, 512>}]} {
    %c0 = arith.constant 0 : index
    %c0_0 = arith.constant 0 : index
    %c0_1 = arith.constant 0 : index
    %0 = vector.load %arg1[%c0, %c0_0, %c0_1] : memref<1x8x512xf32, #tpu.memory_space<vmem>>, vector<1x8x512xf32>
    %1 = vector.shape_cast %0 : vector<1x8x512xf32> to vector<8x512xf32>
    %c0_2 = arith.constant 0 : index
    %c0_3 = arith.constant 0 : index
    %2 = vector.load %arg3[%c0_2, %c0_3] : memref<48x16xf32, #tpu.memory_space<vmem>>, vector<48x16xf32>
    %c0_4 = arith.constant 0 : index
    %c0_5 = arith.constant 0 : index
    %3 = vector.load %arg10[%c0_4, %c0_5] : memref<2x512xi32, #tpu.memory_space<vmem>>, vector<1x512xi32>
    %c1 = arith.constant 1 : index
    %c0_6 = arith.constant 0 : index
    %4 = vector.load %arg10[%c1, %c0_6] : memref<2x512xi32, #tpu.memory_space<vmem>>, vector<1x512xi32>
    %c0_7 = arith.constant 0 : index
    %c0_8 = arith.constant 0 : index
    %5 = vector.load %arg2[%c0_7, %c0_8] : memref<48x8xf32, #tpu.memory_space<vmem>>, vector<48x8xf32>
    %cst = arith.constant dense<0.000000e+00> : vector<48x512xf32>
    %6 = tpu.matmul %5, %1, %cst {dimension_numbers = #tpu.dot_dimension_numbers<[1], [0], [0], [1], [0, 0, 1, 1], [], []>} : vector<48x8xf32>, vector<8x512xf32>, vector<48x512xf32> -> vector<48x512xf32>
    %7 = vector.extract_strided_slice %2 {offsets = [0, 0], sizes = [48, 1], strides = [1, 1]} : vector<48x16xf32> to vector<48x1xf32>
    %8 = vector.broadcast %7 : vector<48x1xf32> to vector<48x512xf32>
    %9 = arith.addf %6, %8 : vector<48x512xf32>
    %10 = arith.negf %9 : vector<48x512xf32>
    %11 = math.exp %10 : vector<48x512xf32>
    %cst_9 = arith.constant 1.000000e+00 : f32
    %12 = vector.broadcast %cst_9 : f32 to vector<48x512xf32>
    %13 = arith.addf %12, %11 : vector<48x512xf32>
    %14 = arith.divf %12, %13 : vector<48x512xf32>
    %15 = arith.mulf %9, %14 : vector<48x512xf32>
    %c0_i32 = arith.constant 0 : i32
    %16 = vector.broadcast %c0_i32 : i32 to vector<1x512xi32>
    %17 = arith.cmpi sgt, %4, %16 : vector<1x512xi32>
    %cst_10 = arith.constant 0.000000e+00 : f32
    %18 = vector.shape_cast %17 : vector<1x512xi1> to vector<1x512xi1>
    %19 = vector.broadcast %18 : vector<1x512xi1> to vector<48x512xi1>
    %20 = vector.broadcast %cst_10 : f32 to vector<48x512xf32>
    %21 = arith.select %19, %15, %20 : vector<48x512xi1>, vector<48x512xf32>
    %c15_i32 = arith.constant 15 : i32
    %22 = vector.broadcast %c15_i32 : i32 to vector<1x512xi32>
    %23 = arith.cmpi slt, %4, %22 : vector<1x512xi32>
    %cst_11 = arith.constant 0.000000e+00 : f32
    %24 = vector.shape_cast %23 : vector<1x512xi1> to vector<1x512xi1>
    %25 = vector.broadcast %24 : vector<1x512xi1> to vector<48x512xi1>
    %26 = vector.broadcast %cst_11 : f32 to vector<48x512xf32>
    %27 = arith.select %25, %15, %26 : vector<48x512xi1>, vector<48x512xf32>
    %c17_i32 = arith.constant 17 : i32
    %28 = tpu.dynamic_rotate %27 by %c17_i32 dim 1 : vector<48x512xf32>, i32 -> vector<48x512xf32>
    %29 = vector.extract_strided_slice %2 {offsets = [0, 4], sizes = [48, 1], strides = [1, 1]} : vector<48x16xf32> to vector<48x1xf32>
    %30 = vector.broadcast %29 : vector<48x1xf32> to vector<48x512xf32>
    %31 = arith.mulf %28, %30 : vector<48x512xf32>
    %c16_i32 = arith.constant 16 : i32
    %32 = tpu.dynamic_rotate %15 by %c16_i32 dim 1 : vector<48x512xf32>, i32 -> vector<48x512xf32>
    %33 = vector.extract_strided_slice %2 {offsets = [0, 5], sizes = [48, 1], strides = [1, 1]} : vector<48x16xf32> to vector<48x1xf32>
    %34 = vector.broadcast %33 : vector<48x1xf32> to vector<48x512xf32>
    %35 = arith.mulf %32, %34 : vector<48x512xf32>
    %36 = arith.addf %31, %35 : vector<48x512xf32>
    %c15_i32_12 = arith.constant 15 : i32
    %37 = tpu.dynamic_rotate %21 by %c15_i32_12 dim 1 : vector<48x512xf32>, i32 -> vector<48x512xf32>
    %38 = vector.extract_strided_slice %2 {offsets = [0, 6], sizes = [48, 1], strides = [1, 1]} : vector<48x16xf32> to vector<48x1xf32>
    %39 = vector.broadcast %38 : vector<48x1xf32> to vector<48x512xf32>
    %40 = arith.mulf %37, %39 : vector<48x512xf32>
    %41 = arith.addf %36, %40 : vector<48x512xf32>
    %c0_i32_13 = arith.constant 0 : i32
    %42 = vector.broadcast %c0_i32_13 : i32 to vector<1x512xi32>
    %43 = arith.cmpi sgt, %3, %42 : vector<1x512xi32>
    %cst_14 = arith.constant 0.000000e+00 : f32
    %44 = vector.shape_cast %43 : vector<1x512xi1> to vector<1x512xi1>
    %45 = vector.broadcast %44 : vector<1x512xi1> to vector<48x512xi1>
    %46 = vector.broadcast %cst_14 : f32 to vector<48x512xf32>
    %47 = arith.select %45, %41, %46 : vector<48x512xi1>, vector<48x512xf32>
    %c1_i32 = arith.constant 1 : i32
    %48 = tpu.dynamic_rotate %27 by %c1_i32 dim 1 : vector<48x512xf32>, i32 -> vector<48x512xf32>
    %49 = vector.extract_strided_slice %2 {offsets = [0, 7], sizes = [48, 1], strides = [1, 1]} : vector<48x16xf32> to vector<48x1xf32>
    %50 = vector.broadcast %49 : vector<48x1xf32> to vector<48x512xf32>
    %51 = arith.mulf %48, %50 : vector<48x512xf32>
    %52 = vector.extract_strided_slice %2 {offsets = [0, 8], sizes = [48, 1], strides = [1, 1]} : vector<48x16xf32> to vector<48x1xf32>
    %53 = vector.broadcast %52 : vector<48x1xf32> to vector<48x512xf32>
    %54 = arith.mulf %15, %53 : vector<48x512xf32>
    %55 = arith.addf %51, %54 : vector<48x512xf32>
    %c511_i32 = arith.constant 511 : i32
    %56 = tpu.dynamic_rotate %21 by %c511_i32 dim 1 : vector<48x512xf32>, i32 -> vector<48x512xf32>
    %57 = vector.extract_strided_slice %2 {offsets = [0, 9], sizes = [48, 1], strides = [1, 1]} : vector<48x16xf32> to vector<48x1xf32>
    %58 = vector.broadcast %57 : vector<48x1xf32> to vector<48x512xf32>
    %59 = arith.mulf %56, %58 : vector<48x512xf32>
    %60 = arith.addf %55, %59 : vector<48x512xf32>
    %61 = arith.addf %47, %60 : vector<48x512xf32>
    %c497_i32 = arith.constant 497 : i32
    %62 = tpu.dynamic_rotate %27 by %c497_i32 dim 1 : vector<48x512xf32>, i32 -> vector<48x512xf32>
    %63 = vector.extract_strided_slice %2 {offsets = [0, 10], sizes = [48, 1], strides = [1, 1]} : vector<48x16xf32> to vector<48x1xf32>
    %64 = vector.broadcast %63 : vector<48x1xf32> to vector<48x512xf32>
    %65 = arith.mulf %62, %64 : vector<48x512xf32>
    %c496_i32 = arith.constant 496 : i32
    %66 = tpu.dynamic_rotate %15 by %c496_i32 dim 1 : vector<48x512xf32>, i32 -> vector<48x512xf32>
    %67 = vector.extract_strided_slice %2 {offsets = [0, 11], sizes = [48, 1], strides = [1, 1]} : vector<48x16xf32> to vector<48x1xf32>
    %68 = vector.broadcast %67 : vector<48x1xf32> to vector<48x512xf32>
    %69 = arith.mulf %66, %68 : vector<48x512xf32>
    %70 = arith.addf %65, %69 : vector<48x512xf32>
    %c495_i32 = arith.constant 495 : i32
    %71 = tpu.dynamic_rotate %21 by %c495_i32 dim 1 : vector<48x512xf32>, i32 -> vector<48x512xf32>
    %72 = vector.extract_strided_slice %2 {offsets = [0, 12], sizes = [48, 1], strides = [1, 1]} : vector<48x16xf32> to vector<48x1xf32>
    %73 = vector.broadcast %72 : vector<48x1xf32> to vector<48x512xf32>
    %74 = arith.mulf %71, %73 : vector<48x512xf32>
    %75 = arith.addf %70, %74 : vector<48x512xf32>
    %c15_i32_15 = arith.constant 15 : i32
    %76 = vector.broadcast %c15_i32_15 : i32 to vector<1x512xi32>
    %77 = arith.cmpi slt, %3, %76 : vector<1x512xi32>
    %cst_16 = arith.constant 0.000000e+00 : f32
    %78 = vector.shape_cast %77 : vector<1x512xi1> to vector<1x512xi1>
    %79 = vector.broadcast %78 : vector<1x512xi1> to vector<48x512xi1>
    %80 = vector.broadcast %cst_16 : f32 to vector<48x512xf32>
    %81 = arith.select %79, %75, %80 : vector<48x512xi1>, vector<48x512xf32>
    %82 = arith.addf %61, %81 : vector<48x512xf32>
    %83 = vector.extract_strided_slice %2 {offsets = [0, 1], sizes = [48, 1], strides = [1, 1]} : vector<48x16xf32> to vector<48x1xf32>
    %84 = vector.broadcast %83 : vector<48x1xf32> to vector<48x512xf32>
    %85 = arith.addf %82, %84 : vector<48x512xf32>
    %86 = arith.negf %85 : vector<48x512xf32>
    %87 = math.exp %86 : vector<48x512xf32>
    %cst_17 = arith.constant 1.000000e+00 : f32
    %88 = vector.broadcast %cst_17 : f32 to vector<48x512xf32>
    %89 = arith.addf %88, %87 : vector<48x512xf32>
    %90 = arith.divf %88, %89 : vector<48x512xf32>
    %91 = arith.mulf %85, %90 : vector<48x512xf32>
    %c0_18 = arith.constant 0 : index
    %c0_19 = arith.constant 0 : index
    %92 = vector.load %arg9[%c0_18, %c0_19] : memref<512x8xf32, #tpu.memory_space<vmem>>, vector<512x8xf32>
    %cst_20 = arith.constant dense<0.000000e+00> : vector<48x8xf32>
    %93 = tpu.matmul %91, %92, %cst_20 {dimension_numbers = #tpu.dot_dimension_numbers<[1], [0], [0], [1], [0, 0, 1, 1], [], []>} : vector<48x512xf32>, vector<512x8xf32>, vector<48x8xf32> -> vector<48x8xf32>
    %cst_21 = arith.constant 3.906250e-03 : f32
    %94 = vector.broadcast %cst_21 : f32 to vector<48x8xf32>
    %95 = arith.mulf %93, %94 : vector<48x8xf32>
    %c0_22 = arith.constant 0 : index
    %c0_23 = arith.constant 0 : index
    %96 = vector.load %arg4[%c0_22, %c0_23] : memref<8x48xf32, #tpu.memory_space<vmem>>, vector<8x48xf32>
    %cst_24 = arith.constant dense<0.000000e+00> : vector<8x8xf32>
    %97 = tpu.matmul %96, %95, %cst_24 {dimension_numbers = #tpu.dot_dimension_numbers<[1], [0], [0], [1], [0, 0, 1, 1], [], []>} : vector<8x48xf32>, vector<48x8xf32>, vector<8x8xf32> -> vector<8x8xf32>
    %c0_25 = arith.constant 0 : index
    %c0_26 = arith.constant 0 : index
    %98 = vector.load %arg5[%c0_25, %c0_26] : memref<8x1xf32, #tpu.memory_space<vmem>>, vector<8x1xf32>
    %99 = vector.broadcast %98 : vector<8x1xf32> to vector<8x8xf32>
    %100 = arith.addf %97, %99 : vector<8x8xf32>
    %101 = arith.negf %100 : vector<8x8xf32>
    %102 = math.exp %101 : vector<8x8xf32>
    %cst_27 = arith.constant 1.000000e+00 : f32
    %103 = vector.broadcast %cst_27 : f32 to vector<8x8xf32>
    %104 = arith.addf %103, %102 : vector<8x8xf32>
    %105 = arith.divf %103, %104 : vector<8x8xf32>
    %106 = arith.mulf %100, %105 : vector<8x8xf32>
    %c0_28 = arith.constant 0 : index
    %c0_29 = arith.constant 0 : index
    %107 = vector.load %arg6[%c0_28, %c0_29] : memref<48x8xf32, #tpu.memory_space<vmem>>, vector<48x8xf32>
    %cst_30 = arith.constant dense<0.000000e+00> : vector<48x8xf32>
    %108 = tpu.matmul %107, %106, %cst_30 {dimension_numbers = #tpu.dot_dimension_numbers<[1], [0], [0], [1], [0, 0, 1, 1], [], []>} : vector<48x8xf32>, vector<8x8xf32>, vector<48x8xf32> -> vector<48x8xf32>
    %109 = vector.extract_strided_slice %2 {offsets = [0, 2], sizes = [48, 1], strides = [1, 1]} : vector<48x16xf32> to vector<48x1xf32>
    %110 = vector.broadcast %109 : vector<48x1xf32> to vector<48x8xf32>
    %111 = arith.addf %108, %110 : vector<48x8xf32>
    %112 = arith.negf %111 : vector<48x8xf32>
    %113 = math.exp %112 : vector<48x8xf32>
    %cst_31 = arith.constant 1.000000e+00 : f32
    %114 = vector.broadcast %cst_31 : f32 to vector<48x8xf32>
    %115 = arith.addf %114, %113 : vector<48x8xf32>
    %116 = arith.divf %114, %115 : vector<48x8xf32>
    %c0_32 = arith.constant 0 : index
    %c0_33 = arith.constant 0 : index
    %117 = vector.load %arg8[%c0_32, %c0_33] : memref<8x512xf32, #tpu.memory_space<vmem>>, vector<8x512xf32>
    %cst_34 = arith.constant dense<0.000000e+00> : vector<48x512xf32>
    %118 = tpu.matmul %116, %117, %cst_34 {dimension_numbers = #tpu.dot_dimension_numbers<[1], [0], [0], [1], [0, 0, 1, 1], [], []>} : vector<48x8xf32>, vector<8x512xf32>, vector<48x512xf32> -> vector<48x512xf32>
    %119 = arith.mulf %91, %118 : vector<48x512xf32>
    %c0_35 = arith.constant 0 : index
    %c0_36 = arith.constant 0 : index
    %120 = vector.load %arg7[%c0_35, %c0_36] : memref<8x48xf32, #tpu.memory_space<vmem>>, vector<8x48xf32>
    %cst_37 = arith.constant dense<0.000000e+00> : vector<8x512xf32>
    %121 = tpu.matmul %120, %119, %cst_37 {dimension_numbers = #tpu.dot_dimension_numbers<[1], [0], [0], [1], [0, 0, 1, 1], [], []>} : vector<8x48xf32>, vector<48x512xf32>, vector<8x512xf32> -> vector<8x512xf32>
    %122 = vector.extract_strided_slice %2 {offsets = [0, 3], sizes = [8, 1], strides = [1, 1]} : vector<48x16xf32> to vector<8x1xf32>
    %123 = vector.broadcast %122 : vector<8x1xf32> to vector<8x512xf32>
    %124 = arith.addf %121, %123 : vector<8x512xf32>
    %125 = arith.addf %124, %1 : vector<8x512xf32>
    %c0_38 = arith.constant 0 : index
    %c0_39 = arith.constant 0 : index
    %c0_40 = arith.constant 0 : index
    %126 = vector.load %arg11[%c0_38, %c0_39, %c0_40] : memref<1x8x512xf32, #tpu.memory_space<vmem>>, vector<1x8x512xf32>
    %127 = vector.shape_cast %126 : vector<1x8x512xf32> to vector<8x512xf32>
    %128 = vector.shape_cast %125 : vector<8x512xf32> to vector<1x8x512xf32>
    tpu.vector_store %arg11[%c0_38, %c0_39, %c0_40], %128 {strides = array<i32>} : memref<1x8x512xf32, #tpu.memory_space<vmem>>, vector<1x8x512xf32>,
    return
  }
  func.func @transform_0(%arg0: i32) -> (i32, i32, i32) {
    %c0_i32 = arith.constant 0 : i32
    %c0_i32_0 = arith.constant 0 : i32
    %c0_i32_1 = arith.constant 0 : i32
    return %arg0, %c0_i32, %c0_i32_0 : i32, i32, i32
  }
  func.func @transform_1(%arg0: i32) -> (i32, i32) {
    %c0_i32 = arith.constant 0 : i32
    %c0_i32_0 = arith.constant 0 : i32
    %c0_i32_1 = arith.constant 0 : i32
    return %c0_i32, %c0_i32_0 : i32, i32
  }
  func.func @transform_2(%arg0: i32) -> (i32, i32) {
    %c0_i32 = arith.constant 0 : i32
    %c0_i32_0 = arith.constant 0 : i32
    %c0_i32_1 = arith.constant 0 : i32
    return %c0_i32, %c0_i32_0 : i32, i32
  }
  func.func @transform_3(%arg0: i32) -> (i32, i32) {
    %c0_i32 = arith.constant 0 : i32
    %c0_i32_0 = arith.constant 0 : i32
    %c0_i32_1 = arith.constant 0 : i32
    return %c0_i32, %c0_i32_0 : i32, i32
  }
  func.func @transform_4(%arg0: i32) -> (i32, i32) {
    %c0_i32 = arith.constant 0 : i32
    %c0_i32_0 = arith.constant 0 : i32
    %c0_i32_1 = arith.constant 0 : i32
    return %c0_i32, %c0_i32_0 : i32, i32
  }
  func.func @transform_5(%arg0: i32) -> (i32, i32) {
    %c0_i32 = arith.constant 0 : i32
    %c0_i32_0 = arith.constant 0 : i32
    %c0_i32_1 = arith.constant 0 : i32
    return %c0_i32, %c0_i32_0 : i32, i32
  }
  func.func @transform_6(%arg0: i32) -> (i32, i32) {
    %c0_i32 = arith.constant 0 : i32
    %c0_i32_0 = arith.constant 0 : i32
    %c0_i32_1 = arith.constant 0 : i32
    return %c0_i32, %c0_i32_0 : i32, i32
  }
  func.func @transform_7(%arg0: i32) -> (i32, i32) {
    %c0_i32 = arith.constant 0 : i32
    %c0_i32_0 = arith.constant 0 : i32
    %c0_i32_1 = arith.constant 0 : i32
    return %c0_i32, %c0_i32_0 : i32, i32
  }
  func.func @transform_8(%arg0: i32) -> (i32, i32) {
    %c0_i32 = arith.constant 0 : i32
    %c0_i32_0 = arith.constant 0 : i32
    %c0_i32_1 = arith.constant 0 : i32
    return %c0_i32, %c0_i32_0 : i32, i32
  }
  func.func @transform_9(%arg0: i32) -> (i32, i32) {
    %c0_i32 = arith.constant 0 : i32
    %c0_i32_0 = arith.constant 0 : i32
    %c0_i32_1 = arith.constant 0 : i32
    return %c0_i32, %c0_i32_0 : i32, i32
  }
  func.func @transform_10(%arg0: i32) -> (i32, i32, i32) {
    %c0_i32 = arith.constant 0 : i32
    %c0_i32_0 = arith.constant 0 : i32
    %c0_i32_1 = arith.constant 0 : i32
    return %arg0, %c0_i32, %c0_i32_0 : i32, i32, i32
  }
}

</mosaic_0001>

<bundles_post_ra>
// kernel: mbconv_forward.1
= control target key start
LH: loop header
LB: loop body
LE: loop exit
PB: predicated region body
PF: predicated region fallthrough
CT: control target
= control target key end

     0   :  { %v7120_v3 = vmov 0.0   ;;  %vm7195_vm0 = vcmask 64512   ;;  %v7138_v8 = vmov 0   ;;  %v3662_v17 = vmov 5   ;;  %s3672_s26 = smov 16   ;;  %s3673_s27 = smov 17   ;;  %s7109_s0 = inlined_call_operand.vmem [shape: f32[1,8,512], index: 0, kind: input, shape index: {}]   ;;  %s7110_s1 = inlined_call_operand.vmem [shape: f32[48,8], index: 1, kind: input, shape index: {}]   ;;  %s7111_s2 = inlined_call_operand.vmem [shape: f32[48,16], index: 2, kind: input, shape index: {}]   ;;  %s7112_s9 = inlined_call_operand.vmem [shape: s32[2,512], index: 9, kind: input, shape index: {}]   ;;  %s7113_s8 = inlined_call_operand.vmem [shape: f32[512,8], index: 8, kind: input, shape index: {}]   ;;  %s7114_s4 = inlined_call_operand.vmem [shape: f32[8,1], index: 4, kind: input, shape index: {}]   ;;  %s7115_s3 = inlined_call_operand.vmem [shape: f32[8,48], index: 3, kind: input, shape index: {}]   ;;  %s7116_s5 = inlined_call_operand.vmem [shape: f32[48,8], index: 5, kind: input, shape index: {}]   ;;  %s7117_s7 = inlined_call_operand.vmem [shape: f32[8,512], index: 7, kind: input, shape index: {}]   ;;  %s7118_s6 = inlined_call_operand.vmem [shape: f32[8,48], index: 6, kind: input, shape index: {}]   ;;  %s7119_s10 = inlined_call_operand.vmem [shape: f32[1,8,512], index: 10, kind: output, shape index: {}]  }
   0x1   :  { %v36_v0 = vld [vmem:[%s7109_s0 + $0x8] sm:$0xff]  ;;  %v38_v1 = vld [vmem:[%s7109_s0 + $0x18] sm:$0xff]  ;;  %v35_v2 = vld [vmem:[%s7109_s0] sm:$0xff]  ;;  %167 = vmatprep.mubr.f32.mxu0 %v7120_v3  ;;  %268 = vmatprep.mubr.f32.mxu1 %v7120_v3  ;;  %v7136_v18 = vmov 4   ;;  %v7134_v20 = vmov 7   ;;  %v7126_v21 = vmov 11   ;;  %v7140_v57 = vlaneseq }
   0x2   :  { %103 = vmatprep.subr.mxu0 %v36_v0  ;;  %204 = vmatprep.subr.mxu1 %v38_v1  ;;  %v37_v4 = vld [vmem:[%s7109_s0 + $0x10] sm:$0xff]  ;;  %v48_v5 = vld [vmem:[%s7110_s1] sm:$0xff]  ;;  %v49_v7 = vld [vmem:[%s7110_s1 + $0x8] sm:$0xff]  ;;  %v7123_v22 = vmov 6   ;;  %v7132_v23 = vmov 8   ;;  %v7130_v24 = vmov 10  }
   0x3   :  { %104 = vmatpush1.msra.mxu0 %v35_v2  ;;  %205 = vmatpush1.msra.mxu1 %v37_v4  ;;  %v3761_v6 = vld [vmem:[%s7111_s2 + $0x10] sm:$0xff]  ;;  %v3772_v9 = vld [vmem:[%s7111_s2] sm:$0xff]  ;;  %v3782_v10 = vld [vmem:[%s7111_s2 + $0x18] sm:$0xff]  ;;  %v7122_v25 = vmov 9   ;;  %v7128_v26 = vmov 12   ;;  %v7124_v27 = vmov 1  }
   0x4   :  { %3021 = vmatmul.mubr.msk.f32.vlgmr.msra.gmra.mrb[0].mxu0 %vm7195_vm0, %v48_v5  ;;  %3027 = vmatmul.mubr.msk.f32.vlgmr.msra.gmra.mrb[0].mxu1 %vm7195_vm0, %v48_v5  ;;  %v50_v11 = vld [vmem:[%s7110_s1 + $0x10] sm:$0xff]  ;;  %v40_v12 = vld [vmem:[%s7111_s2 + $0x8] sm:$0xff]  ;;  %v43_v14 = vld [vmem:[%s7111_s2 + $0x20] sm:$0xff]  ;;  %v476_v2 = vshrl.u32 %v7140_v57, 7  ;;  %s3674_s28 = smov 112   ;;  %s3675_s29 = smov 1  }
   0x5   :  { %173 = vmatprep.mubr.f32.mxu0 %v7120_v3  ;;  %274 = vmatprep.mubr.f32.mxu1 %v7120_v3  ;;  %v44_v13 = vld [vmem:[%s7111_s2 + $0x28] sm:$0xff]  ;;  %v51_v15 = vld [vmem:[%s7110_s1 + $0x18] sm:$0xff]  ;;  %v52_v16 = vld [vmem:[%s7110_s1 + $0x20] sm:$0xff]  ;;  %s3676_s30 = smov 15   ;;  %s3677_s11 = smov 113  }
   0x6   :  { %3373 = vset.pattern.permute.xlu1 %v7138_v8  ;;  %3372 = vset.pattern.permute.xlu0 %v7138_v8  ;;  %v53_v19 = vld [vmem:[%s7110_s1 + $0x28] sm:$0xff]  ;;  %v3917_v61 = vld [vmem:[%s7112_s9 + $0x1] ss:$2 sm:$0xf]  ;;  %s3678_s12 = smov 127   ;;  %s3679_s13 = smov 111  }
   0x7   :  { %66 = vperm.xlu1 %3373, %v3761_v6   ;;  %56 = vperm.xlu0 %3372, %v3772_v9   ;;  %vm519_vm1 = vcmp.lt.s32.totalorder %v3917_v61, 15  ;;  %vm473_vm4 = vcmp.gt.s32.totalorder %v3917_v61, 0  ;;  %v2131_v57 = vld [vmem:[%s7113_s8 + $0x180] sm:$0xff] }
   0x8   :  { %3022 = vmatmul.mubr.msk.f32.gmra.mrb[2].mxu0 %vm7195_vm0, %v49_v7  ;;  %3028 = vmatmul.mubr.msk.f32.gmra.mrb[2].mxu1 %vm7195_vm0, %v49_v7 }
   0x9   :  { %179 = vmatprep.mubr.f32.mxu0 %v7120_v3  ;;  %280 = vmatprep.mubr.f32.mxu1 %v7120_v3 }
   0xb   :  { %71 = vperm.xlu1 %3373, %v3782_v10   ;;  %61 = vperm.xlu0 %3372, %v40_v12  }
   0xc   :  { %3023 = vmatmul.mubr.msk.f32.gmra.mrb[4].mxu0 %vm7195_vm0, %v50_v11  ;;  %3029 = vmatmul.mubr.msk.f32.gmra.mrb[4].mxu1 %vm7195_vm0, %v50_v11 }
   0xd   :  { %185 = vmatprep.mubr.f32.mxu0 %v7120_v3  ;;  %286 = vmatprep.mubr.f32.mxu1 %v7120_v3 }
   0xf   :  { %81 = vperm.xlu1 %3373, %v44_v13   ;;  %76 = vperm.xlu0 %3372, %v43_v14  }
  0x10   :  { %3024 = vmatmul.mubr.msk.f32.gmra.mrb[6].mxu0 %vm7195_vm0, %v51_v15  ;;  %3030 = vmatmul.mubr.msk.f32.gmra.mrb[6].mxu1 %vm7195_vm0, %v51_v15  ;;  %v3933_v15 = vsub.s32 0, %v476_v2 }
  0x11   :  { %191 = vmatprep.mubr.f32.mxu0 %v7120_v3  ;;  %292 = vmatprep.mubr.f32.mxu1 %v7120_v3 }
  0x13   :  { %3375 = vset.pattern.permute.xlu1 %v3662_v17  ;;  %3374 = vset.pattern.permute.xlu0 %v7136_v18 }
  0x14   :  { %3025 = vmatmul.mubr.msk.f32.gmra.mrb[8].mxu0 %vm7195_vm0, %v52_v16  ;;  %3031 = vmatmul.mubr.msk.f32.gmra.mrb[8].mxu1 %vm7195_vm0, %v52_v16 }
  0x15   :  { %197 = vmatprep.mubr.f32.mxu0 %v7120_v3  ;;  %298 = vmatprep.mubr.f32.mxu1 %v7120_v3  ;;  %v7354_v3 = vmov 0 }
  0x16   :  { %762 = vperm.xlu1 %3375, %v3772_v9   ;;  %641 = vperm.xlu0 %3374, %v3772_v9  }
  0x18   :  { %3026 = vmatmul.mubr.msk.f32.gmra.mrb[10].mxu0 %vm7195_vm0, %v53_v19  ;;  %3032 = vmatmul.mubr.msk.f32.gmra.mrb[10].mxu1 %vm7195_vm0, %v53_v19 }
  0x1a   :  { %3376 = vset.pattern.permute.xlu1 %v7134_v20  ;;  %3379 = vset.pattern.permute.xlu0 %v7126_v21 }
  0x1b   :  { %1098 = vperm.xlu1 %3376, %v3772_v9   ;;  %1581 = vperm.xlu0 %3379, %v3772_v9  }
  0x1f   :  { %3377 = vset.pattern.permute.xlu1 %v7123_v22  ;;  %3380 = vset.pattern.permute.xlu0 %v7132_v23 }
  0x20   :  { %907 = vperm.xlu1 %3377, %v3772_v9   ;;  %1146 = vperm.xlu0 %3380, %v3772_v9  }
  0x24   :  { %3378 = vset.pattern.permute.xlu1 %v7130_v24  ;;  %1150 = vperm.xlu0 %3380, %v40_v12  }
  0x25   :  { %1460 = vperm.xlu1 %3378, %v3772_v9  }
  0x28   :  { %3385 = vset.pattern.permute.xlu0 %v3662_v17 }
  0x29   :  { %3381 = vset.pattern.permute.xlu1 %v7122_v25  ;;  %766 = vperm.xlu0 %3385, %v40_v12  }
  0x2a   :  { %1291 = vperm.xlu1 %3381, %v3772_v9  }
  0x2d   :  { %774 = vperm.xlu0 %3385, %v3782_v10  }
  0x2e   :  { %3382 = vset.pattern.permute.xlu1 %v7136_v18 }
  0x2f   :  { %645 = vperm.xlu1 %3382, %v40_v12  }
  0x33   :  { %3383 = vset.pattern.permute.xlu1 %v7128_v26 }
  0x34   :  { %1726 = vperm.xlu1 %3383, %v3772_v9  }
  0x38   :  { %3384 = vset.pattern.permute.xlu1 %v7134_v20 }
  0x39   :  { %1102 = vperm.xlu1 %3384, %v40_v12  }
  0x3d   :  { %3386 = vset.pattern.permute.xlu1 %v7130_v24 }
  0x3e   :  { %1464 = vperm.xlu1 %3386, %v40_v12  }
  0x42   :  { %3387 = vset.pattern.permute.xlu1 %v7126_v21 }
  0x43   :  { %1585 = vperm.xlu1 %3387, %v40_v12  }
  0x47   :  { %3388 = vset.pattern.permute.xlu1 %v7136_v18 }
  0x48   :  { %649 = vperm.xlu1 %3388, %v3761_v6  }
  0x4c   :  { %3389 = vset.pattern.permute.xlu1 %v3662_v17 }
  0x4d   :  { %770 = vperm.xlu1 %3389, %v3761_v6  }
  0x51   :  { %3390 = vset.pattern.permute.xlu1 %v7134_v20 }
  0x52   :  { %1106 = vperm.xlu1 %3390, %v3761_v6  }
  0x56   :  { %3391 = vset.pattern.permute.xlu1 %v7132_v23 }
  0x57   :  { %1154 = vperm.xlu1 %3391, %v3761_v6  }
  0x5b   :  { %3392 = vset.pattern.permute.xlu1 %v7130_v24 }
  0x5c   :  { %1468 = vperm.xlu1 %3392, %v3761_v6  }
  0x60   :  { %3393 = vset.pattern.permute.xlu1 %v7126_v21 }
  0x61   :  { %1589 = vperm.xlu1 %3393, %v3761_v6  }
  0x65   :  { %3394 = vset.pattern.permute.xlu1 %v7124_v27 }
  0x66   :  { %1868 = vperm.xlu1 %3394, %v3772_v9  }
  0x6a   :  { %3395 = vset.pattern.permute.xlu1 %v7136_v18 }
  0x6b   :  { %653 = vperm.xlu1 %3395, %v3782_v10  }
  0x6f   :  { %3396 = vset.pattern.permute.xlu1 %v7134_v20 }
  0x70   :  { %1110 = vperm.xlu1 %3396, %v3782_v10  }
  0x74   :  { %3397 = vset.pattern.permute.xlu1 %v7132_v23 }
  0x75   :  { %1158 = vperm.xlu1 %3397, %v3782_v10  }
  0x79   :  { %3398 = vset.pattern.permute.xlu1 %v7130_v24 }
  0x7a   :  { %1472 = vperm.xlu1 %3398, %v3782_v10  }
  0x7e   :  { %3399 = vset.pattern.permute.xlu1 %v7126_v21 }
  0x7f   :  { %1593 = vperm.xlu1 %3399, %v3782_v10  }
  0x83   :  { %3400 = vset.pattern.permute.xlu1 %v7124_v27  ;;  %v7358_v27 = vmov 0 }
  0x86   :  { %v3868_v28 = vpop.permute.xlu1 %66  ;;  %v57_v29 = vpop.permute.xlu0 %56 }
  0x8a   :  { %v3878_v38 = vpop.permute.xlu1 %71  ;;  %v3880_v39 = vpop.permute.xlu0 %61 }
  0x8e   :  { %v3904_v54 = vpop.permute.xlu1 %81 }
  0x8f   :  { %7331 = vst [vmem:[#allocation2_spill] sm:$0xff] %v3904_v54  ;;  %v2114_v54 = vld [vmem:[%s7113_s8 + $0xf8] sm:$0xff] }
  0x95   :  { %v3919_v63 = vpop.permute.xlu1 %762 }
  0xd7   :  { %v169_v30 = vpop.f32.mrb[0].mxu0  ;;  %v270_v31 = vpop.f32.mrb[0].mxu1 }
  0xd8   :  { %v3870_v32 = vadd.f32 %v169_v30, %v57_v29  ;;  %v3872_v33 = vadd.f32 %v270_v31, %v57_v29  ;;  %v171_v34 = vpop.f32.mrb[1].mxu0  ;;  %v272_v35 = vpop.f32.mrb[1].mxu1 }
  0xd9   :  { %v3874_v36 = vadd.f32 %v171_v34, %v57_v29  ;;  %v3876_v37 = vadd.f32 %v272_v35, %v57_v29  ;;  %v520_v29 = vsel %vm519_vm1, 1, %v7138_v8  ;;  %v3940_v30 = vpop.permute.xlu1 %1098 }
  0xda   :  { %v3033_v40 = vmul.f32 -1.442695, %v3870_v32  ;;  %v3035_v41 = vmul.f32 -1.442695, %v3872_v33  ;;  %v524_v34 = vrot.slane %v520_v29, %v3933_v15 }
  0xdb   :  { %v3034_v42 = vmul.f32 -1.442695, %v3874_v36  ;;  %v3036_v43 = vmul.f32 -1.442695, %v3876_v37  ;;  %v175_v44 = vpop.f32.mrb[2].mxu0  ;;  %v3886_v45 = vpop.f32.mrb[2].mxu1 }
  0xdc   :  { %3423 = vpow2.f32 %v3033_v40  ;;  %v3889_v46 = vadd.f32 %v175_v44, %v3880_v39  ;;  %v3891_v47 = vpop.f32.mrb[3].mxu0  ;;  %v3893_v48 = vpop.f32.mrb[3].mxu1  ;;  %vm3947_vm2 = vcmp.eq.s32.totalorder %v524_v34, 1 }
  0xdd   :  { %3425 = vpow2.f32 %v3035_v41  ;;  %v3945_v40 = vpop.permute.xlu1 %907  ;;  %v7340_v41 = vmov 0  ;;  %v279_v23 = vadd.f32 %v3893_v48, %v3880_v39 }
  0xde   :  { %3427 = vpow2.f32 %v3034_v42  ;;  %v3037_v49 = vmul.f32 -1.442695, %v3889_v46  ;;  %v7341_v41 = vsel %vm3947_vm2, 4294967295, %v7340_v41 }
  0xdf   :  { %3429 = vpow2.f32 %v3036_v43  ;;  %v3896_v50 = vpop.f32.mrb[4].mxu0  ;;  %v3898_v51 = vpop.f32.mrb[4].mxu1  ;;  %7342 = vst [vmem:[#allocation11_spill] sm:$0xff] %v7341_v41  ;;  %v3040_v18 = vmul.f32 -1.442695, %v279_v23 }
  0xe0   :  { %3431 = vpow2.f32 %v3037_v49  ;;  %v3900_v52 = vpop.f32.mrb[5].mxu0  ;;  %v3902_v53 = vpop.f32.mrb[5].mxu1 }
  0xe3   :  { %v3906_v55 = vpop.f32.mrb[6].mxu0  ;;  %v3908_v56 = vpop.f32.mrb[6].mxu1 }
  0xe4   :  { %v3910_v58 = vpop.f32.mrb[7].mxu0  ;;  %v3912_v59 = vpop.f32.mrb[7].mxu1 }
  0xe6   :  { %v3424_v60 = vpop.eup %3423 }
  0xe7   :  { %v3426_v62 = vpop.eup %3425  ;;  %v377_v0 = vadd.f32 1.0, %v3424_v60  ;;  %v3921_v1 = vpop.f32.mrb[8].mxu0 }
  0xe8   :  { %7332 = vst [vmem:[#allocation3_spill] sm:$0xff] %v3921_v1  ;;  %v3428_v4 = vpop.eup %3427  ;;  %v379_v5 = vadd.f32 1.0, %v3426_v62  ;;  %v3924_v6 = vpop.f32.mrb[8].mxu1 }
  0xe9   :  { %7333 = vst [vmem:[#allocation4_spill] sm:$0xff] %v3924_v6  ;;  %v3926_v7 = vpop.f32.mrb[9].mxu0  ;;  %v3430_v9 = vpop.eup %3429  ;;  %3433 = vrcp.f32 %v377_v0  ;;  %v378_v10 = vadd.f32 1.0, %v3428_v4 }
  0xea   :  { %7334 = vst [vmem:[#allocation5_spill] sm:$0xff] %v3926_v7  ;;  %v3928_v11 = vpop.f32.mrb[9].mxu1  ;;  %v3432_v12 = vpop.eup %3431  ;;  %3435 = vrcp.f32 %v379_v5  ;;  %v380_v16 = vadd.f32 1.0, %v3430_v9  ;;  %v3976_v9 = vsub.s32 2, %v476_v2  ;;  %v7394_v7 = vlaneseq }
  0xeb   :  { %7335 = vst [vmem:[#allocation6_spill] sm:$0xff] %v3928_v11  ;;  %v381_v13 = vadd.f32 1.0, %v3432_v12  ;;  %v3931_v14 = vpop.f32.mrb[10].mxu0  ;;  %3437 = vrcp.f32 %v378_v10  ;;  %v3935_v17 = vpop.f32.mrb[10].mxu1  ;;  %v3995_v12 = vsub.s32 1, %v476_v2  ;;  %v2145_v11 = vld [vmem:[%s7113_s8 + $0x1f0] sm:$0xff] }
  0xec   :  { %7336 = vst [vmem:[#allocation7_spill] sm:$0xff] %v3931_v14  ;;  %7337 = vst [vmem:[#allocation8_spill] sm:$0xff] %v3935_v17  ;;  %v3937_v19 = vpop.f32.mrb[11].mxu0  ;;  %v3942_v31 = vpop.f32.mrb[11].mxu1  ;;  %v2111_v17 = vld [vmem:[%s7113_s8 + $0xe0] sm:$0xff]  ;;  %v2141_v14 = vld [vmem:[%s7113_s8 + $0x1d0] sm:$0xff] }
  0xed   :  { %7338 = vst [vmem:[#allocation9_spill] sm:$0xff] %v3937_v19  ;;  %3439 = vrcp.f32 %v381_v13  ;;  %7339 = vst [vmem:[#allocation10_spill] sm:$0xff] %v3942_v31  ;;  %v3969_v0 = vpop.permute.xlu1 %1460  ;;  %v7344_v13 = vmov 0  ;;  %v2094_v31 = vld [vmem:[%s7113_s8 + $0x58] sm:$0xff]  ;;  %v4558_v6 = vand.u32 127, %v7394_v7 }
  0xee   :  { %3441 = vrcp.f32 %v380_v16  ;;  %v4006_v16 = vsub.s32 3, %v476_v2 }
  0xef   :  { %vm7200_vm13 = vcmp.lt.s32.totalorder %v4558_v6, 17  ;;  %vm7201_vm14 = vcmp.lt.s32.totalorder %v4558_v6, 16  ;;  %vm7199_vm15 = vcmp.lt.s32.totalorder %v4558_v6, 15  ;;  %vm7198_vm1 = vcmp.lt.s32.totalorder %v4558_v6, 1 }
  0xf0   :  { %v536_v2 = vrot.slane %v520_v29, %v4006_v16 }
  0xf2   :  { %vm4032_vm6 = vcmp.eq.s32.totalorder %v536_v2, 1 }
  0xf3   :  { %v3434_v35 = vpop.eup %3433 }
  0xf4   :  { %v3952_v42 = vmul.f32 %v3434_v35, %v3870_v32  ;;  %v3436_v43 = vpop.eup %3435 }
  0xf5   :  { %v3438_v44 = vpop.eup %3437  ;;  %v3964_v62 = vmul.f32 %v3436_v43, %v3872_v33  ;;  %v7348_v43 = vmov 0 }
  0xf6   :  { %688 = vrot.lane.b32.xlu0 %v3952_v42, %s3672_s26  ;;  %v3959_v49 = vsel %vm3947_vm2, %v3952_v42, 0.0  ;;  %v3972_v4 = vmul.f32 %v3438_v44, %v3874_v36  ;;  %v532_v36 = vrot.slane %v520_v29, %v3976_v9  ;;  %v474_v44 = vsel %vm473_vm4, 1, %v7138_v8 }
  0xf7   :  { %v3440_v60 = vpop.eup %3439  ;;  %565 = vrot.lane.b32.xlu1 %v3959_v49, %s3673_s27  ;;  %v486_v25 = vrot.slane %v474_v44, %v3976_v9  ;;  %v482_v21 = vrot.slane %v474_v44, %v3995_v12  ;;  %v490_v20 = vrot.slane %v474_v44, %v4006_v16  ;;  %vm7196_vm4 = vcmp.lt.s32.totalorder %v4558_v6, 112 }
  0xf8   :  { %v3967_v32 = vmul.f32 %v3440_v60, %v3889_v46  ;;  %v3442_v5 = vpop.eup %3441  ;;  %v3991_v46 = vpop.permute.xlu1 %1291  ;;  %vm3999_vm3 = vcmp.eq.s32.totalorder %v532_v36, 1  ;;  %v478_v60 = vrot.slane %v474_v44, %v3933_v15  ;;  %v7351_v36 = vmov 0 }
  0xf9   :  { %v3986_v33 = vmul.f32 %v3442_v5, %v3876_v37  ;;  %v7345_v13 = vsel %vm3999_vm3, 4294967295, %v7344_v13  ;;  %v528_v37 = vrot.slane %v520_v29, %v3995_v12  ;;  %v543_v35 = vsel %vm3999_vm3, %v3964_v62, 0.0 }
  0xfa   :  { %7343 = vst [vmem:[#allocation12_spill] sm:$0xff] %v3967_v32  ;;  %712 = vrot.lane.b32.xlu0 %v3964_v62, %s3672_s26  ;;  %v3981_v10 = vsel %vm3947_vm2, %v3967_v32, 0.0  ;;  %7346 = vst [vmem:[#allocation13_spill] sm:$0xff] %v7345_v13  ;;  %v7352_v36 = vsel %vm4032_vm6, 4294967295, %v7351_v36  ;;  %v277_v29 = vadd.f32 %v3886_v45, %v3880_v39  ;;  %vm4042_vm7 = vcmp.eq.s32.totalorder %v478_v60, 1 }
  0xfb   :  { %700 = vrot.lane.b32.xlu1 %v3972_v4, %s3672_s26  ;;  %vm4017_vm5 = vcmp.eq.s32.totalorder %v528_v37, 1  ;;  %7353 = vst [vmem:[#allocation16_spill] sm:$0xff] %v7352_v36  ;;  %v544_v37 = vsel %vm4032_vm6, %v3986_v33, 0.0  ;;  %v7355_v3 = vsel %vm4042_vm7, 4294967295, %v7354_v3  ;;  %v495_v45 = vsel %vm4042_vm7, %v3952_v42, 0.0 }
  0xfc   :  { %v4009_v34 = vpop.permute.xlu1 %645  ;;  %v7349_v43 = vsel %vm4017_vm5, 4294967295, %v7348_v43  ;;  %v542_v61 = vsel %vm4017_vm5, %v3972_v4, 0.0  ;;  %7356 = vst [vmem:[#allocation17_spill] sm:$0xff] %v7355_v3  ;;  %v3039_v22 = vmul.f32 -1.442695, %v277_v29  ;;  %vm4054_vm8 = vcmp.eq.s32.totalorder %v486_v25, 1 }
  0xfd   :  { %7347 = vst [vmem:[#allocation14_spill] sm:$0xff] %v4009_v34  ;;  %7350 = vst [vmem:[#allocation15_spill] sm:$0xff] %v7349_v43  ;;  %v7359_v27 = vsel %vm4054_vm8, 4294967295, %v7358_v27  ;;  %v178_v60 = vadd.f32 %v3891_v47, %v3880_v39  ;;  %v497_v26 = vsel %vm4054_vm8, %v3964_v62, 0.0  ;;  %vm4071_vm9 = vcmp.eq.s32.totalorder %v482_v21, 1  ;;  %v2091_v34 = vld [vmem:[%s7113_s8 + $0x40] sm:$0xff] }
  0xfe   :  { %1507 = vrot.lane.b32.xlu0 %v3952_v42, %s3674_s28  ;;  %7360 = vst [vmem:[#allocation19_spill] sm:$0xff] %v7359_v27  ;;  %3443 = vpow2.f32 %v3039_v22  ;;  %v7362_v47 = vmov 0  ;;  %v496_v22 = vsel %vm4071_vm9, %v3972_v4, 0.0  ;;  %vm4082_vm10 = vcmp.eq.s32.totalorder %v490_v20, 1 }
  0xff   :  { %724 = vrot.lane.b32.xlu1 %v3986_v33, %s3672_s26  ;;  %v3038_v25 = vmul.f32 -1.442695, %v178_v60  ;;  %v7363_v47 = vsel %vm4071_vm9, 4294967295, %v7362_v47  ;;  %v7365_v39 = vmov 0  ;;  %v498_v48 = vsel %vm4082_vm10, %v3986_v33, 0.0 }
 0x100   :  { %v4029_v5 = vpop.permute.xlu1 %1726  ;;  %7364 = vst [vmem:[#allocation21_spill] sm:$0xff] %v7363_v47  ;;  %v7366_v39 = vsel %vm4082_vm10, 4294967295, %v7365_v39 }
 0x101   :  { %3445 = vpow2.f32 %v3038_v25  ;;  %7367 = vst [vmem:[#allocation22_spill] sm:$0xff] %v7366_v39 }
 0x102   :  { %1531 = vrot.lane.b32.xlu0 %v3964_v62, %s3674_s28  ;;  %3447 = vpow2.f32 %v3040_v18 }
 0x103   :  { %1519 = vrot.lane.b32.xlu1 %v3972_v4, %s3674_s28 }
 0x104   :  { %v4048_v2 = vpop.permute.xlu1 %1102 }
 0x105   :  { %7357 = vst [vmem:[#allocation18_spill] sm:$0xff] %v4048_v2  ;;  %v4232_v2 = vadd.f32 %v3896_v50, %v3868_v28  ;;  %v2108_v50 = vld [vmem:[%s7113_s8 + $0xc8] sm:$0xff] }
 0x106   :  { %589 = vrot.lane.b32.xlu0 %v543_v35, %s3673_s27 }
 0x107   :  { %1543 = vrot.lane.b32.xlu1 %v3986_v33, %s3674_s28 }
 0x108   :  { %v4066_v24 = vpop.permute.xlu1 %1464 }
 0x109   :  { %7361 = vst [vmem:[#allocation20_spill] sm:$0xff] %v4066_v24  ;;  %v2106_v24 = vld [vmem:[%s7113_s8 + $0xb8] sm:$0xff] }
 0x10a   :  { %1024 = vrot.lane.b32.xlu0 %v3959_v49, %s3675_s29 }
 0x10b   :  { %577 = vrot.lane.b32.xlu1 %v542_v61, %s3673_s27 }
 0x10c   :  { %v4086_v21 = vpop.permute.xlu1 %1585 }
 0x10d   :  { %7368 = vst [vmem:[#allocation23_spill] sm:$0xff] %v4086_v21  ;;  %v2119_v21 = vld [vmem:[%s7113_s8 + $0x120] sm:$0xff] }
 0x10e   :  { %1048 = vrot.lane.b32.xlu0 %v543_v35, %s3675_s29 }
 0x10f   :  { %601 = vrot.lane.b32.xlu1 %v544_v37, %s3673_s27 }
 0x110   :  { %v4094_v20 = vpop.permute.xlu1 %649 }
 0x111   :  { %7369 = vst [vmem:[#allocation24_spill] sm:$0xff] %v4094_v20 }
 0x112   :  { %833 = vrot.lane.b32.xlu0 %v495_v45, %s3676_s30 }
 0x113   :  { %1036 = vrot.lane.b32.xlu1 %v542_v61, %s3675_s29 }
 0x114   :  { %v4099_v18 = vpop.permute.xlu1 %770 }
 0x115   :  { %7370 = vst [vmem:[#allocation25_spill] sm:$0xff] %v4099_v18  ;;  %v2103_v18 = vld [vmem:[%s7113_s8 + $0xa0] sm:$0xff] }
 0x116   :  { %857 = vrot.lane.b32.xlu0 %v497_v26, %s3676_s30 }
 0x117   :  { %1060 = vrot.lane.b32.xlu1 %v544_v37, %s3675_s29 }
 0x11a   :  { %1386 = vrot.lane.b32.xlu0 %v3959_v49, %s3677_s11  ;;  %v3444_v49 = vpop.eup %3443 }
 0x11b   :  { %845 = vrot.lane.b32.xlu1 %v496_v22, %s3676_s30  ;;  %v383_v44 = vadd.f32 1.0, %v3444_v49  ;;  %v3446_v25 = vpop.eup %3445 }
 0x11c   :  { %v3448_v8 = vpop.eup %3447 }
 0x11d   :  { %3449 = vrcp.f32 %v383_v44  ;;  %v384_v49 = vadd.f32 1.0, %v3448_v8 }
 0x11e   :  { %1410 = vrot.lane.b32.xlu0 %v543_v35, %s3677_s11  ;;  %v382_v35 = vadd.f32 1.0, %v3446_v25 }
 0x11f   :  { %869 = vrot.lane.b32.xlu1 %v498_v48, %s3676_s30 }
 0x120   :  { %3451 = vrcp.f32 %v382_v35 }
 0x121   :  { %3453 = vrcp.f32 %v384_v49  ;;  %v2083_v49 = vld [vmem:[%s7113_s8] sm:$0xff] }
 0x122   :  { %1217 = vrot.lane.b32.xlu0 %v495_v45, %s3678_s12 }
 0x123   :  { %1398 = vrot.lane.b32.xlu1 %v542_v61, %s3677_s11  ;;  %v4104_v61 = vpop.permute.xlu1 %1106 }
 0x124   :  { %7371 = vst [vmem:[#allocation26_spill] sm:$0xff] %v4104_v61 }
 0x126   :  { %1241 = vrot.lane.b32.xlu0 %v497_v26, %s3678_s12 }
 0x127   :  { %1422 = vrot.lane.b32.xlu1 %v544_v37, %s3677_s11  ;;  %v3450_v44 = vpop.eup %3449 }
 0x128   :  { %v4110_v37 = vmul.f32 %v3450_v44, %v277_v29 }
 0x12a   :  { %1652 = vrot.lane.b32.xlu0 %v495_v45, %s3679_s13  ;;  %7372 = vst [vmem:[#allocation27_spill] sm:$0xff] %v4110_v37  ;;  %v4112_v45 = vpop.permute.xlu1 %1154  ;;  %v3452_v25 = vpop.eup %3451 }
 0x12b   :  { %1229 = vrot.lane.b32.xlu1 %v496_v22, %s3678_s12  ;;  %7373 = vst [vmem:[#allocation28_spill] sm:$0xff] %v4112_v45  ;;  %v4117_v8 = vmul.f32 %v3452_v25, %v178_v60  ;;  %v3454_v29 = vpop.eup %3453  ;;  %v2084_v60 = vld [vmem:[%s7113_s8 + $0x8] sm:$0xff] }
 0x12c   :  { %v3251_v44 = vpack.c.bf16 %v2084_v60, %v2083_v49  ;;  %v4137_v25 = vmul.f32 %v3454_v29, %v279_v23  ;;  %v2132_v23 = vld [vmem:[%s7113_s8 + $0x188] sm:$0xff]  ;;  %v2085_v29 = vld [vmem:[%s7113_s8 + $0x10] sm:$0xff] }
 0x12d   :  { %7374 = vst [vmem:[#allocation29_spill] sm:$0xff] %v4117_v8  ;;  %v3281_v60 = vpack.c.bf16 %v2132_v23, %v2131_v57  ;;  %v2104_v57 = vld [vmem:[%s7113_s8 + $0xa8] sm:$0xff]  ;;  %v2133_v23 = vld [vmem:[%s7113_s8 + $0x190] sm:$0xff] }
 0x12e   :  { %1676 = vrot.lane.b32.xlu0 %v497_v26, %s3679_s13  ;;  %v2099_v26 = vld [vmem:[%s7113_s8 + $0x80] sm:$0xff]  ;;  %7376 = vst [vmem:[#allocation31_spill] sm:$0xff] %v4137_v25 }
 0x12f   :  { %1253 = vrot.lane.b32.xlu1 %v498_v48, %s3678_s12  ;;  %3282 = vmatprep.subr.bf16.mxu1 %v3281_v60  ;;  %v2134_v60 = vld [vmem:[%s7113_s8 + $0x198] sm:$0xff] }
 0x132   :  { %690 = vrot.lane.b32.xlu0 %v3967_v32, %s3672_s26 }
 0x133   :  { %1664 = vrot.lane.b32.xlu1 %v496_v22, %s3679_s13  ;;  %v2100_v22 = vld [vmem:[%s7113_s8 + $0x88] sm:$0xff] }
 0x134   :  { %v3249_v35 = vpack.c.bf16 %v2100_v22, %v2099_v26  ;;  %v2101_v26 = vld [vmem:[%s7113_s8 + $0x90] sm:$0xff]  ;;  %v2102_v22 = vld [vmem:[%s7113_s8 + $0x98] sm:$0xff] }
 0x135   :  { %v3253_v49 = vpack.c.bf16 %v2102_v22, %v2101_v26  ;;  %v2115_v26 = vld [vmem:[%s7113_s8 + $0x100] sm:$0xff]  ;;  %v2116_v22 = vld [vmem:[%s7113_s8 + $0x108] sm:$0xff] }
 0x136   :  { %714 = vrot.lane.b32.xlu0 %v4110_v37, %s3672_s26  ;;  %3250 = vmatprep.subr.bf16.mxu0 %v3249_v35  ;;  %v2086_v35 = vld [vmem:[%s7113_s8 + $0x18] sm:$0xff] }
 0x137   :  { %1688 = vrot.lane.b32.xlu1 %v498_v48, %s3679_s13  ;;  %v4133_v48 = vpop.permute.xlu1 %1468  ;;  %3252 = vmatpush3.bf16.msra.mxu0 %v3251_v44  ;;  %v3255_v44 = vpack.c.bf16 %v2086_v35, %v2085_v29  ;;  %v4178_v29 = vpop.permute.xlu0 %76  ;;  %v3257_v35 = vpack.c.bf16 %v2104_v57, %v2103_v18  ;;  %v2117_v18 = vld [vmem:[%s7113_s8 + $0x110] sm:$0xff] }
 0x138   :  { %7375 = vst [vmem:[#allocation30_spill] sm:$0xff] %v4133_v48  ;;  %3254 = vmatprep.subr.bf16.mxu0 %v3253_v49  ;;  %v3283_v48 = vpack.c.bf16 %v2116_v22, %v2115_v26  ;;  %7378 = vst [vmem:[#allocation33_spill] sm:$0xff] %v4178_v29  ;;  %v4185_v49 = vsel %vm4042_vm7, %v3967_v32, 0.0  ;;  %v2088_v26 = vld [vmem:[%s7113_s8 + $0x28] sm:$0xff]  ;;  %v3285_v22 = vpack.c.bf16 %v2134_v60, %v2133_v23  ;;  %v2105_v57 = vld [vmem:[%s7113_s8 + $0xb0] sm:$0xff] }
 0x139   :  { %v2135_v23 = vld [vmem:[%s7113_s8 + $0x1a0] sm:$0xff]  ;;  %v2136_v60 = vld [vmem:[%s7113_s8 + $0x1a8] sm:$0xff] }
 0x13a   :  { %1509 = vrot.lane.b32.xlu0 %v3967_v32, %s3674_s28  ;;  %3284 = vmatpush3.bf16.msra.mxu1 %v3283_v48  ;;  %v2118_v48 = vld [vmem:[%s7113_s8 + $0x118] sm:$0xff]  ;;  %v4281_v32 = vadd.f32 %v3898_v51, %v3868_v28 }
 0x13b   :  { %702 = vrot.lane.b32.xlu1 %v4117_v8, %s3672_s26  ;;  %v4167_v61 = vpop.permute.xlu1 %1589  ;;  %3256 = vmatpush3.bf16.msra.mxu0 %v3255_v44  ;;  %v2087_v44 = vld [vmem:[%s7113_s8 + $0x20] sm:$0xff]  ;;  %v3287_v20 = vpack.c.bf16 %v2118_v48, %v2117_v18  ;;  %v2089_v18 = vld [vmem:[%s7113_s8 + $0x30] sm:$0xff]  ;;  %v2090_v48 = vld [vmem:[%s7113_s8 + $0x38] sm:$0xff] }
 0x13c   :  { %7377 = vst [vmem:[#allocation32_spill] sm:$0xff] %v4167_v61  ;;  %v3259_v61 = vpack.c.bf16 %v2088_v26, %v2087_v44  ;;  %3258 = vmatprep.subr.bf16.mxu0 %v3257_v35  ;;  %v4219_v44 = vsel %vm3999_vm3, %v4110_v37, 0.0  ;;  %3286 = vmatprep.subr.bf16.mxu1 %v3285_v22  ;;  %v3261_v35 = vpack.c.bf16 %v2106_v24, %v2105_v57  ;;  %v4234_v22 = vpop.permute.xlu0 %641  ;;  %v2107_v57 = vld [vmem:[%s7113_s8 + $0xc0] sm:$0xff] }
 0x13d   :  { %v3289_v26 = vpack.c.bf16 %v2136_v60, %v2135_v23  ;;  %v3263_v24 = vpack.c.bf16 %v2090_v48, %v2089_v18  ;;  %v3265_v60 = vpack.c.bf16 %v2108_v50, %v2107_v57  ;;  %v2137_v18 = vld [vmem:[%s7113_s8 + $0x1b0] sm:$0xff]  ;;  %v2138_v48 = vld [vmem:[%s7113_s8 + $0x1b8] sm:$0xff] }
 0x13e   :  { %1533 = vrot.lane.b32.xlu0 %v4110_v37, %s3674_s28  ;;  %3288 = vmatpush3.bf16.msra.mxu1 %v3287_v20  ;;  %v3293_v45 = vpack.c.bf16 %v2138_v48, %v2137_v18  ;;  %v2109_v50 = vld [vmem:[%s7113_s8 + $0xd0] sm:$0xff]  ;;  %v2139_v18 = vld [vmem:[%s7113_s8 + $0x1c0] sm:$0xff]  ;;  %v3041_v48 = vmul.f32 -1.442695, %v4232_v2 }
 0x13f   :  { %726 = vrot.lane.b32.xlu1 %v4137_v25, %s3672_s26  ;;  %3260 = vmatpush3.bf16.msra.mxu0 %v3259_v61  ;;  %v2120_v61 = vld [vmem:[%s7113_s8 + $0x128] sm:$0xff]  ;;  %v4247_v23 = vpop.permute.xlu1 %1868 }
 0x140   :  { %7379 = vst [vmem:[#allocation34_spill] sm:$0xff] %v4247_v23  ;;  %3262 = vmatprep.subr.bf16.mxu0 %v3261_v35  ;;  %v3291_v20 = vpack.c.bf16 %v2120_v61, %v2119_v21  ;;  %3290 = vmatprep.subr.bf16.mxu1 %v3289_v26  ;;  %v2092_v35 = vld [vmem:[%s7113_s8 + $0x48] sm:$0xff]  ;;  %v2121_v21 = vld [vmem:[%s7113_s8 + $0x130] sm:$0xff]  ;;  %v2122_v61 = vld [vmem:[%s7113_s8 + $0x138] sm:$0xff]  ;;  %3455 = vpow2.f32 %v3041_v48 }
 0x141   :  { %v3267_v57 = vpack.c.bf16 %v2092_v35, %v2091_v34  ;;  %v2110_v26 = vld [vmem:[%s7113_s8 + $0xd8] sm:$0xff]  ;;  %v3295_v34 = vpack.c.bf16 %v2122_v61, %v2121_v21  ;;  %v2093_v35 = vld [vmem:[%s7113_s8 + $0x50] sm:$0xff]  ;;  %v2124_v21 = vld [vmem:[%s7113_s8 + $0x148] sm:$0xff]  ;;  %v4302_v61 = vpop.permute.xlu0 %1581 }
 0x142   :  { %567 = vrot.lane.b32.xlu0 %v3981_v10, %s3673_s27  ;;  %3292 = vmatpush3.bf16.msra.mxu1 %v3291_v20  ;;  %v3269_v51 = vpack.c.bf16 %v2110_v26, %v2109_v50  ;;  %v2123_v20 = vld [vmem:[%s7113_s8 + $0x140] sm:$0xff]  ;;  %v3271_v26 = vpack.c.bf16 %v2094_v31, %v2093_v35  ;;  %v2096_v48 = vld [vmem:[%s7113_s8 + $0x68] sm:$0xff] }
 0x143   :  { %835 = vrot.lane.b32.xlu1 %v4185_v49, %s3676_s30  ;;  %3264 = vmatpush3.bf16.msra.mxu0 %v3263_v24  ;;  %v2140_v24 = vld [vmem:[%s7113_s8 + $0x1c8] sm:$0xff]  ;;  %v4310_v50 = vpop.permute.xlu1 %653  ;;  %v3299_v31 = vpack.c.bf16 %v2124_v21, %v2123_v20  ;;  %v2113_v21 = vld [vmem:[%s7113_s8 + $0xf0] sm:$0xff] }
 0x144   :  { %3266 = vmatprep.subr.bf16.mxu0 %v3265_v60  ;;  %3294 = vmatprep.subr.bf16.mxu1 %v3293_v45  ;;  %v3297_v19 = vpack.c.bf16 %v2140_v24, %v2139_v18  ;;  %v2112_v60 = vld [vmem:[%s7113_s8 + $0xe8] sm:$0xff]  ;;  %7380 = vst [vmem:[#allocation35_spill] sm:$0xff] %v4310_v50  ;;  %v2142_v45 = vld [vmem:[%s7113_s8 + $0x1d8] sm:$0xff]  ;;  %v3043_v18 = vmul.f32 -1.442695, %v4281_v32  ;;  %v4324_v24 = vsel %vm4017_vm5, %v4117_v8, 0.0 }
 0x145   :  { %v3273_v35 = vpack.c.bf16 %v2112_v60, %v2111_v17  ;;  %v2125_v50 = vld [vmem:[%s7113_s8 + $0x150] sm:$0xff]  ;;  %v3301_v20 = vpack.c.bf16 %v2142_v45, %v2141_v14  ;;  %v4349_v17 = vsel %vm4054_vm8, %v4110_v37, 0.0  ;;  %v2144_v14 = vld [vmem:[%s7113_s8 + $0x1e8] sm:$0xff]  ;;  %v4357_v60 = vpop.permute.xlu0 %1146  ;;  %v4364_v45 = vsel %vm4032_vm6, %v4137_v25, 0.0 }
 0x146   :  { %591 = vrot.lane.b32.xlu0 %v4219_v44, %s3673_s27  ;;  %3296 = vmatpush3.bf16.msra.mxu1 %v3295_v34  ;;  %v2126_v34 = vld [vmem:[%s7113_s8 + $0x158] sm:$0xff]  ;;  %3457 = vpow2.f32 %v3043_v18  ;;  %v3277_v37 = vpack.c.bf16 %v2114_v54, %v2113_v21 }
 0x147   :  { %1521 = vrot.lane.b32.xlu1 %v4117_v8, %s3674_s28  ;;  %3268 = vmatpush3.bf16.msra.mxu0 %v3267_v57  ;;  %v2095_v57 = vld [vmem:[%s7113_s8 + $0x60] sm:$0xff]  ;;  %v2098_v18 = vld [vmem:[%s7113_s8 + $0x78] sm:$0xff] }
 0x148   :  { %3270 = vmatprep.subr.bf16.mxu0 %v3269_v51  ;;  %3298 = vmatprep.subr.bf16.mxu1 %v3297_v19  ;;  %v3275_v51 = vpack.c.bf16 %v2096_v48, %v2095_v57  ;;  %v2143_v19 = vld [vmem:[%s7113_s8 + $0x1e0] sm:$0xff]  ;;  %v2097_v57 = vld [vmem:[%s7113_s8 + $0x70] sm:$0xff]  ;;  %v4372_v48 = vpop.permute.xlu1 %1110 }
 0x149   :  { %7381 = vst [vmem:[#allocation36_spill] sm:$0xff] %v4372_v48  ;;  %v2146_v48 = vld [vmem:[%s7113_s8 + $0x1f8] sm:$0xff]  ;;  %v3279_v54 = vpack.c.bf16 %v2098_v18, %v2097_v57 }
 0x14a   :  { %1026 = vrot.lane.b32.xlu0 %v3981_v10, %s3675_s29  ;;  %3300 = vmatpush3.bf16.msra.mxu1 %v3299_v31  ;;  %v2127_v31 = vld [vmem:[%s7113_s8 + $0x160] sm:$0xff]  ;;  %v3309_v21 = vpack.c.bf16 %v2146_v48, %v2145_v11  ;;  %v4409_v11 = vadd.f32 %v3902_v53, %v3868_v28 }
 0x14b   :  { %1545 = vrot.lane.b32.xlu1 %v4137_v25, %s3674_s28  ;;  %3272 = vmatpush3.bf16.msra.mxu0 %v3271_v26  ;;  %v3303_v26 = vpack.c.bf16 %v2126_v34, %v2125_v50  ;;  %v2128_v50 = vld [vmem:[%s7113_s8 + $0x168] sm:$0xff]  ;;  %v3305_v34 = vpack.c.bf16 %v2144_v14, %v2143_v19  ;;  %v2129_v19 = vld [vmem:[%s7113_s8 + $0x170] sm:$0xff]  ;;  %v4402_v14 = vpop.permute.xlu0 %1150 }
 0x14c   :  { %3274 = vmatprep.subr.bf16.mxu0 %v3273_v35  ;;  %3302 = vmatprep.subr.bf16.mxu1 %v3301_v20  ;;  %v4390_v35 = vadd.f32 %v3900_v52, %v3868_v28  ;;  %v3307_v20 = vpack.c.bf16 %v2128_v50, %v2127_v31  ;;  %v3456_v52 = vpop.eup %3455  ;;  %7382 = vst [vmem:[#allocation37_spill] sm:$0xff] %v4402_v14  ;;  %v3044_v50 = vmul.f32 -1.442695, %v4409_v11  ;;  %v500_v28 = vsel %vm4071_vm9, %v4117_v8, 0.0 }
 0x14d   :  { %v385_v57 = vadd.f32 1.0, %v3456_v52  ;;  %v4448_v52 = vadd.f32 %v3908_v56, %v3878_v38 }
 0x14e   :  { %1050 = vrot.lane.b32.xlu0 %v4219_v44, %s3675_s29  ;;  %3304 = vmatpush3.bf16.msra.mxu1 %v3303_v26  ;;  %v3042_v26 = vmul.f32 -1.442695, %v4390_v35 }
 0x14f   :  { %579 = vrot.lane.b32.xlu1 %v4324_v24, %s3673_s27  ;;  %3276 = vmatpush3.bf16.msra.mxu0 %v3275_v51  ;;  %v2130_v51 = vld [vmem:[%s7113_s8 + $0x178] sm:$0xff]  ;;  %v4415_v48 = vpop.permute.xlu0 %766  ;;  %v3047_v56 = vmul.f32 -1.442695, %v4448_v52 }
 0x150   :  { %3278 = vmatprep.subr.bf16.mxu0 %v3277_v37  ;;  %3306 = vmatprep.subr.bf16.mxu1 %v3305_v34  ;;  %v3311_v37 = vpack.c.bf16 %v2130_v51, %v2129_v19  ;;  %v3458_v18 = vpop.eup %3457  ;;  %7384 = vst [vmem:[#allocation39_spill] sm:$0xff] %v4415_v48  ;;  %3459 = vpow2.f32 %v3042_v26 }
 0x151   :  { %3461 = vrcp.f32 %v385_v57  ;;  %v387_v53 = vadd.f32 1.0, %v3458_v18 }
 0x152   :  { %859 = vrot.lane.b32.xlu0 %v4349_v17, %s3676_s30  ;;  %3308 = vmatpush3.bf16.msra.mxu1 %v3307_v20  ;;  %3463 = vpow2.f32 %v3044_v50  ;;  %v4440_v20 = vadd.f32 %v3906_v55, %v3878_v38 }
 0x153   :  { %603 = vrot.lane.b32.xlu1 %v4364_v45, %s3673_s27  ;;  %3280 = vmatpush3.bf16.msra.mxu0 %v3279_v54  ;;  %v4431_v34 = vpop.permute.xlu0 %774  ;;  %3465 = vrcp.f32 %v387_v53 }
 0x154   :  { %3310 = vmatprep.subr.bf16.mxu1 %v3309_v21  ;;  %7386 = vst [vmem:[#allocation41_spill] sm:$0xff] %v4431_v34 }
 0x156   :  { %1388 = vrot.lane.b32.xlu0 %v3981_v10, %s3677_s11  ;;  %v4404_v10 = vpop.permute.xlu1 %1158  ;;  %3312 = vmatpush3.bf16.msra.mxu1 %v3311_v37 }
 0x157   :  { %1038 = vrot.lane.b32.xlu1 %v4324_v24, %s3675_s29  ;;  %7383 = vst [vmem:[#allocation38_spill] sm:$0xff] %v4404_v10 }
 0x15a   :  { %1412 = vrot.lane.b32.xlu0 %v4219_v44, %s3677_s11  ;;  %v4417_v31 = vpop.permute.xlu1 %1472  ;;  %v502_v44 = vsel %vm4082_vm10, %v4137_v25, 0.0  ;;  %v3460_v21 = vpop.eup %3459 }
 0x15b   :  { %1062 = vrot.lane.b32.xlu1 %v4364_v45, %s3675_s29  ;;  %7385 = vst [vmem:[#allocation40_spill] sm:$0xff] %v4417_v31  ;;  %v3462_v51 = vpop.eup %3461  ;;  %v386_v37 = vadd.f32 1.0, %v3460_v21 }
 0x15c   :  { %v3464_v55 = vpop.eup %3463 }
 0x15d   :  { %v3466_v18 = vpop.eup %3465 }
 0x15e   :  { %1219 = vrot.lane.b32.xlu0 %v4185_v49, %s3678_s12  ;;  %v4434_v54 = vpop.permute.xlu1 %1593 }
 0x15f   :  { %847 = vrot.lane.b32.xlu1 %v500_v28, %s3676_s30  ;;  %7387 = vst [vmem:[#allocation42_spill] sm:$0xff] %v4434_v54 }
 0x162   :  { %1243 = vrot.lane.b32.xlu0 %v4349_v17, %s3678_s12 }
 0x163   :  { %871 = vrot.lane.b32.xlu1 %v502_v44, %s3676_s30 }
 0x166   :  { %1654 = vrot.lane.b32.xlu0 %v4185_v49, %s3679_s13  ;;  %v3045_v49 = vmul.f32 -1.442695, %v4440_v20 }
 0x167   :  { %1400 = vrot.lane.b32.xlu1 %v4324_v24, %s3677_s11  ;;  %v4458_v24 = vmul.f32 %v3462_v51, %v4232_v2  ;;  %v388_v2 = vadd.f32 1.0, %v3464_v55 }
 0x168   :  { %v4444_v19 = vpop.permute.xlu0 %688  ;;  %3467 = vpow2.f32 %v3045_v49 }
 0x169   :  { %v4450_v26 = vpop.permute.xlu1 %565  ;;  %7388 = vst [vmem:[#allocation43_spill] sm:$0xff] %v4458_v24  ;;  %3469 = vrcp.f32 %v386_v37 }
 0x16a   :  { %1678 = vrot.lane.b32.xlu0 %v4349_v17, %s3679_s13  ;;  %v4469_v17 = vmul.f32 %v3466_v18, %v4281_v32  ;;  %3471 = vpow2.f32 %v3047_v56  ;;  %v549_v32 = vsel %vm3947_vm2, %v4458_v24, 0.0 }
 0x16b   :  { %1424 = vrot.lane.b32.xlu1 %v4364_v45, %s3677_s11  ;;  %3473 = vrcp.f32 %v388_v2 }
 0x16c   :  { %v4460_v57 = vpop.permute.xlu0 %712  ;;  %7389 = vst [vmem:[#allocation44_spill] sm:$0xff] %v4469_v17  ;;  %v4494_v18 = vsel %vm3999_vm3, %v4469_v17, 0.0 }
 0x16d   :  { %v4463_v50 = vpop.permute.xlu1 %700 }
 0x16e   :  { %692 = vrot.lane.b32.xlu0 %v4458_v24, %s3672_s26  ;;  %v743_v39 = vsel %vm7201_vm14, %v4463_v50, %v4460_v57 }
 0x16f   :  { %1231 = vrot.lane.b32.xlu1 %v500_v28, %s3678_s12  ;;  %v787_v13 = vmul.f32 %v3919_v63, %v743_v39 }
 0x170   :  { %v4471_v45 = vpop.permute.xlu0 %1507 }
 0x171   :  { %v4473_v53 = vpop.permute.xlu1 %724 }
 0x172   :  { %716 = vrot.lane.b32.xlu0 %v4469_v17, %s3672_s26  ;;  %v3468_v55 = vpop.eup %3467 }
 0x173   :  { %1255 = vrot.lane.b32.xlu1 %v502_v44, %s3678_s12  ;;  %v3470_v56 = vpop.eup %3469  ;;  %v389_v54 = vadd.f32 1.0, %v3468_v55 }
 0x174   :  { %v4478_v21 = vpop.permute.xlu0 %1531  ;;  %v3472_v2 = vpop.eup %3471 }
 0x175   :  { %v4480_v51 = vpop.permute.xlu1 %1519  ;;  %v3474_v48 = vpop.eup %3473  ;;  %v391_v10 = vadd.f32 1.0, %v3472_v2  ;;  %3475 = vrcp.f32 %v389_v54  ;;  %v45_v2 = vld [vmem:[%s7112_s9] ss:$2 sm:$0xf] }
 0x176   :  { %569 = vrot.lane.b32.xlu0 %v549_v32, %s3673_s27  ;;  %v4512_v14 = vmul.f32 %v3474_v48, %v4409_v11  ;;  %v4537_v11 = vadd.f32 %v3910_v58, %v3878_v38  ;;  %v4543_v48 = vadd.f32 %v3912_v59, %v3878_v38  ;;  %v4555_v58 = vsel %vm4054_vm8, %v4469_v17, 0.0 }
 0x177   :  { %1666 = vrot.lane.b32.xlu1 %v500_v28, %s3679_s13  ;;  %v4502_v28 = vmul.f32 %v3470_v56, %v4390_v35  ;;  %3477 = vrcp.f32 %v391_v10  ;;  %v4527_v56 = vld [vmem:[%s7111_s2 + $0x20] sm:$0xff]  ;;  %vm978_vm11 = vcmp.gt.s32.totalorder %v45_v2, 0  ;;  %vm1797_vm12 = vcmp.lt.s32.totalorder %v45_v2, 15 }
 0x178   :  { %v4487_v49 = vpop.permute.xlu0 %589  ;;  %7391 = vst [vmem:[#allocation46_spill] sm:$0xff] %v4512_v14  ;;  %7392 = vst [vmem:[#allocation47_spill] sm:$0xff] %v4537_v11  ;;  %v4565_v38 = vsel %vm4032_vm6, %v4512_v14, 0.0  ;;  %v3046_v1 = vmul.f32 -1.442695, %v4537_v11 }
 0x179   :  { %v4489_v37 = vpop.permute.xlu1 %1543  ;;  %7390 = vst [vmem:[#allocation45_spill] sm:$0xff] %v4502_v28  ;;  %v4533_v10 = vsel %vm4017_vm5, %v4502_v28, 0.0  ;;  %7393 = vst [vmem:[#allocation48_spill] sm:$0xff] %v4543_v48  ;;  %v3048_v27 = vmul.f32 -1.442695, %v4543_v48  ;;  %v7397_v48 = vmov 0  }
 0x17a   :  { %593 = vrot.lane.b32.xlu0 %v4494_v18, %s3673_s27  ;;  %7395 = vst [vmem:[#allocation49_spill] sm:$0xff] %v4565_v38  ;;  %3479 = vpow2.f32 %v3046_v1  ;;  %v4586_v11 = vsel %vm978_vm11, 1, %v7397_v48  ;;  %v4603_v1 = vmul.f32 %v4357_v60, %v3964_v62  ;;  %vm7203_vm11 = vcmp.lt.s32.totalorder %v4558_v6, 127 }
 0x17b   :  { %1690 = vrot.lane.b32.xlu1 %v502_v44, %s3679_s13  ;;  %3481 = vpow2.f32 %v3048_v27  ;;  %v4611_v27 = vmul.f32 %v4357_v60, %v3986_v33  ;;  %v4637_v33 = vsel %vm4082_vm10, %v4512_v14, 0.0 }
 0x17c   :  { %v4499_v31 = vpop.permute.xlu0 %1024 }
 0x17d   :  { %v4504_v34 = vpop.permute.xlu1 %577 }
 0x17e   :  { %1028 = vrot.lane.b32.xlu0 %v549_v32, %s3675_s29 }
 0x17f   :  { %704 = vrot.lane.b32.xlu1 %v4502_v28, %s3672_s26  ;;  %v3476_v59 = vpop.eup %3475 }
 0x180   :  { %v4509_v25 = vpop.permute.xlu0 %1048  ;;  %v4576_v23 = vmul.f32 %v3476_v59, %v4440_v20  ;;  %v4593_v20 = vsel %vm1797_vm12, 1, %v7397_v48  ;;  %v987_v59 = vrot.slane %v4586_v11, %v3995_v12  ;;  %v983_v48 = vrot.slane %v4586_v11, %v3933_v15 }
 0x181   :  { %v4514_v44 = vpop.permute.xlu1 %601  ;;  %v3478_v29 = vpop.eup %3477  ;;  %vm7202_vm12 = vcmp.lt.s32.totalorder %v4558_v6, 113 }
 0x182   :  { %1052 = vrot.lane.b32.xlu0 %v4494_v18, %s3675_s29  ;;  %v4583_v36 = vmul.f32 %v3478_v29, %v4448_v52  ;;  %v4607_v52 = vmul.f32 %v4357_v60, %v3952_v42  ;;  %v4627_v42 = vsel %vm4071_vm9, %v4502_v28, 0.0  ;;  %v4632_v62 = vsel %vm3947_vm2, %v4576_v23, 0.0 }
 0x183   :  { %728 = vrot.lane.b32.xlu1 %v4512_v14, %s3672_s26  ;;  %vm4753_vm0 = vcmp.eq.s32.totalorder %v987_v59, 1 }
 0x184   :  { %v4520_v35 = vpop.permute.xlu0 %833  ;;  %7396 = vst [vmem:[#allocation50_spill] sm:$0xff] %v4583_v36  ;;  %v4653_v41 = vsel %vm3999_vm3, %v4583_v36, 0.0  ;;  %v1562_v36 = vsel %vm7196_vm4, %v4480_v51, %v4478_v21 }
 0x185   :  { %v4522_v55 = vpop.permute.xlu1 %1036 }
 0x186   :  { %778 = vperm.xlu0 %3385, %v4527_v56  }
 0x187   :  { %581 = vrot.lane.b32.xlu1 %v4533_v10, %s3673_s27 }
 0x188   :  { %v4545_v54 = vpop.permute.xlu0 %857 }
 0x189   :  { %v4550_v8 = vpop.permute.xlu1 %1060 }
 0x18a   :  { %861 = vrot.lane.b32.xlu0 %v4555_v58, %s3676_s30 }
 0x18b   :  { %605 = vrot.lane.b32.xlu1 %v4565_v38, %s3673_s27 }
 0x18c   :  { %v4571_v7 = vpop.permute.xlu0 %1386 }
 0x18d   :  { %v4573_v43 = vpop.permute.xlu1 %845 }
 0x18e   :  { %1390 = vrot.lane.b32.xlu0 %v549_v32, %s3677_s11  ;;  %v4597_v32 = vmul.f32 %v4357_v60, %v3972_v4  ;;  %v4618_v4 = vsel %vm4042_vm7, %v4458_v24, 0.0  ;;  %v749_v60 = vsel %vm7201_vm14, %v4444_v19, %v4463_v50  ;;  %v737_v50 = vsel %vm7201_vm14, %v4460_v57, %v4473_v53 }
 0x18f   :  { %1040 = vrot.lane.b32.xlu1 %v4533_v10, %s3675_s29  ;;  %v786_v28 = vmul.f32 %v3919_v63, %v749_v60  ;;  %v1568_v57 = vsel %vm7196_vm4, %v4471_v45, %v4480_v51  ;;  %v788_v39 = vmul.f32 %v3919_v63, %v737_v50  ;;  %v616_v51 = vsel %vm7200_vm13, %v4487_v49, %v4514_v44 }
 0x190   :  { %v4599_v29 = vpop.permute.xlu0 %1410 }
 0x191   :  { %v4613_v2 = vpop.permute.xlu1 %869 }
 0x192   :  { %1414 = vrot.lane.b32.xlu0 %v4494_v18, %s3677_s11  ;;  %v755_v18 = vsel %vm7201_vm14, %v4473_v53, %v4444_v19  ;;  %v628_v19 = vsel %vm7200_vm13, %v4450_v26, %v4504_v34  ;;  %v622_v53 = vsel %vm7200_vm13, %v4504_v34, %v4487_v49  ;;  %v634_v34 = vsel %vm7200_vm13, %v4514_v44, %v4450_v26 }
 0x193   :  { %1064 = vrot.lane.b32.xlu1 %v4565_v38, %s3675_s29  ;;  %v785_v60 = vmul.f32 %v3919_v63, %v755_v18  ;;  %v665_v18 = vmul.f32 %v4234_v22, %v628_v19  ;;  %v894_v26 = vsel %vm7199_vm15, %v4520_v35, %v4573_v43  ;;  %v4725_v38 = vpop.eup %3479  ;;  %v1556_v63 = vsel %vm7196_vm4, %v4478_v21, %v4489_v37 }
 0x194   :  { %v4665_v3 = vpop.permute.xlu0 %1217  ;;  %7399 = vst [vmem:[#allocation52_spill] sm:$0xff] %v4725_v38  ;;  %v1574_v49 = vsel %vm7196_vm4, %v4489_v37, %v4471_v45  ;;  %v666_v44 = vmul.f32 %v4234_v22, %v622_v53  ;;  %v4739_v19 = vpop.eup %3481  ;;  %v4742_v38 = vmul.f32 %v4302_v61, %v1562_v36  ;;  %v1079_v21 = vsel %vm7198_vm1, %v4522_v55, %v4509_v25 }
 0x195   :  { %v4678_v14 = vpop.permute.xlu1 %1398  ;;  %7400 = vst [vmem:[#allocation53_spill] sm:$0xff] %v4739_v19  ;;  %v1085_v45 = vsel %vm7198_vm1, %v4499_v31, %v4522_v55  ;;  %v7401_v37 = vmov 0  ;;  %vm7204_vm4 = vcmp.lt.s32.totalorder %v4558_v6, 111  ;;  %v667_v36 = vmul.f32 %v4234_v22, %v616_v51 }
 0x196   :  { %1511 = vrot.lane.b32.xlu0 %v4458_v24, %s3674_s28  ;;  %v4710_v24 = vld [vmem:[%s7111_s2 + $0x8] sm:$0xff]  ;;  %v7402_v37 = vsel %vm4753_vm0, 4294967295, %v7401_v37  ;;  %v1073_v53 = vsel %vm7198_vm1, %v4509_v25, %v4550_v8  ;;  %v1091_v55 = vsel %vm7198_vm1, %v4550_v8, %v4499_v31  ;;  %v931_v59 = vmul.f32 %v3945_v40, %v894_v26 }
 0x197   :  { %7398 = vst [vmem:[#allocation51_spill] sm:$0xff] %v4710_v24  ;;  %1872 = vperm.xlu1 %3400, %v4710_v24   ;;  %v4728_v24 = vmul.f32 %v4302_v61, %v1568_v57  ;;  %v664_v57 = vmul.f32 %v4234_v22, %v634_v34  ;;  %7403 = vst [vmem:[#allocation54_spill] sm:$0xff] %v7402_v37  ;;  %v7404_v34 = vmov 4   ;;  %v4775_v19 = vmul.f32 %v4302_v61, %v1574_v49 }
 0x198   :  { %v4723_v47 = vpop.permute.xlu0 %1241  ;;  %v810_v22 = vadd.f32 %v786_v28, %v665_v18  ;;  %v888_v25 = vsel %vm7199_vm15, %v4573_v43, %v4545_v54  ;;  %v811_v8 = vadd.f32 %v787_v13, %v666_v44  ;;  %v1122_v31 = vmul.f32 %v3940_v30, %v1085_v45 }
 0x199   :  { %v1423_v50 = vpop.permute.xlu1 %1422  ;;  %v1123_v26 = vmul.f32 %v3940_v30, %v1079_v21  ;;  %vm4786_vm1 = vcmp.eq.s32.totalorder %v983_v48, 1  ;;  %v1121_v43 = vmul.f32 %v3940_v30, %v1091_v55  ;;  %v1124_v18 = vmul.f32 %v3940_v30, %v1073_v53 }
 0x19a   :  { %1535 = vrot.lane.b32.xlu0 %v4469_v17, %s3674_s28  ;;  %v4772_v17 = vmul.f32 %v4302_v61, %v1556_v63  ;;  %v7405_v63 = vmov 0  ;;  %v900_v61 = vsel %vm7199_vm15, %v4613_v2, %v4520_v35  ;;  %v809_v49 = vadd.f32 %v785_v60, %v664_v57 }
 0x19b   :  { %3401 = vset.pattern.permute.xlu1 %v7404_v34  ;;  %v7406_v63 = vsel %vm4786_vm1, 4294967295, %v7405_v63  ;;  %v812_v44 = vadd.f32 %v788_v39, %v667_v36  ;;  %v932_v35 = vmul.f32 %v3945_v40, %v888_v25  ;;  %v955_v21 = vadd.f32 %v931_v59, %v810_v22 }
 0x19c   :  { %657 = vperm.xlu1 %3401, %v4527_v56   ;;  %v4782_v51 = vpop.permute.xlu0 %1652  ;;  %7407 = vst [vmem:[#allocation55_spill] sm:$0xff] %v7406_v63  ;;  %v882_v30 = vsel %vm7199_vm15, %v4545_v54, %v4613_v2  ;;  %v930_v45 = vmul.f32 %v3945_v40, %v900_v61  ;;  %v1441_v53 = vsel %vm7202_vm12, %v4678_v14, %v4599_v29  ;;  %v7409_v54 = vmov 0  ;;  %v7463_v63 = vld [vmem:[#allocation4_spill] sm:$0xff] }
 0x19d   :  { %v1230_v28 = vpop.permute.xlu1 %1229  ;;  %v1447_v60 = vsel %vm7202_vm12, %v4571_v7, %v4678_v14  ;;  %v7408_v57 = vrot.slane %v4593_v20, %v3933_v15  ;;  %v7412_v2 = vrot.slane %v4593_v20, %v3995_v12  ;;  %v7413_v36 = vmov 0 }
 0x19e   :  { %v1272_v13 = vsel %vm7203_vm11, %v1230_v28, %v4723_v47  ;;  %v1278_v48 = vsel %vm7203_vm11, %v4665_v3, %v1230_v28  ;;  %1221 = vrot.lane.b32.xlu0 %v4618_v4, %s3678_s12  ;;  %v1435_v14 = vsel %vm7202_vm12, %v4599_v29, %v1423_v50  ;;  %v1453_v55 = vsel %vm7202_vm12, %v1423_v50, %v4571_v7 }
 0x19f   :  { %vm4823_vm15 = vcmp.eq.s32.totalorder %v7408_v57, 1  ;;  %vm4830_vm13 = vcmp.eq.s32.totalorder %v7412_v2, 1  ;;  %v1314_v15 = vmul.f32 %v3991_v46, %v1278_v48  ;;  %v1315_v59 = vmul.f32 %v3991_v46, %v1272_v13 }
 0x1a0   :  { %837 = vrot.lane.b32.xlu1 %v4618_v4, %s3676_s30  ;;  %v1677_v39 = vpop.permute.xlu0 %1676  ;;  %v7410_v54 = vsel %vm4823_vm15, 4294967295, %v7409_v54  ;;  %v7414_v36 = vsel %vm4830_vm13, 4294967295, %v7413_v36  ;;  %v7416_v25 = vmov 7   ;;  %v1194_v12 = vadd.f32 %v4597_v32, %v1122_v31 }
 0x1a1   :  { %7411 = vst [vmem:[#allocation56_spill] sm:$0xff] %v7410_v54  ;;  %7415 = vst [vmem:[#allocation57_spill] sm:$0xff] %v7414_v36  ;;  %v1254_v22 = vpop.permute.xlu1 %1253  ;;  %3402 = vset.pattern.permute.xlu1 %v7416_v25  ;;  %v1195_v61 = vadd.f32 %v4603_v1, %v1123_v26  ;;  %v1193_v28 = vadd.f32 %v4607_v52, %v1121_v43  ;;  %v1196_v57 = vadd.f32 %v4611_v27, %v1124_v18  ;;  %v7418_v7 = vmov 0 }
 0x1a2   :  { %v7417_v29 = vrot.slane %v4586_v11, %v3976_v9  ;;  %v7421_v50 = vrot.slane %v4586_v11, %v4006_v16  ;;  %v7422_v13 = vmov 0  ;;  %1245 = vrot.lane.b32.xlu0 %v4555_v58, %s3678_s12  ;;  %v1483_v32 = vmul.f32 %v3969_v0, %v1447_v60 }
 0x1a3   :  { %v1484_v1 = vmul.f32 %v3969_v0, %v1441_v53  ;;  %v1266_v52 = vsel %vm7203_vm11, %v4723_v47, %v1254_v22  ;;  %v1284_v27 = vsel %vm7203_vm11, %v1254_v22, %v4665_v3  ;;  %v933_v11 = vmul.f32 %v3945_v40, %v882_v30 }
 0x1a4   :  { %vm4850_vm14 = vcmp.eq.s32.totalorder %v7417_v29, 1  ;;  %vm4857_vm12 = vcmp.eq.s32.totalorder %v7421_v50, 1  ;;  %v954_v31 = vadd.f32 %v930_v45, %v809_v49  ;;  %v1485_v26 = vmul.f32 %v3969_v0, %v1435_v14  ;;  %849 = vrot.lane.b32.xlu1 %v4627_v42, %s3676_s30  ;;  %v4876_v18 = vpop.permute.xlu0 %690 }
 0x1a5   :  { %v7419_v7 = vsel %vm4850_vm14, 4294967295, %v7418_v7  ;;  %v7423_v13 = vsel %vm4857_vm12, 4294967295, %v7422_v13  ;;  %v1486_v43 = vmul.f32 %v3969_v0, %v1453_v55  ;;  %v956_v48 = vadd.f32 %v932_v35, %v811_v8  ;;  %v1665_v2 = vpop.permute.xlu1 %1664 }
 0x1a6   :  { %7420 = vst [vmem:[#allocation58_spill] sm:$0xff] %v7419_v7  ;;  %7424 = vst [vmem:[#allocation59_spill] sm:$0xff] %v7423_v13  ;;  %v1001_v47 = vsel %vm4753_vm0, %v955_v21, 0.0  ;;  %v1338_v53 = vadd.f32 %v1314_v15, %v1193_v28  ;;  %v1339_v60 = vadd.f32 %v1315_v59, %v1194_v12  ;;  %v1316_v3 = vmul.f32 %v3991_v46, %v1266_v52 }
 0x1a7   :  { %v1317_v40 = vmul.f32 %v3991_v46, %v1284_v27  ;;  %v1707_v49 = vsel %vm7204_vm4, %v1665_v2, %v1677_v39  ;;  %v1713_v0 = vsel %vm7204_vm4, %v4782_v51, %v1665_v2  ;;  %571 = vrot.lane.b32.xlu0 %v4632_v62, %s3673_s27  ;;  %v1628_v8 = vadd.f32 %v4728_v24, %v1483_v32 }
 0x1a8   :  { %v1629_v35 = vadd.f32 %v4742_v38, %v1484_v1  ;;  %v1749_v21 = vmul.f32 %v4029_v5, %v1713_v0  ;;  %v1750_v30 = vmul.f32 %v4029_v5, %v1707_v49  ;;  %v957_v45 = vadd.f32 %v933_v11, %v812_v44  ;;  %873 = vrot.lane.b32.xlu1 %v4637_v33, %s3676_s30  ;;  %v4899_v15 = vpop.permute.xlu0 %714 }
 0x1a9   :  { %v1000_v46 = vsel %vm4786_vm1, %v954_v31, 0.0  ;;  %v1630_v14 = vadd.f32 %v4772_v17, %v1485_v26  ;;  %v1631_v55 = vadd.f32 %v4775_v19, %v1486_v43  ;;  %v1363_v59 = vadd.f32 %v1339_v60, %v1001_v47  ;;  %v1689_v12 = vpop.permute.xlu1 %1688  ;;  %v7433_v47 = vld [vmem:[#allocation34_spill] sm:$0xff] }
 0x1aa   :  { %v1362_v24 = vadd.f32 %v1338_v53, %v1000_v46  ;;  %v1773_v38 = vadd.f32 %v1749_v21, %v1628_v8  ;;  %v1774_v22 = vadd.f32 %v1750_v30, %v1629_v35  ;;  %v1340_v28 = vadd.f32 %v1316_v3, %v1195_v61  ;;  %v7435_v30 = vld [vmem:[#allocation50_spill] sm:$0xff] }
 0x1ab   :  { %v1341_v29 = vadd.f32 %v1317_v40, %v1196_v57  ;;  %v1701_v44 = vsel %vm7204_vm4, %v1677_v39, %v1689_v12  ;;  %v1719_v17 = vsel %vm7204_vm4, %v1689_v12, %v4782_v51  ;;  %595 = vrot.lane.b32.xlu0 %v4653_v41, %s3673_s27  ;;  %v7425_v39 = vrot.slane %v4593_v20, %v3976_v9  ;;  %v7434_v40 = vld [vmem:[#allocation49_spill] sm:$0xff]  ;;  %v7439_v12 = vld [vmem:[#allocation46_spill] sm:$0xff] }
 0x1ac   :  { %v1819_v19 = vsel %vm4823_vm15, %v1773_v38, 0.0  ;;  %v1820_v50 = vsel %vm4830_vm13, %v1774_v22, 0.0  ;;  %v1751_v32 = vmul.f32 %v4029_v5, %v1701_v44  ;;  %v1752_v61 = vmul.f32 %v4029_v5, %v1719_v17  ;;  %1402 = vrot.lane.b32.xlu1 %v4533_v10, %s3677_s11  ;;  %v4930_v27 = vpop.permute.xlu0 %1509  ;;  %v7438_v38 = vld [vmem:[#allocation52_spill] sm:$0xff]  ;;  %v7440_v44 = vld [vmem:[#allocation53_spill] sm:$0xff] }
 0x1ad   :  { %v1843_v57 = vadd.f32 %v1819_v19, %v1362_v24  ;;  %vm4917_vm11 = vcmp.eq.s32.totalorder %v7425_v39, 1  ;;  %v7426_v1 = vmov 0  ;;  %v7429_v51 = vrot.slane %v4593_v20, %v4006_v16  ;;  %v4936_v43 = vpop.permute.xlu1 %702 }
 0x1ae   :  { %v7427_v1 = vsel %vm4917_vm11, 4294967295, %v7426_v1  ;;  %v7430_v52 = vmov 0  ;;  %v1844_v5 = vadd.f32 %v1820_v50, %v1363_v59  ;;  %v1002_v9 = vsel %vm4850_vm14, %v956_v48, 0.0 }
 0x1af   :  { %7428 = vst [vmem:[#allocation60_spill] sm:$0xff] %v7427_v1  ;;  %vm4924_vm4 = vcmp.eq.s32.totalorder %v7429_v51, 1  ;;  %v1003_v11 = vsel %vm4857_vm12, %v957_v45, 0.0  ;;  %v1775_v31 = vadd.f32 %v1751_v32, %v1630_v14  ;;  %v1776_v26 = vadd.f32 %v1752_v61, %v1631_v55  ;;  %694 = vrot.lane.b32.xlu0 %v4576_v23, %s3672_s26  ;;  %v7436_v14 = vld [vmem:[#allocation45_spill] sm:$0xff] }
 0x1b0   :  { %v7431_v52 = vsel %vm4924_vm4, 4294967295, %v7430_v52  ;;  %v1364_v16 = vadd.f32 %v1340_v28, %v1002_v9  ;;  %v1365_v20 = vadd.f32 %v1341_v29, %v1003_v11  ;;  %v4939_v53 = vadd.f32 %v7433_v47, %v1843_v57  ;;  %1426 = vrot.lane.b32.xlu1 %v7434_v40, %s3677_s11  ;;  %v4953_v49 = vpop.permute.xlu0 %1533 }
 0x1b1   :  { %7432 = vst [vmem:[#allocation61_spill] sm:$0xff] %v7431_v52  ;;  %v4944_v10 = vadd.f32 %v7433_v47, %v1844_v5  ;;  %v1821_v48 = vsel %vm4917_vm11, %v1775_v31, 0.0  ;;  %v1822_v60 = vsel %vm4924_vm4, %v1776_v26, 0.0  ;;  %v4956_v35 = vpop.permute.xlu1 %726  ;;  %v390_v22 = vadd.f32 1.0, %v7438_v38 }
 0x1b2   :  { %v3057_v2 = vmul.f32 -1.442695, %v4939_v53  ;;  %v1845_v3 = vadd.f32 %v1821_v48, %v1364_v16  ;;  %v1846_v8 = vadd.f32 %v1822_v60, %v1365_v20  ;;  %v392_v17 = vadd.f32 1.0, %v7440_v44 }
 0x1b3   :  { %v3058_v0 = vmul.f32 -1.442695, %v4944_v10  ;;  %718 = vrot.lane.b32.xlu0 %v7435_v30, %s3672_s26  ;;  %v7441_v51 = vmov 8   ;;  %v7443_v48 = vmov 10   ;;  %v7464_v54 = vmov 11  }
 0x1b4   :  { %3483 = vpow2.f32 %v3057_v2  ;;  %v4959_v21 = vadd.f32 %v7433_v47, %v1845_v3  ;;  %v4964_v45 = vadd.f32 %v7433_v47, %v1846_v8  ;;  %1523 = vrot.lane.b32.xlu1 %v7436_v14, %s3674_s28  ;;  %v4969_v55 = vpop.permute.xlu0 %567  ;;  %v5010_v47 = vld [vmem:[%s7111_s2 + $0x28] sm:$0xff] }
 0x1b5   :  { %3485 = vpow2.f32 %v3058_v0  ;;  %v4971_v24 = vpop.permute.xlu1 %835  ;;  %v7444_v2 = vld [vmem:[#allocation47_spill] sm:$0xff] }
 0x1b6   :  { %v3059_v46 = vmul.f32 -1.442695, %v4959_v21  ;;  %7437 = vst [vmem:[#allocation34_spill] sm:$0xff] %v4971_v24  ;;  %v3060_v59 = vmul.f32 -1.442695, %v4964_v45 }
 0x1b7   :  { %1656 = vrot.lane.b32.xlu0 %v4618_v4, %s3679_s13 }
 0x1b8   :  { %3487 = vpow2.f32 %v3059_v46  ;;  %1547 = vrot.lane.b32.xlu1 %v7439_v12, %s3674_s28  ;;  %v4979_v28 = vpop.permute.xlu0 %591 }
 0x1b9   :  { %3489 = vpow2.f32 %v3060_v59  ;;  %v4981_v29 = vpop.permute.xlu1 %1521  ;;  %v7445_v59 = vmov 12  }
 0x1ba   :  { %3491 = vrcp.f32 %v390_v22  ;;  %v7447_v22 = vld [vmem:[#allocation51_spill] sm:$0xff] }
 0x1bb   :  { %1680 = vrot.lane.b32.xlu0 %v4555_v58, %s3679_s13  ;;  %3493 = vrcp.f32 %v392_v17  ;;  %v7449_v17 = vld [vmem:[#allocation48_spill] sm:$0xff] }
 0x1bc   :  { %1114 = vperm.xlu1 %3402, %v4527_v56   ;;  %v4987_v4 = vpop.permute.xlu0 %1026 }
 0x1bd   :  { %v4989_v61 = vpop.permute.xlu1 %1545 }
 0x1be   :  { %v3484_v19 = vpop.eup %3483 }
 0x1bf   :  { %v3486_v50 = vpop.eup %3485  ;;  %v1987_v32 = vadd.f32 1.0, %v3484_v19  ;;  %1030 = vrot.lane.b32.xlu0 %v4632_v62, %s3675_s29 }
 0x1c0   :  { %v1988_v57 = vadd.f32 1.0, %v3486_v50  ;;  %3403 = vset.pattern.permute.xlu1 %v7441_v51  ;;  %v4994_v58 = vpop.permute.xlu0 %1050 }
 0x1c1   :  { %3495 = vrcp.f32 %v1987_v32  ;;  %1162 = vperm.xlu1 %3403, %v4527_v56   ;;  %v4997_v11 = vpop.permute.xlu1 %579 }
 0x1c2   :  { %v3488_v39 = vpop.eup %3487  ;;  %3497 = vrcp.f32 %v1988_v57 }
 0x1c3   :  { %v3490_v5 = vpop.eup %3489  ;;  %v1989_v9 = vadd.f32 1.0, %v3488_v39  ;;  %1054 = vrot.lane.b32.xlu0 %v4653_v41, %s3675_s29 }
 0x1c4   :  { %v1990_v31 = vadd.f32 1.0, %v3490_v5  ;;  %v5001_v26 = vpop.permute.xlu0 %859  ;;  %v3492_v16 = vpop.eup %3491 }
 0x1c5   :  { %3499 = vrcp.f32 %v1989_v9  ;;  %7442 = vst [vmem:[#allocation49_spill] sm:$0xff] %v5001_v26  ;;  %1233 = vrot.lane.b32.xlu1 %v4627_v42, %s3678_s12  ;;  %v5005_v20 = vpop.permute.xlu1 %603  ;;  %v3494_v60 = vpop.eup %3493  ;;  %v5015_v3 = vmul.f32 %v3492_v16, %v7444_v2  ;;  %v5053_v9 = vld [vmem:[%s7111_s2 + $0x10] sm:$0xff]  ;;  %v7499_v26 = vmov 9  }
 0x1c6   :  { %3501 = vrcp.f32 %v1990_v31  ;;  %3404 = vset.pattern.permute.xlu1 %v7443_v48  ;;  %v5032_v19 = vmul.f32 %v3494_v60, %v7449_v17 }
 0x1c7   :  { %782 = vperm.xlu0 %3385, %v5010_v47   ;;  %v5039_v57 = vsel %vm4017_vm5, %v5015_v3, 0.0 }
 0x1c8   :  { %v5017_v40 = vpop.permute.xlu0 %1388  ;;  %v5064_v2 = vsel %vm4032_vm6, %v5032_v19, 0.0 }
 0x1c9   :  { %1257 = vrot.lane.b32.xlu1 %v4637_v33, %s3678_s12  ;;  %v5021_v8 = vpop.permute.xlu1 %1038 }
 0x1cb   :  { %v3496_v0 = vpop.eup %3495  ;;  %3408 = vset.pattern.permute.xlu0 %v7445_v59 }
 0x1cc   :  { %v3498_v46 = vpop.eup %3497  ;;  %v5025_v38 = vmul.f32 %v3496_v0, %v4939_v53  ;;  %1730 = vperm.xlu0 %3408, %v7447_v22   ;;  %v5034_v50 = vpop.permute.xlu0 %1412 }
 0x1cd   :  { %v5029_v44 = vmul.f32 %v3498_v46, %v4944_v10  ;;  %583 = vrot.lane.b32.xlu1 %v5039_v57, %s3673_s27  ;;  %v5044_v53 = vpop.permute.xlu1 %1062 }
 0x1ce   :  { %7446 = vst [vmem:[#allocation50_spill] sm:$0xff] %v5025_v38 }
 0x1cf   :  { %7448 = vst [vmem:[#allocation45_spill] sm:$0xff] %v5029_v44  ;;  %v3500_v39 = vpop.eup %3499  ;;  %2211 = vmatprep.mubr.f32.mxu0 %v5029_v44  ;;  %v7460_v44 = vld [vmem:[#allocation33_spill] sm:$0xff] }
 0x1d0   :  { %v3502_v10 = vpop.eup %3501  ;;  %2212 = vmatmul.mubr.f32.vlgmr.msra.gmra.mrb[12].mxu0 %v5025_v38  ;;  %v5048_v5 = vmul.f32 %v3500_v39, %v4959_v21  ;;  %1734 = vperm.xlu0 %3408, %v5053_v9   ;;  %v5059_v16 = vpop.permute.xlu0 %1219  ;;  %v5087_v39 = vsel %vm4054_vm8, %v7435_v30, 0.0  ;;  %v295_v1 = vadd.f32 %v7463_v63, %v7460_v44 }
 0x1d1   :  { %v5057_v31 = vmul.f32 %v3502_v10, %v4964_v45  ;;  %7453 = vst [vmem:[#allocation53_spill] sm:$0xff] %v5059_v16  ;;  %607 = vrot.lane.b32.xlu1 %v5064_v2, %s3673_s27  ;;  %v5069_v21 = vpop.permute.xlu1 %847  ;;  %v5075_v45 = vld [vmem:[%s7111_s2 + $0x18] sm:$0xff]  ;;  %v7484_v16 = vld [vmem:[#allocation6_spill] sm:$0xff] }
 0x1d2   :  { %7451 = vst [vmem:[#allocation52_spill] sm:$0xff] %v5048_v5  ;;  %7455 = vst [vmem:[#allocation47_spill] sm:$0xff] %v5069_v21 }
 0x1d3   :  { %7452 = vst [vmem:[#allocation46_spill] sm:$0xff] %v5057_v31  ;;  %2306 = vmatprep.mubr.f32.mxu1 %v5057_v31 }
 0x1d4   :  { %2307 = vmatmul.mubr.f32.vlgmr.msra.gmra.mrb[12].mxu1 %v5048_v5  ;;  %1738 = vperm.xlu0 %3408, %v5075_v45   ;;  %v5078_v0 = vpop.permute.xlu0 %1243  ;;  %v7461_v5 = vld [vmem:[#allocation3_spill] sm:$0xff] }
 0x1d5   :  { %7456 = vst [vmem:[#allocation51_spill] sm:$0xff] %v5078_v0  ;;  %706 = vrot.lane.b32.xlu1 %v5015_v3, %s3672_s26  ;;  %v5082_v46 = vpop.permute.xlu1 %871  ;;  %v194_v38 = vadd.f32 %v7461_v5, %v7460_v44  ;;  %v3051_v5 = vmul.f32 -1.442695, %v295_v1 }
 0x1d6   :  { %7457 = vst [vmem:[#allocation48_spill] sm:$0xff] %v5082_v46 }
 0x1d7   :  { %v3049_v37 = vmul.f32 -1.442695, %v194_v38 }
 0x1d8   :  { %863 = vrot.lane.b32.xlu0 %v5087_v39, %s3676_s30  ;;  %v5091_v10 = vpop.permute.xlu0 %1654 }
 0x1d9   :  { %7459 = vst [vmem:[#allocation15_spill] sm:$0xff] %v5091_v10  ;;  %730 = vrot.lane.b32.xlu1 %v5032_v19, %s3672_s26  ;;  %v5095_v31 = vpop.permute.xlu1 %1400  ;;  %3503 = vpow2.f32 %v3049_v37 }
 0x1da   :  { %3505 = vpow2.f32 %v3051_v5 }
 0x1dc   :  { %1392 = vrot.lane.b32.xlu0 %v4632_v62, %s3677_s11  ;;  %v5101_v13 = vpop.permute.xlu0 %1678 }
 0x1dd   :  { %7462 = vst [vmem:[#allocation16_spill] sm:$0xff] %v5101_v13  ;;  %1476 = vperm.xlu1 %3404, %v4527_v56   ;;  %v5104_v7 = vpop.permute.xlu1 %1424  ;;  %v7473_v13 = vmov 6  }
 0x1e0   :  { %1416 = vrot.lane.b32.xlu0 %v4653_v41, %s3677_s11  ;;  %v5114_v62 = vpop.permute.xlu0 %692  ;;  %v7468_v41 = vmov 1  }
 0x1e1   :  { %3405 = vset.pattern.permute.xlu1 %v7464_v54  ;;  %v5111_v52 = vpop.permute.xlu1 %1231  ;;  %7466 = vst [vmem:[#allocation33_spill] sm:$0xff] %v5114_v62 }
 0x1e2   :  { %7465 = vst [vmem:[#allocation19_spill] sm:$0xff] %v5111_v52  ;;  %1597 = vperm.xlu1 %3405, %v4527_v56  }
 0x1e4   :  { %1513 = vrot.lane.b32.xlu0 %v4576_v23, %s3674_s28  ;;  %v5125_v63 = vpop.permute.xlu0 %716 }
 0x1e5   :  { %v5118_v36 = vpop.permute.xlu1 %1255  ;;  %7469 = vst [vmem:[#allocation4_spill] sm:$0xff] %v5125_v63 }
 0x1e6   :  { %7467 = vst [vmem:[#allocation3_spill] sm:$0xff] %v5118_v36  ;;  %1668 = vrot.lane.b32.xlu1 %v4627_v42, %s3679_s13  ;;  %v3504_v42 = vpop.eup %3503 }
 0x1e7   :  { %3406 = vset.pattern.permute.xlu1 %v7468_v41  ;;  %v393_v5 = vadd.f32 1.0, %v3504_v42  ;;  %v3506_v63 = vpop.eup %3505 }
 0x1e8   :  { %1537 = vrot.lane.b32.xlu0 %v7435_v30, %s3674_s28  ;;  %v5136_v62 = vpop.permute.xlu0 %569 }
 0x1e9   :  { %v5127_v10 = vpop.permute.xlu1 %1666  ;;  %7472 = vst [vmem:[#allocation64_spill] sm:$0xff] %v5136_v62  ;;  %3507 = vrcp.f32 %v393_v5  ;;  %v5159_v5 = vsel %vm4042_vm7, %v4576_v23, 0.0 }
 0x1ea   :  { %7470 = vst [vmem:[#allocation62_spill] sm:$0xff] %v5127_v10  ;;  %1692 = vrot.lane.b32.xlu1 %v4637_v33, %s3679_s13  ;;  %v395_v10 = vadd.f32 1.0, %v3506_v63 }
 0x1ec   :  { %1742 = vperm.xlu0 %3408, %v4527_v56   ;;  %3509 = vrcp.f32 %v395_v10 }
 0x1ed   :  { %v5132_v37 = vpop.permute.xlu1 %1690 }
 0x1ee   :  { %7471 = vst [vmem:[#allocation63_spill] sm:$0xff] %v5132_v37  ;;  %1042 = vrot.lane.b32.xlu1 %v5039_v57, %s3675_s29  ;;  %v5145_v37 = vpop.permute.xlu0 %593 }
 0x1ef   :  { %7475 = vst [vmem:[#allocation66_spill] sm:$0xff] %v5145_v37  ;;  %v5175_v37 = vsel %vm4071_vm9, %v5015_v3, 0.0 }
 0x1f0   :  { %3409 = vset.pattern.permute.xlu0 %v7473_v13 }
 0x1f1   :  { %911 = vperm.xlu0 %3409, %v7447_v22   ;;  %v5142_v33 = vpop.permute.xlu1 %704 }
 0x1f2   :  { %1066 = vrot.lane.b32.xlu1 %v5064_v2, %s3675_s29  ;;  %7474 = vst [vmem:[#allocation65_spill] sm:$0xff] %v5142_v33  ;;  %v5152_v42 = vpop.permute.xlu0 %1028 }
 0x1f3   :  { %7477 = vst [vmem:[#allocation68_spill] sm:$0xff] %v5152_v42  ;;  %v3508_v63 = vpop.eup %3507 }
 0x1f4   :  { %v5177_v36 = vmul.f32 %v3508_v63, %v194_v38  ;;  %v5192_v38 = vsel %vm4082_vm10, %v5032_v19, 0.0 }
 0x1f5   :  { %915 = vperm.xlu0 %3409, %v5053_v9   ;;  %v5149_v13 = vpop.permute.xlu1 %728 }
 0x1f6   :  { %1876 = vperm.xlu1 %3406, %v5053_v9   ;;  %7476 = vst [vmem:[#allocation67_spill] sm:$0xff] %v5149_v13  ;;  %v5170_v42 = vpop.permute.xlu0 %1052  ;;  %7483 = vst [vmem:[#allocation21_spill] sm:$0xff] %v5177_v36  ;;  %v5201_v24 = vsel %vm3947_vm2, %v5177_v36, 0.0 }
 0x1f9   :  { %919 = vperm.xlu0 %3409, %v5075_v45   ;;  %v5163_v10 = vpop.permute.xlu1 %581 }
 0x1fa   :  { %3407 = vset.pattern.permute.xlu1 %v7404_v34  ;;  %7479 = vst [vmem:[#allocation17_spill] sm:$0xff] %v5163_v10  ;;  %v7480_v34 = vld [vmem:[#allocation5_spill] sm:$0xff]  ;;  %v3510_v10 = vpop.eup %3509 }
 0x1fb   :  { %661 = vperm.xlu1 %3407, %v5010_v47   ;;  %v196_v13 = vadd.f32 %v7480_v34, %v7460_v44  ;;  %7481 = vst [vmem:[#allocation5_spill] sm:$0xff] %v5170_v42  ;;  %v297_v34 = vadd.f32 %v7484_v16, %v7460_v44  ;;  %v5194_v63 = vmul.f32 %v3510_v10, %v295_v1 }
 0x1fd   :  { %923 = vperm.xlu0 %3409, %v4527_v56   ;;  %v5187_v42 = vpop.permute.xlu1 %605  ;;  %7488 = vst [vmem:[#allocation22_spill] sm:$0xff] %v5194_v63  ;;  %v3052_v44 = vmul.f32 -1.442695, %v297_v34  ;;  %v5212_v10 = vsel %vm3999_vm3, %v5194_v63, 0.0 }
 0x1fe   :  { %7486 = vst [vmem:[#allocation69_spill] sm:$0xff] %v5187_v42 }
 0x1ff   :  { %839 = vrot.lane.b32.xlu1 %v5159_v5, %s3676_s30 }
 0x200   :  { %3410 = vset.pattern.permute.xlu1 %v7416_v25  ;;  %v3050_v25 = vmul.f32 -1.442695, %v196_v13 }
 0x201   :  { %1223 = vrot.lane.b32.xlu0 %v5159_v5, %s3678_s12 }
 0x202   :  { %3511 = vpow2.f32 %v3050_v25 }
 0x203   :  { %851 = vrot.lane.b32.xlu1 %v5175_v37, %s3676_s30  ;;  %3513 = vpow2.f32 %v3052_v44 }
 0x205   :  { %1247 = vrot.lane.b32.xlu0 %v5087_v39, %s3678_s12  ;;  %v5185_v52 = vpop.permute.xlu0 %778 }
 0x206   :  { %7485 = vst [vmem:[#allocation6_spill] sm:$0xff] %v5185_v52  ;;  %v5214_v52 = vpop.permute.xlu1 %1040 }
 0x207   :  { %875 = vrot.lane.b32.xlu1 %v5192_v38, %s3676_s30  ;;  %7492 = vst [vmem:[#allocation13_spill] sm:$0xff] %v5214_v52 }
 0x209   :  { %573 = vrot.lane.b32.xlu0 %v5201_v24, %s3673_s27  ;;  %v5205_v16 = vpop.permute.xlu0 %861 }
 0x20a   :  { %7490 = vst [vmem:[#allocation11_spill] sm:$0xff] %v5205_v16  ;;  %v5226_v25 = vpop.permute.xlu1 %1064 }
 0x20b   :  { %1404 = vrot.lane.b32.xlu1 %v5039_v57, %s3677_s11  ;;  %7495 = vst [vmem:[#allocation72_spill] sm:$0xff] %v5226_v25 }
 0x20c   :  { %v3512_v16 = vpop.eup %3511 }
 0x20d   :  { %597 = vrot.lane.b32.xlu0 %v5212_v10, %s3673_s27  ;;  %v5218_v42 = vpop.permute.xlu0 %1390 }
 0x20e   :  { %7493 = vst [vmem:[#allocation70_spill] sm:$0xff] %v5218_v42  ;;  %v394_v42 = vadd.f32 1.0, %v3512_v16 }
 0x20f   :  { %1428 = vrot.lane.b32.xlu1 %v5064_v2, %s3677_s11  ;;  %v3514_v2 = vpop.eup %3513 }
 0x210   :  { %3515 = vrcp.f32 %v394_v42  ;;  %v396_v25 = vadd.f32 1.0, %v3514_v2 }
 0x211   :  { %696 = vrot.lane.b32.xlu0 %v5177_v36, %s3672_s26  ;;  %v5224_v57 = vpop.permute.xlu0 %1414 }
 0x212   :  { %7494 = vst [vmem:[#allocation71_spill] sm:$0xff] %v5224_v57  ;;  %3517 = vrcp.f32 %v396_v25 }
 0x213   :  { %1525 = vrot.lane.b32.xlu1 %v5015_v3, %s3674_s28 }
 0x215   :  { %720 = vrot.lane.b32.xlu0 %v5194_v63, %s3672_s26  ;;  %v5232_v44 = vpop.permute.xlu0 %1511 }
 0x216   :  { %7496 = vst [vmem:[#allocation73_spill] sm:$0xff] %v5232_v44  ;;  %v5234_v52 = vpop.permute.xlu1 %1872 }
 0x217   :  { %7497 = vst [vmem:[#allocation74_spill] sm:$0xff] %v5234_v52  ;;  %1549 = vrot.lane.b32.xlu1 %v5032_v19, %s3674_s28 }
 0x219   :  { %927 = vperm.xlu0 %3409, %v5010_v47   ;;  %v5239_v57 = vpop.permute.xlu0 %1535 }
 0x21b   :  { %1118 = vperm.xlu1 %3410, %v5010_v47   ;;  %v5242_v21 = vpop.permute.xlu1 %657 }
 0x21c   :  { %7498 = vst [vmem:[#allocation75_spill] sm:$0xff] %v5242_v21  ;;  %v3516_v21 = vpop.eup %3515 }
 0x21d   :  { %3412 = vset.pattern.permute.xlu0 %v7499_v26  ;;  %v5246_v16 = vpop.permute.xlu0 %1221  ;;  %v3518_v25 = vpop.eup %3517 }
 0x21e   :  { %1295 = vperm.xlu0 %3412, %v7447_v22   ;;  %7500 = vst [vmem:[#allocation76_spill] sm:$0xff] %v5246_v16  ;;  %v5272_v16 = vmul.f32 %v3518_v25, %v297_v34 }
 0x21f   :  { %3411 = vset.pattern.permute.xlu1 %v7441_v51  ;;  %v5249_v52 = vpop.permute.xlu1 %837  ;;  %v5263_v51 = vmul.f32 %v3516_v21, %v196_v13 }
 0x220   :  { %7501 = vst [vmem:[#allocation77_spill] sm:$0xff] %v5249_v52  ;;  %1166 = vperm.xlu1 %3411, %v5010_v47   ;;  %7508 = vst [vmem:[#allocation84_spill] sm:$0xff] %v5272_v16  ;;  %v7519_v52 = vld [vmem:[#allocation8_spill] sm:$0xff] }
 0x221   :  { %v5253_v42 = vpop.permute.xlu0 %1245  ;;  %7505 = vst [vmem:[#allocation81_spill] sm:$0xff] %v5263_v51 }
 0x222   :  { %1299 = vperm.xlu0 %3412, %v5053_v9   ;;  %7502 = vst [vmem:[#allocation78_spill] sm:$0xff] %v5253_v42 }
 0x223   :  { %v5255_v2 = vpop.permute.xlu1 %849 }
 0x224   :  { %7503 = vst [vmem:[#allocation79_spill] sm:$0xff] %v5255_v2  ;;  %1235 = vrot.lane.b32.xlu1 %v5175_v37, %s3678_s12 }
 0x225   :  { %v5260_v26 = vpop.permute.xlu0 %571  ;;  %3413 = vset.pattern.permute.xlu1 %v7443_v48  ;;  %v558_v48 = vsel %vm4017_vm5, %v5263_v51, 0.0 }
 0x226   :  { %1303 = vperm.xlu0 %3412, %v5075_v45   ;;  %7504 = vst [vmem:[#allocation80_spill] sm:$0xff] %v5260_v26  ;;  %v7516_v26 = vld [vmem:[#allocation7_spill] sm:$0xff] }
 0x227   :  { %v5265_v22 = vpop.permute.xlu1 %873 }
 0x228   :  { %7506 = vst [vmem:[#allocation82_spill] sm:$0xff] %v5265_v22  ;;  %1259 = vrot.lane.b32.xlu1 %v5192_v38, %s3678_s12 }
 0x229   :  { %v5270_v9 = vpop.permute.xlu0 %595 }
 0x22a   :  { %1307 = vperm.xlu0 %3412, %v4527_v56   ;;  %7507 = vst [vmem:[#allocation83_spill] sm:$0xff] %v5270_v9  ;;  %v560_v56 = vsel %vm4032_vm6, %v5272_v16, 0.0 }
 0x22b   :  { %v5274_v42 = vpop.permute.xlu1 %1402 }
 0x22c   :  { %7509 = vst [vmem:[#allocation85_spill] sm:$0xff] %v5274_v42  ;;  %585 = vrot.lane.b32.xlu1 %v558_v48, %s3673_s27 }
 0x22d   :  { %v5282_v21 = vpop.permute.xlu0 %694 }
 0x22e   :  { %1658 = vrot.lane.b32.xlu0 %v5159_v5, %s3679_s13  ;;  %7510 = vst [vmem:[#allocation86_spill] sm:$0xff] %v5282_v21  ;;  %v7515_v21 = vld [vmem:[#allocation2_spill] sm:$0xff] }
 0x22f   :  { %v5284_v13 = vpop.permute.xlu1 %1426  ;;  %v5304_v9 = vadd.f32 %v7516_v26, %v7515_v21  ;;  %v5317_v2 = vadd.f32 %v7519_v52, %v7515_v21  ;;  %v7521_v26 = vld [vmem:[#allocation9_spill] sm:$0xff] }
 0x230   :  { %7511 = vst [vmem:[#allocation87_spill] sm:$0xff] %v5284_v13  ;;  %609 = vrot.lane.b32.xlu1 %v560_v56, %s3673_s27  ;;  %v5324_v13 = vadd.f32 %v7521_v26, %v7515_v21  ;;  %v5340_v26 = vsel %vm4071_vm9, %v5263_v51, 0.0 }
 0x231   :  { %v5292_v34 = vpop.permute.xlu0 %718  ;;  %v3055_v52 = vmul.f32 -1.442695, %v5317_v2 }
 0x232   :  { %1682 = vrot.lane.b32.xlu0 %v5087_v39, %s3679_s13  ;;  %7512 = vst [vmem:[#allocation88_spill] sm:$0xff] %v5292_v34  ;;  %v3053_v34 = vmul.f32 -1.442695, %v5304_v9  ;;  %v3054_v44 = vmul.f32 -1.442695, %v5324_v13 }
 0x233   :  { %v5294_v25 = vpop.permute.xlu1 %1523 }
 0x234   :  { %7513 = vst [vmem:[#allocation89_spill] sm:$0xff] %v5294_v25  ;;  %708 = vrot.lane.b32.xlu1 %v5263_v51, %s3672_s26  ;;  %3519 = vpow2.f32 %v3053_v34 }
 0x235   :  { %v5300_v5 = vpop.permute.xlu0 %1656  ;;  %3521 = vpow2.f32 %v3055_v52 }
 0x236   :  { %1032 = vrot.lane.b32.xlu0 %v5201_v24, %s3675_s29  ;;  %7514 = vst [vmem:[#allocation90_spill] sm:$0xff] %v5300_v5  ;;  %3523 = vpow2.f32 %v3054_v44 }
 0x237   :  { %v5306_v22 = vpop.permute.xlu1 %1547 }
 0x238   :  { %7517 = vst [vmem:[#allocation2_spill] sm:$0xff] %v5306_v22  ;;  %732 = vrot.lane.b32.xlu1 %v5272_v16, %s3672_s26 }
 0x239   :  { %v5312_v39 = vpop.permute.xlu0 %1680 }
 0x23a   :  { %1056 = vrot.lane.b32.xlu0 %v5212_v10, %s3675_s29  ;;  %7518 = vst [vmem:[#allocation7_spill] sm:$0xff] %v5312_v39  ;;  %v7523_v39 = vld [vmem:[#allocation10_spill] sm:$0xff] }
 0x23b   :  { %v5319_v5 = vpop.permute.xlu1 %1114  ;;  %v5331_v22 = vadd.f32 %v7523_v39, %v7515_v21  ;;  %v5355_v39 = vsel %vm4082_vm10, %v5272_v16, 0.0 }
 0x23c   :  { %7520 = vst [vmem:[#allocation8_spill] sm:$0xff] %v5319_v5  ;;  %1480 = vperm.xlu1 %3413, %v5010_v47  }
 0x23d   :  { %v5327_v42 = vpop.permute.xlu0 %1030  ;;  %v3056_v34 = vmul.f32 -1.442695, %v5331_v22 }
 0x23e   :  { %1311 = vperm.xlu0 %3412, %v5010_v47   ;;  %7522 = vst [vmem:[#allocation9_spill] sm:$0xff] %v5327_v42  ;;  %v3520_v42 = vpop.eup %3519 }
 0x23f   :  { %3525 = vpow2.f32 %v3056_v34 }
 0x240   :  { %3414 = vset.pattern.permute.xlu1 %v7464_v54  ;;  %v5335_v5 = vpop.permute.xlu1 %1162 }
 0x241   :  { %7524 = vst [vmem:[#allocation10_spill] sm:$0xff] %v5335_v5  ;;  %1601 = vperm.xlu1 %3414, %v5010_v47   ;;  %v5346_v21 = vpop.permute.xlu0 %1054 }
 0x242   :  { %853 = vrot.lane.b32.xlu0 %v5340_v26, %s3676_s30  ;;  %7525 = vst [vmem:[#allocation91_spill] sm:$0xff] %v5346_v21  ;;  %v397_v21 = vadd.f32 1.0, %v3520_v42 }
 0x243   :  { %3417 = vset.pattern.permute.xlu0 %v7468_v41 }
 0x244   :  { %v5350_v54 = vpop.permute.xlu1 %1233  ;;  %3527 = vrcp.f32 %v397_v21 }
 0x245   :  { %7526 = vst [vmem:[#allocation92_spill] sm:$0xff] %v5350_v54  ;;  %1670 = vrot.lane.b32.xlu1 %v5175_v37, %s3679_s13  ;;  %v3522_v54 = vpop.eup %3521 }
 0x246   :  { %877 = vrot.lane.b32.xlu0 %v5355_v39, %s3676_s30  ;;  %v5361_v5 = vpop.permute.xlu0 %782  ;;  %3415 = vset.pattern.permute.xlu1 %v7468_v41  ;;  %v3524_v41 = vpop.eup %3523 }
 0x247   :  { %7527 = vst [vmem:[#allocation93_spill] sm:$0xff] %v5361_v5 }
 0x248   :  { %v5364_v52 = vpop.permute.xlu1 %1257 }
 0x249   :  { %7528 = vst [vmem:[#allocation94_spill] sm:$0xff] %v5364_v52  ;;  %1694 = vrot.lane.b32.xlu1 %v5192_v38, %s3679_s13  ;;  %v3526_v5 = vpop.eup %3525  ;;  %v399_v52 = vadd.f32 1.0, %v3522_v54  ;;  %v398_v38 = vadd.f32 1.0, %v3524_v41  ;;  %v5396_v54 = vsel %vm4042_vm7, %v5177_v36, 0.0 }
 0x24a   :  { %1406 = vrot.lane.b32.xlu0 %v558_v48, %s3677_s11 }
 0x24b   :  { %v5369_v44 = vpop.permute.xlu0 %1730  ;;  %3529 = vrcp.f32 %v399_v52 }
 0x24c   :  { %v5371_v37 = vpop.permute.xlu1 %583  ;;  %3531 = vrcp.f32 %v398_v38 }
 0x24d   :  { %7529 = vst [vmem:[#allocation95_spill] sm:$0xff] %v5371_v37  ;;  %1044 = vrot.lane.b32.xlu1 %v558_v48, %s3675_s29  ;;  %v400_v37 = vadd.f32 1.0, %v3526_v5 }
 0x24e   :  { %1430 = vrot.lane.b32.xlu0 %v560_v56, %s3677_s11  ;;  %v3528_v5 = vpop.eup %3527 }
 0x24f   :  { %v5375_v34 = vpop.permute.xlu0 %1734  ;;  %3533 = vrcp.f32 %v400_v37  ;;  %v5410_v37 = vsel %vm4054_vm8, %v5194_v63, 0.0  ;;  %v5413_v41 = vmul.f32 %v3528_v5, %v5304_v9  ;;  %v7542_v5 = vld [vmem:[#allocation29_spill] sm:$0xff] }
 0x250   :  { %7530 = vst [vmem:[#allocation96_spill] sm:$0xff] %v5375_v34  ;;  %v5377_v25 = vpop.permute.xlu1 %607  ;;  %v7549_v34 = vld [vmem:[#allocation28_spill] sm:$0xff] }
 0x251   :  { %7531 = vst [vmem:[#allocation97_spill] sm:$0xff] %v5377_v25  ;;  %1068 = vrot.lane.b32.xlu1 %v560_v56, %s3675_s29  ;;  %7538 = vst [vmem:[#allocation104_spill] sm:$0xff] %v5413_v41  ;;  %v5431_v9 = vsel %vm3947_vm2, %v5413_v41, 0.0  ;;  %vm7553_vm2 = vcmp.lt.s32.totalorder %v4558_v6, 16 }
 0x252   :  { %1527 = vrot.lane.b32.xlu0 %v5263_v51, %s3674_s28  ;;  %vm7557_vm12 = vmmov %vm7553_vm2 }
 0x253   :  { %v5382_v42 = vpop.permute.xlu0 %1738  ;;  %v738_v1 = vsel %vm7557_vm12, %v4899_v15, %v4956_v35 }
 0x254   :  { %7532 = vst [vmem:[#allocation98_spill] sm:$0xff] %v5382_v42  ;;  %v5384_v48 = vpop.permute.xlu1 %706 }
 0x255   :  { %7533 = vst [vmem:[#allocation99_spill] sm:$0xff] %v5384_v48  ;;  %1880 = vperm.xlu1 %3415, %v5075_v45   ;;  %v3530_v38 = vpop.eup %3529  ;;  %v7551_v48 = vld [vmem:[#allocation44_spill] sm:$0xff] }
 0x256   :  { %1551 = vrot.lane.b32.xlu0 %v5272_v16, %s3674_s28 }
 0x257   :  { %v5389_v21 = vpop.permute.xlu0 %863 }
 0x258   :  { %7534 = vst [vmem:[#allocation100_spill] sm:$0xff] %v5389_v21  ;;  %v5391_v56 = vpop.permute.xlu1 %730 }
 0x259   :  { %7535 = vst [vmem:[#allocation101_spill] sm:$0xff] %v5391_v56  ;;  %841 = vrot.lane.b32.xlu1 %v5396_v54, %s3676_s30 }
 0x25a   :  { %1225 = vrot.lane.b32.xlu0 %v5396_v54, %s3678_s12  ;;  %3416 = vset.pattern.permute.xlu1 %v7445_v59  ;;  %v3532_v59 = vpop.eup %3531 }
 0x25b   :  { %v5402_v45 = vpop.permute.xlu0 %1392  ;;  %v3534_v51 = vpop.eup %3533 }
 0x25c   :  { %7536 = vst [vmem:[#allocation102_spill] sm:$0xff] %v5402_v45  ;;  %v5405_v52 = vpop.permute.xlu1 %1476  ;;  %v7543_v45 = vld [vmem:[#allocation37_spill] sm:$0xff]  ;;  %v5461_v56 = vmul.f32 %v3534_v51, %v5331_v22 }
 0x25d   :  { %7537 = vst [vmem:[#allocation103_spill] sm:$0xff] %v5405_v52  ;;  %865 = vrot.lane.b32.xlu1 %v5410_v37, %s3676_s30  ;;  %v5422_v52 = vmul.f32 %v3530_v38, %v5317_v2  ;;  %v5435_v21 = vmul.f32 %v7543_v45, %v7542_v5  ;;  %v7547_v38 = vld [vmem:[#allocation12_spill] sm:$0xff] }
 0x25e   :  { %1249 = vrot.lane.b32.xlu0 %v5410_v37, %s3678_s12  ;;  %v5450_v46 = vmul.f32 %v7543_v45, %v7547_v38  ;;  %v5473_v38 = vmul.f32 %v7549_v34, %v7439_v12  ;;  %v5549_v17 = vsel %vm4082_vm10, %v5461_v56, 0.0 }
 0x25f   :  { %v5419_v16 = vpop.permute.xlu0 %1416  ;;  %7540 = vst [vmem:[#allocation106_spill] sm:$0xff] %v5422_v52  ;;  %v5486_v22 = vsel %vm3999_vm3, %v5422_v52, 0.0  ;;  %vm7558_vm3 = vmmov %vm7553_vm2 }
 0x260   :  { %7539 = vst [vmem:[#allocation105_spill] sm:$0xff] %v5419_v16  ;;  %v7544_v16 = vld [vmem:[#allocation27_spill] sm:$0xff]  ;;  %7565 = vst [vmem:[#allocation108_spill] sm:$0xff] %v5549_v17 }
 0x261   :  { %1394 = vrot.lane.b32.xlu1 %v5201_v24, %s3677_s11  ;;  %v5426_v42 = vpop.permute.xlu1 %1597  ;;  %v5439_v25 = vmul.f32 %v7543_v45, %v7544_v16  ;;  %v5446_v24 = vmul.f32 %v3532_v59, %v5324_v13  ;;  %v5458_v16 = vmul.f32 %v7549_v34, %v7436_v14  ;;  %7550 = vst [vmem:[#allocation27_spill] sm:$0xff] %v5461_v56  ;;  %v7552_v13 = vld [vmem:[#allocation43_spill] sm:$0xff] }
 0x262   :  { %7541 = vst [vmem:[#allocation107_spill] sm:$0xff] %v5426_v42  ;;  %575 = vrot.lane.b32.xlu0 %v5431_v9, %s3673_s27  ;;  %v7548_v42 = vld [vmem:[#allocation31_spill] sm:$0xff]  ;;  %v5469_v59 = vmul.f32 %v7549_v34, %v7552_v13  ;;  %v750_v14 = vsel %vm7553_vm2, %v4876_v18, %v4936_v43 }
 0x263   :  { %v5443_v2 = vpop.permute.xlu0 %1513  ;;  %7546 = vst [vmem:[#allocation37_spill] sm:$0xff] %v5446_v24  ;;  %v5454_v5 = vmul.f32 %v7543_v45, %v7548_v42  ;;  %v7554_v42 = vld [vmem:[#allocation38_spill] sm:$0xff]  ;;  %v5544_v32 = vsel %vm4071_vm9, %v5446_v24, 0.0 }
 0x264   :  { %7545 = vst [vmem:[#allocation29_spill] sm:$0xff] %v5443_v2  ;;  %v5465_v2 = vmul.f32 %v7549_v34, %v7551_v48  ;;  %v5490_v48 = vmul.f32 %v7554_v42, %v7435_v30  ;;  %v5494_v12 = vmul.f32 %v7554_v42, %v4576_v23  ;;  %v756_v30 = vsel %vm7558_vm3, %v4956_v35, %v4876_v18 }
 0x265   :  { %1418 = vrot.lane.b32.xlu1 %v5212_v10, %s3677_s11  ;;  %v5481_v51 = vpop.permute.xlu1 %1668  ;;  %v744_v10 = vsel %vm7553_vm2, %v4936_v43, %v4899_v15  ;;  %v5514_v34 = vmul.f32 %v7554_v42, %v5015_v3  ;;  %v5518_v43 = vmul.f32 %v7554_v42, %v5032_v19  ;;  %v5523_v15 = vsel %vm4017_vm5, %v5446_v24, 0.0  ;;  %v7563_v3 = vld [vmem:[#allocation39_spill] sm:$0xff] }
 0x266   :  { %7555 = vst [vmem:[#allocation12_spill] sm:$0xff] %v5490_v48  ;;  %7556 = vst [vmem:[#allocation31_spill] sm:$0xff] %v5494_v12  ;;  %599 = vrot.lane.b32.xlu0 %v5486_v22, %s3673_s27  ;;  %v5528_v18 = vsel %vm4054_vm8, %v5422_v52, 0.0  ;;  %v5533_v35 = vsel %vm4042_vm7, %v5413_v41, 0.0  ;;  %v790_v45 = vmul.f32 %v7563_v3, %v750_v14  ;;  %v5539_v19 = vsel %vm4032_vm6, %v5461_v56, 0.0  ;;  %v7649_v48 = vld [vmem:[#allocation63_spill] sm:$0xff] }
 0x267   :  { %v5510_v23 = vpop.permute.xlu0 %1537  ;;  %7560 = vst [vmem:[#allocation44_spill] sm:$0xff] %v5518_v43  ;;  %7561 = vst [vmem:[#allocation43_spill] sm:$0xff] %v5528_v18  ;;  %v791_v33 = vmul.f32 %v7563_v3, %v744_v10  ;;  %v789_v13 = vmul.f32 %v7563_v3, %v756_v30  ;;  %v792_v14 = vmul.f32 %v7563_v3, %v738_v1  ;;  %vm7566_vm5 = vcmp.lt.s32.totalorder %v4558_v6, 17  ;;  %v7576_v3 = vld [vmem:[#allocation14_spill] sm:$0xff] }
 0x268   :  { %7559 = vst [vmem:[#allocation28_spill] sm:$0xff] %v5510_v23  ;;  %7562 = vst [vmem:[#allocation38_spill] sm:$0xff] %v5533_v35  ;;  %v629_v60 = vsel %vm7566_vm5, %v4969_v55, %v4997_v11  ;;  %vm7567_vm6 = vcmp.lt.s32.totalorder %v4558_v6, 112  ;;  %vm7575_vm3 = vcmp.lt.s32.totalorder %v4558_v6, 1  ;;  %v7581_v23 = vld [vmem:[#allocation18_spill] sm:$0xff] }
 0x269   :  { %7564 = vst [vmem:[#allocation39_spill] sm:$0xff] %v5544_v32  ;;  %1515 = vrot.lane.b32.xlu1 %v5177_v36, %s3674_s28  ;;  %v5560_v62 = vpop.permute.xlu1 %1692  ;;  %v1563_v0 = vsel %vm7567_vm6, %v4981_v29, %v4953_v49  ;;  %vm7568_vm7 = vmmov %vm7566_vm5 }
 0x26a   :  { %v623_v42 = vsel %vm7568_vm7, %v4997_v11, %v4979_v28  ;;  %vm7569_vm8 = vmmov %vm7566_vm5  ;;  %698 = vrot.lane.b32.xlu0 %v5413_v41, %s3672_s26 }
 0x26b   :  { %v617_v10 = vsel %vm7569_vm8, %v4979_v28, %v5005_v20  ;;  %vm7570_vm9 = vmmov %vm7566_vm5  ;;  %v5580_v30 = vpop.permute.xlu0 %1742  ;;  %vm7580_vm8 = vcmp.lt.s32.totalorder %v4558_v6, 113 }
 0x26c   :  { %v635_v1 = vsel %vm7570_vm9, %v5005_v20, %v4969_v55  ;;  %7571 = vst [vmem:[#allocation109_spill] sm:$0xff] %v5580_v30  ;;  %vm7572_vm10 = vmmov %vm7567_vm6  ;;  %v1086_v20 = vsel %vm7575_vm3, %v4987_v4, %v5021_v8  ;;  %v669_v30 = vmul.f32 %v7576_v3, %v629_v60  ;;  %v671_v60 = vmul.f32 %v7576_v3, %v617_v10  ;;  %v7585_v10 = vld [vmem:[#allocation23_spill] sm:$0xff] }
 0x26d   :  { %v1569_v11 = vsel %vm7572_vm10, %v4930_v27, %v4981_v29  ;;  %vm7573_vm12 = vmmov %vm7567_vm6  ;;  %v668_v36 = vmul.f32 %v7576_v3, %v635_v1  ;;  %1539 = vrot.lane.b32.xlu1 %v5194_v63, %s3674_s28  ;;  %v1126_v17 = vmul.f32 %v7581_v23, %v1086_v20 }
 0x26e   :  { %v1557_v28 = vsel %vm7573_vm12, %v4953_v49, %v4989_v61  ;;  %vm7574_vm2 = vmmov %vm7567_vm6  ;;  %722 = vrot.lane.b32.xlu0 %v5422_v52, %s3672_s26  ;;  %v1608_v1 = vmul.f32 %v7585_v10, %v1569_v11  ;;  %v5647_v12 = vadd.f32 %v790_v45, %v669_v30 }
 0x26f   :  { %v1575_v55 = vsel %vm7574_vm2, %v4989_v61, %v4930_v27  ;;  %vm7577_vm5 = vmmov %vm7575_vm3  ;;  %v670_v61 = vmul.f32 %v7576_v3, %v623_v42  ;;  %v1610_v32 = vmul.f32 %v7585_v10, %v1557_v28  ;;  %v5659_v28 = vadd.f32 %v792_v14, %v671_v60 }
 0x270   :  { %v1080_v29 = vsel %vm7577_vm5, %v5021_v8, %v4994_v58  ;;  %vm7578_vm6 = vmmov %vm7575_vm3  ;;  %v1448_v8 = vsel %vm7580_vm8, %v5017_v40, %v5095_v31  ;;  %v5641_v63 = vpop.permute.xlu0 %911  ;;  %v1611_v43 = vmul.f32 %v7585_v10, %v1575_v55  ;;  %v5662_v55 = vadd.f32 %v5435_v21, %v1126_v17  ;;  %v7595_v17 = vld [vmem:[#allocation34_spill] sm:$0xff] }
 0x271   :  { %v1074_v49 = vsel %vm7578_vm6, %v4994_v58, %v5044_v53  ;;  %vm7579_vm7 = vmmov %vm7575_vm3  ;;  %v5620_v58 = vpop.permute.xlu1 %1042  ;;  %v1127_v20 = vmul.f32 %v7581_v23, %v1080_v29  ;;  %1746 = vperm.xlu1 %3416, %v5010_v47   ;;  %7587 = vst [vmem:[#allocation14_spill] sm:$0xff] %v5659_v28  ;;  %vm7594_vm2 = vcmp.lt.s32.totalorder %v4558_v6, 15 }
 0x272   :  { %v1092_v27 = vsel %vm7579_vm7, %v5044_v53, %v4987_v4  ;;  %vm7582_vm9 = vmmov %vm7580_vm8  ;;  %7588 = vst [vmem:[#allocation18_spill] sm:$0xff] %v5662_v55  ;;  %1660 = vrot.lane.b32.xlu0 %v5396_v54, %s3679_s13  ;;  %v7597_v54 = vld [vmem:[#allocation48_spill] sm:$0xff]  ;;  %vm7602_vm7 = vcmp.lt.s32.totalorder %v4558_v6, 127 }
 0x273   :  { %v1442_v4 = vsel %vm7582_vm9, %v5095_v31, %v5034_v50  ;;  %vm7583_vm10 = vmmov %vm7580_vm8  ;;  %v1125_v3 = vmul.f32 %v7581_v23, %v1092_v27  ;;  %v1128_v31 = vmul.f32 %v7581_v23, %v1074_v49  ;;  %v5655_v49 = vadd.f32 %v791_v33, %v670_v61  ;;  %v7592_v33 = vld [vmem:[#allocation49_spill] sm:$0xff]  ;;  %v7634_v55 = vld [vmem:[#allocation68_spill] sm:$0xff] }
 0x274   :  { %v1436_v53 = vsel %vm7583_vm10, %v5034_v50, %v5104_v7  ;;  %vm7584_vm12 = vmmov %vm7580_vm8  ;;  %v1609_v50 = vmul.f32 %v7585_v10, %v1563_v0  ;;  %v5657_v0 = vadd.f32 %v789_v13, %v668_v36  ;;  %v5667_v45 = vadd.f32 %v5439_v25, %v1127_v20  ;;  %v7593_v36 = vld [vmem:[#allocation47_spill] sm:$0xff]  ;;  %v5681_v21 = vpop.permute.xlu0 %915 }
 0x275   :  { %v1454_v42 = vsel %vm7584_vm12, %v5104_v7, %v5017_v40  ;;  %v7586_v7 = vld [vmem:[#allocation20_spill] sm:$0xff]  ;;  %v5653_v23 = vpop.permute.xlu1 %1066  ;;  %v5670_v30 = vadd.f32 %v5450_v46, %v1125_v3  ;;  %v5673_v47 = vadd.f32 %v5454_v5, %v1128_v31  ;;  %v5679_v13 = vsel %vm7594_vm2, %v7593_v36, %v7592_v33  ;;  %vm7596_vm3 = vmmov %vm7594_vm2  ;;  %1237 = vrot.lane.b32.xlu1 %v5340_v26, %s3678_s12  ;;  %v7611_v3 = vld [vmem:[#allocation66_spill] sm:$0xff] }
 0x276   :  { %v1487_v40 = vmul.f32 %v7586_v7, %v1448_v8  ;;  %v1488_v11 = vmul.f32 %v7586_v7, %v1442_v4  ;;  %v1489_v29 = vmul.f32 %v7586_v7, %v1436_v53  ;;  %v1490_v27 = vmul.f32 %v7586_v7, %v1454_v42  ;;  %7589 = vst [vmem:[#allocation23_spill] sm:$0xff] %v5667_v45  ;;  %vm7598_vm5 = vmmov %vm7594_vm2  ;;  %v7600_v4 = vld [vmem:[#allocation51_spill] sm:$0xff]  ;;  %v7612_v31 = vld [vmem:[#allocation17_spill] sm:$0xff] }
 0x277   :  { %7590 = vst [vmem:[#allocation20_spill] sm:$0xff] %v5670_v30  ;;  %7591 = vst [vmem:[#allocation110_spill] sm:$0xff] %v5673_v47  ;;  %v5687_v25 = vsel %vm7596_vm3, %v7595_v17, %v7593_v36  ;;  %v5693_v46 = vsel %vm7598_vm5, %v7592_v33, %v7597_v54  ;;  %v7601_v53 = vld [vmem:[#allocation19_spill] sm:$0xff]  ;;  %vm7613_vm10 = vcmp.lt.s32.totalorder %v4558_v6, 17  ;;  %v7614_v7 = vld [vmem:[#allocation64_spill] sm:$0xff]  ;;  %1684 = vrot.lane.b32.xlu0 %v5410_v37, %s3679_s13  ;;  %vm7620_vm3 = vcmp.lt.s32.totalorder %v4558_v6, 111 }
 0x278   :  { %vm7599_vm6 = vmmov %vm7594_vm2  ;;  %v5701_v14 = vadd.f32 %v1608_v1, %v1487_v40  ;;  %v5703_v61 = vadd.f32 %v1609_v50, %v1488_v11  ;;  %v5705_v60 = vadd.f32 %v1610_v32, %v1489_v29  ;;  %v5707_v8 = vadd.f32 %v1611_v43, %v1490_v27  ;;  %v7605_v1 = vld [vmem:[#allocation53_spill] sm:$0xff]  ;;  %v7608_v32 = vld [vmem:[#allocation3_spill] sm:$0xff] }
 0x279   :  { %v5699_v5 = vsel %vm7599_vm6, %v7597_v54, %v7595_v17  ;;  %v5713_v42 = vsel %vm7602_vm7, %v7601_v53, %v7600_v4  ;;  %v5717_v10 = vpop.permute.xlu1 %1876  ;;  %vm7606_vm8 = vmmov %vm7602_vm7  ;;  %v624_v50 = vsel %vm7613_vm10, %v7612_v31, %v7611_v3  ;;  %v7618_v29 = vld [vmem:[#allocation16_spill] sm:$0xff]  ;;  %v7619_v27 = vld [vmem:[#allocation62_spill] sm:$0xff]  ;;  %vm7623_vm5 = vcmp.lt.s32.totalorder %v4558_v6, 16  ;;  %1261 = vrot.lane.b32.xlu1 %v5355_v39, %s3678_s12 }
 0x27a   :  { %7603 = vst [vmem:[#allocation49_spill] sm:$0xff] %v5713_v42  ;;  %7604 = vst [vmem:[#allocation47_spill] sm:$0xff] %v5717_v10  ;;  %v5723_v20 = vsel %vm7606_vm8, %v7605_v1, %v7601_v53  ;;  %v5751_v33 = vsel %vm7620_vm3, %v7619_v27, %v7618_v29  ;;  %v7621_v36 = vld [vmem:[#allocation4_spill] sm:$0xff]  ;;  %v7622_v17 = vld [vmem:[#allocation65_spill] sm:$0xff]  ;;  %v5761_v53 = vpop.permute.xlu0 %919 }
 0x27b   :  { %7607 = vst [vmem:[#allocation34_spill] sm:$0xff] %v5723_v20  ;;  %vm7609_vm9 = vmmov %vm7602_vm7  ;;  %v745_v54 = vsel %vm7623_vm5, %v7622_v17, %v7621_v36  ;;  %v7630_v10 = vld [vmem:[#allocation69_spill] sm:$0xff]  ;;  %v7636_v30 = vld [vmem:[#allocation67_spill] sm:$0xff]  ;;  %1034 = vrot.lane.b32.xlu0 %v5431_v9, %s3675_s29 }
 0x27c   :  { %v5729_v43 = vsel %vm7609_vm9, %v7600_v4, %v7608_v32  ;;  %vm7615_vm12 = vmmov %vm7613_vm10  ;;  %v7624_v4 = vld [vmem:[#allocation33_spill] sm:$0xff]  ;;  %7626 = vst [vmem:[#allocation19_spill] sm:$0xff] %v5761_v53 }
 0x27d   :  { %7610 = vst [vmem:[#allocation48_spill] sm:$0xff] %v5729_v43  ;;  %v630_v40 = vsel %vm7615_vm12, %v7614_v7, %v7612_v31  ;;  %vm7616_vm2 = vmmov %vm7602_vm7  ;;  %v7633_v47 = vld [vmem:[#allocation13_spill] sm:$0xff]  ;;  %587 = vrot.lane.b32.xlu1 %v5523_v15, %s3673_s27 }
 0x27e   :  { %v5745_v11 = vsel %vm7616_vm2, %v7608_v32, %v7605_v1  ;;  %vm7625_vm6 = vmmov %vm7623_vm5  ;;  %v7627_v1 = vmov 0   ;;  %v7628_v32 = vld [vmem:[#allocation15_spill] sm:$0xff] }
 0x27f   :  { %7617 = vst [vmem:[#allocation51_spill] sm:$0xff] %v5745_v11  ;;  %v751_v37 = vsel %vm7625_vm6, %v7624_v4, %v7622_v17  ;;  %3418 = vset.pattern.permute.xlu1 %v7627_v1  ;;  %vm7629_vm7 = vmmov %vm7620_vm3  ;;  %v7638_v11 = vld [vmem:[#allocation24_spill] sm:$0xff]  ;;  %1058 = vrot.lane.b32.xlu0 %v5486_v22, %s3675_s29 }
 0x280   :  { %v5768_v31 = vsel %vm7629_vm7, %v7628_v32, %v7619_v27  ;;  %vm7631_vm8 = vmmov %vm7613_vm10  ;;  %vm7635_vm10 = vcmp.lt.s32.totalorder %v4558_v6, 1  ;;  %v673_v43 = vmul.f32 %v7638_v11, %v630_v40  ;;  %v674_v42 = vmul.f32 %v7638_v11, %v624_v50  ;;  %v7643_v40 = vld [vmem:[#allocation72_spill] sm:$0xff] }
 0x281   :  { %v618_v45 = vsel %vm7631_vm8, %v7611_v3, %v7630_v10  ;;  %vm7632_vm9 = vmmov %vm7631_vm8  ;;  %v1087_v1 = vsel %vm7635_vm10, %v7634_v55, %v7633_v47  ;;  %v7639_v3 = vld [vmem:[#allocation5_spill] sm:$0xff]  ;;  %611 = vrot.lane.b32.xlu1 %v5539_v19, %s3673_s27 }
 0x282   :  { %v636_v17 = vsel %vm7632_vm9, %v7630_v10, %v7614_v7  ;;  %vm7637_vm12 = vmmov %vm7623_vm5  ;;  %v7641_v10 = vld [vmem:[#allocation25_spill] sm:$0xff]  ;;  %vm7653_vm9 = vcmp.lt.s32.totalorder %v4558_v6, 112 }
 0x283   :  { %v757_v27 = vsel %vm7637_vm12, %v7636_v30, %v7624_v4  ;;  %vm7640_vm2 = vmmov %vm7635_vm10  ;;  %v794_v7 = vmul.f32 %v7641_v10, %v751_v37  ;;  %v795_v35 = vmul.f32 %v7641_v10, %v745_v54  ;;  %v672_v28 = vmul.f32 %v7638_v11, %v636_v17  ;;  %v7646_v54 = vld [vmem:[#allocation26_spill] sm:$0xff] }
 0x284   :  { %v1081_v20 = vsel %vm7640_vm2, %v7633_v47, %v7639_v3  ;;  %vm7642_vm3 = vmmov %vm7623_vm5  ;;  %v5806_v47 = vpop.permute.xlu1 %661  ;;  %v675_v37 = vmul.f32 %v7638_v11, %v618_v45  ;;  %v1130_v53 = vmul.f32 %v7646_v54, %v1087_v1  ;;  %v793_v45 = vmul.f32 %v7641_v10, %v757_v27 }
 0x285   :  { %v739_v4 = vsel %vm7642_vm3, %v7621_v36, %v7636_v30  ;;  %vm7644_vm5 = vmmov %vm7640_vm2  ;;  %7645 = vst [vmem:[#allocation53_spill] sm:$0xff] %v5806_v47  ;;  %v5815_v36 = vpop.permute.xlu0 %923  ;;  %v1131_v11 = vmul.f32 %v7646_v54, %v1081_v20  ;;  %v5828_v47 = vadd.f32 %v794_v7, %v673_v43  ;;  %v7654_v20 = vld [vmem:[#allocation73_spill] sm:$0xff]  ;;  %vm7665_vm3 = vcmp.lt.s32.totalorder %v4558_v6, 113  ;;  %710 = vrot.lane.b32.xlu1 %v5446_v24, %s3672_s26 }
 0x286   :  { %v1093_v50 = vsel %vm7644_vm5, %v7643_v40, %v7634_v55  ;;  %vm7647_vm6 = vmmov %vm7640_vm2  ;;  %7648 = vst [vmem:[#allocation3_spill] sm:$0xff] %v5815_v36  ;;  %v1702_v55 = vsel %vm7629_vm7, %v7618_v29, %v7649_v48  ;;  %v796_v1 = vmul.f32 %v7641_v10, %v739_v4  ;;  %v7652_v36 = vld [vmem:[#allocation89_spill] sm:$0xff]  ;;  %v5852_v27 = vadd.f32 %v793_v45, %v672_v28  ;;  %v7671_v45 = vld [vmem:[#allocation32_spill] sm:$0xff] }
 0x287   :  { %v1075_v30 = vsel %vm7647_vm6, %v7639_v3, %v7643_v40  ;;  %vm7650_vm8 = vmmov %vm7629_vm7  ;;  %v5830_v3 = vadd.f32 %v795_v35, %v674_v42  ;;  %v1129_v40 = vmul.f32 %v7646_v54, %v1093_v50  ;;  %v5857_v7 = vadd.f32 %v5458_v16, %v1130_v53  ;;  %v7668_v53 = vld [vmem:[#allocation87_spill] sm:$0xff] }
 0x288   :  { %v1720_v17 = vsel %vm7650_vm8, %v7649_v48, %v7628_v32  ;;  %v1132_v29 = vmul.f32 %v7646_v54, %v1075_v30  ;;  %v1564_v48 = vsel %vm7653_vm9, %v7652_v36, %v5239_v57  ;;  %vm7655_vm10 = vmmov %vm7653_vm9  ;;  %v7656_v32 = vld [vmem:[#allocation2_spill] sm:$0xff]  ;;  %v5850_v42 = vpop.permute.xlu1 %839  ;;  %v5854_v10 = vadd.f32 %v796_v1, %v675_v37  ;;  %v7663_v54 = vld [vmem:[#allocation71_spill] sm:$0xff] }
 0x289   :  { %7651 = vst [vmem:[#allocation66_spill] sm:$0xff] %v5830_v3  ;;  %v1570_v43 = vsel %vm7655_vm10, %v7654_v20, %v7652_v36  ;;  %vm7657_vm12 = vmmov %vm7653_vm9  ;;  %v5863_v50 = vpop.permute.xlu0 %1223  ;;  %v7664_v30 = vld [vmem:[#allocation85_spill] sm:$0xff]  ;;  %v7666_v37 = vld [vmem:[#allocation70_spill] sm:$0xff]  ;;  %v1613_v1 = vmul.f32 %v7671_v45, %v1564_v48  ;;  %vm7676_vm8 = vcmp.lt.s32.totalorder %v4558_v6, 15  ;;  %734 = vrot.lane.b32.xlu1 %v5461_v56, %s3672_s26 }
 0x28a   :  { %v1558_v35 = vsel %vm7657_vm12, %v5239_v57, %v7656_v32  ;;  %7658 = vst [vmem:[#allocation17_spill] sm:$0xff] %v5854_v10  ;;  %7659 = vst [vmem:[#allocation64_spill] sm:$0xff] %v5857_v7  ;;  %v5866_v57 = vadd.f32 %v5465_v2, %v1131_v11  ;;  %v1443_v28 = vsel %vm7665_vm3, %v7664_v30, %v7663_v54  ;;  %v3648_v48 = vld [vmem:[%s7111_s2 + $0x20] sm:$0xff]  ;;  %v7685_v10 = vld [vmem:[#allocation92_spill] sm:$0xff] }
 0x28b   :  { %vm7660_vm2 = vmmov %vm7653_vm9  ;;  %7661 = vst [vmem:[#allocation16_spill] sm:$0xff] %v5863_v50  ;;  %v1612_v11 = vmul.f32 %v7671_v45, %v1570_v43  ;;  %v7675_v50 = vld [vmem:[#allocation79_spill] sm:$0xff]  ;;  %1884 = vperm.xlu0 %3417, %v3648_v48   ;;  %v1754_v7 = vmul.f32 %v5369_v44, %v5751_v33  ;;  %v7720_v3 = vld [vmem:[#allocation97_spill] sm:$0xff] }
 0x28c   :  { %v1576_v4 = vsel %vm7660_vm2, %v7656_v32, %v7654_v20  ;;  %7662 = vst [vmem:[#allocation62_spill] sm:$0xff] %v5866_v57  ;;  %vm7667_vm5 = vmmov %vm7665_vm3  ;;  %v1614_v20 = vmul.f32 %v7671_v45, %v1558_v35  ;;  %v5890_v32 = vadd.f32 %v5469_v59, %v1129_v40  ;;  %v5905_v35 = vpop.permute.xlu1 %851  ;;  %v7677_v59 = vld [vmem:[#allocation77_spill] sm:$0xff]  ;;  %v7679_v40 = vld [vmem:[#allocation30_spill] sm:$0xff]  ;;  %vm7686_vm2 = vcmp.lt.s32.totalorder %v4558_v6, 127 }
 0x28d   :  { %v1449_v16 = vsel %vm7667_vm5, %v7666_v37, %v7664_v30  ;;  %vm7669_vm6 = vmmov %vm7665_vm3  ;;  %v5893_v30 = vadd.f32 %v5473_v38, %v1132_v29  ;;  %v1615_v43 = vmul.f32 %v7671_v45, %v1576_v4  ;;  %v5916_v4 = vpop.permute.xlu0 %1247  ;;  %v7681_v45 = vld [vmem:[#allocation82_spill] sm:$0xff]  ;;  %1672 = vrot.lane.b32.xlu1 %v5340_v26, %s3679_s13 }
 0x28e   :  { %v1437_v36 = vsel %vm7669_vm6, %v7663_v54, %v7668_v53  ;;  %vm7670_vm7 = vmmov %vm7665_vm3  ;;  %7672 = vst [vmem:[#allocation4_spill] sm:$0xff] %v5890_v32  ;;  %v7674_v54 = vld [vmem:[#allocation11_spill] sm:$0xff]  ;;  %v1491_v29 = vmul.f32 %v7679_v40, %v1449_v16  ;;  %v7684_v32 = vld [vmem:[#allocation78_spill] sm:$0xff] }
 0x28f   :  { %v1455_v2 = vsel %vm7670_vm7, %v7668_v53, %v7666_v37  ;;  %7673 = vst [vmem:[#allocation65_spill] sm:$0xff] %v5893_v30  ;;  %v5899_v37 = vsel %vm7676_vm8, %v7675_v50, %v7674_v54  ;;  %vm7678_vm9 = vmmov %vm7676_vm8  ;;  %v1492_v53 = vmul.f32 %v7679_v40, %v1443_v28  ;;  %v1493_v30 = vmul.f32 %v7679_v40, %v1437_v36 }
 0x290   :  { %v5911_v38 = vsel %vm7678_vm9, %v7677_v59, %v7675_v50  ;;  %7680 = vst [vmem:[#allocation33_spill] sm:$0xff] %v5916_v4  ;;  %vm7682_vm10 = vmmov %vm7676_vm8  ;;  %v1494_v16 = vmul.f32 %v7679_v40, %v1455_v2  ;;  %v1753_v28 = vmul.f32 %v5369_v44, %v5768_v31  ;;  %v1636_v36 = vadd.f32 %v1612_v11, %v1491_v29  ;;  %v7688_v2 = vld [vmem:[#allocation76_spill] sm:$0xff]  ;;  %v5952_v33 = vpop.permute.xlu1 %875 }
 0x291   :  { %v5922_v48 = vsel %vm7682_vm10, %v7674_v54, %v7681_v45  ;;  %vm7683_vm12 = vmmov %vm7676_vm8  ;;  %v1637_v57 = vadd.f32 %v1613_v1, %v1492_v53  ;;  %v1638_v4 = vadd.f32 %v1614_v20, %v1493_v30  ;;  %v1756_v11 = vmul.f32 %v5369_v44, %v1720_v17  ;;  %867 = vrot.lane.b32.xlu0 %v5528_v18, %s3676_s30  ;;  %v7691_v1 = vld [vmem:[#allocation94_spill] sm:$0xff]  ;;  %v5971_v40 = vpop.permute.xlu0 %573 }
 0x292   :  { %v5928_v50 = vsel %vm7683_vm12, %v7681_v45, %v7677_v59  ;;  %v1639_v54 = vadd.f32 %v1615_v43, %v1494_v16  ;;  %v5941_v59 = vsel %vm7686_vm2, %v7685_v10, %v7684_v32  ;;  %vm7689_vm3 = vmmov %vm7686_vm2  ;;  %v7696_v17 = vld [vmem:[#allocation90_spill] sm:$0xff]  ;;  %vm7697_vm7 = vcmp.lt.s32.totalorder %v4558_v6, 111  ;;  %7698 = vst [vmem:[#allocation67_spill] sm:$0xff] %v5971_v40  ;;  %v7704_v16 = vld [vmem:[#allocation95_spill] sm:$0xff]  ;;  %1696 = vrot.lane.b32.xlu1 %v5355_v39, %s3679_s13 }
 0x293   :  { %7687 = vst [vmem:[#allocation15_spill] sm:$0xff] %v5941_v59  ;;  %v5947_v31 = vsel %vm7689_vm3, %v7688_v2, %v7685_v10  ;;  %vm7692_vm5 = vmmov %vm7686_vm2  ;;  %v1755_v10 = vmul.f32 %v5369_v44, %v1702_v55  ;;  %v1715_v43 = vsel %vm7697_vm7, %v7696_v17, %v5481_v51  ;;  %v5974_v29 = vadd.f32 %v1753_v28, %v5701_v14  ;;  %v7703_v14 = vld [vmem:[#allocation83_spill] sm:$0xff]  ;;  %v7715_v40 = vld [vmem:[#allocation96_spill] sm:$0xff] }
 0x294   :  { %7690 = vst [vmem:[#allocation69_spill] sm:$0xff] %v5947_v31  ;;  %v5958_v20 = vsel %vm7692_vm5, %v7684_v32, %v7691_v1  ;;  %vm7694_vm6 = vmmov %vm7686_vm2  ;;  %v7699_v32 = vld [vmem:[#allocation7_spill] sm:$0xff]  ;;  %v5989_v45 = vadd.f32 %v1754_v7, %v5703_v61  ;;  %vm7705_vm12 = vcmp.lt.s32.totalorder %v4558_v6, 17  ;;  %vm7710_vm3 = vcmp.lt.s32.totalorder %v4558_v6, 16  ;;  %v7711_v61 = vld [vmem:[#allocation88_spill] sm:$0xff] }
 0x295   :  { %7693 = vst [vmem:[#allocation13_spill] sm:$0xff] %v5958_v20  ;;  %v5964_v30 = vsel %vm7694_vm6, %v7691_v1, %v7688_v2  ;;  %vm7700_vm8 = vmmov %vm7697_vm7  ;;  %v625_v28 = vsel %vm7705_vm12, %v7704_v16, %v7703_v14  ;;  %v7708_v1 = vld [vmem:[#allocation99_spill] sm:$0xff]  ;;  %1396 = vrot.lane.b32.xlu0 %v5431_v9, %s3677_s11  ;;  %v6019_v20 = vpop.permute.xlu1 %1404  ;;  %v6028_v59 = vpop.permute.xlu0 %597  ;;  %v7719_v31 = vld [vmem:[#allocation41_spill] sm:$0xff] }
 0x296   :  { %7695 = vst [vmem:[#allocation68_spill] sm:$0xff] %v5964_v30  ;;  %v1709_v53 = vsel %vm7700_vm8, %v5481_v51, %v7699_v32  ;;  %vm7701_vm9 = vmmov %vm7697_vm7  ;;  %v7706_v51 = vld [vmem:[#allocation80_spill] sm:$0xff]  ;;  %v1757_v30 = vmul.f32 %v7715_v40, %v1715_v43  ;;  %v6031_v43 = vadd.f32 %v1755_v10, %v5705_v60  ;;  %1046 = vrot.lane.b32.xlu1 %v5523_v15, %s3675_s29 }
 0x297   :  { %v1703_v44 = vsel %vm7701_vm9, %v7699_v32, %v5560_v62  ;;  %vm7702_vm10 = vmmov %vm7697_vm7  ;;  %v7709_v32 = vld [vmem:[#allocation86_spill] sm:$0xff]  ;;  %7716 = vst [vmem:[#allocation24_spill] sm:$0xff] %v6019_v20 }
 0x298   :  { %v1721_v55 = vsel %vm7702_vm10, %v5560_v62, %v7696_v17  ;;  %vm7707_vm2 = vmmov %vm7705_vm12  ;;  %v752_v24 = vsel %vm7710_vm3, %v7709_v32, %v7708_v1  ;;  %v6006_v62 = vadd.f32 %v1756_v11, %v5707_v8  ;;  %v7713_v17 = vld [vmem:[#allocation101_spill] sm:$0xff]  ;;  %v1758_v11 = vmul.f32 %v7715_v40, %v1709_v53 }
 0x299   :  { %v631_v2 = vsel %vm7707_vm2, %v7706_v51, %v7704_v16  ;;  %vm7712_vm5 = vmmov %vm7710_vm3  ;;  %v1760_v56 = vmul.f32 %v7715_v40, %v1721_v55  ;;  %v798_v18 = vmul.f32 %v7719_v31, %v752_v24  ;;  %1420 = vrot.lane.b32.xlu0 %v5486_v22, %s3677_s11  ;;  %vm7729_vm10 = vcmp.lt.s32.totalorder %v4558_v6, 1 }
 0x29a   :  { %v746_v7 = vsel %vm7712_vm5, %v7708_v1, %v7711_v61  ;;  %vm7714_vm6 = vmmov %vm7710_vm3  ;;  %v1759_v1 = vmul.f32 %v7715_v40, %v1703_v44  ;;  %v6061_v26 = vadd.f32 %v1758_v11, %v1637_v57  ;;  %vm7736_vm5 = vcmp.lt.s32.totalorder %v4558_v6, 15  ;;  %1070 = vrot.lane.b32.xlu1 %v5539_v19, %s3675_s29 }
 0x29b   :  { %v740_v16 = vsel %vm7714_vm6, %v7711_v61, %v7713_v17  ;;  %vm7717_vm7 = vmmov %vm7710_vm3  ;;  %v7718_v61 = vld [vmem:[#allocation35_spill] sm:$0xff]  ;;  %v799_v44 = vmul.f32 %v7719_v31, %v746_v7  ;;  %v6067_v7 = vpop.permute.xlu0 %696 }
 0x29c   :  { %v758_v8 = vsel %vm7717_vm7, %v7713_v17, %v7709_v32  ;;  %v677_v9 = vmul.f32 %v7718_v61, %v631_v2  ;;  %v678_v20 = vmul.f32 %v7718_v61, %v625_v28  ;;  %vm7721_vm8 = vmmov %vm7707_vm2  ;;  %v800_v55 = vmul.f32 %v7719_v31, %v740_v16 }
 0x29d   :  { %v619_v53 = vsel %vm7721_vm8, %v7703_v14, %v7720_v3  ;;  %vm7722_vm9 = vmmov %vm7707_vm2  ;;  %v797_v24 = vmul.f32 %v7719_v31, %v758_v8  ;;  %v6052_v28 = vadd.f32 %v1757_v30, %v1636_v36  ;;  %v6056_v14 = vpop.permute.xlu1 %1428  ;;  %v6063_v2 = vadd.f32 %v1759_v1, %v1638_v4  ;;  %v7728_v4 = vld [vmem:[#allocation91_spill] sm:$0xff]  ;;  %1517 = vrot.lane.b32.xlu0 %v5413_v41, %s3674_s28 }
 0x29e   :  { %v637_v40 = vsel %vm7722_vm9, %v7720_v3, %v7706_v51  ;;  %7724 = vst [vmem:[#allocation5_spill] sm:$0xff] %v6056_v14  ;;  %v6065_v32 = vadd.f32 %v1760_v56, %v1639_v54  ;;  %v679_v30 = vmul.f32 %v7718_v61, %v619_v53  ;;  %v822_v17 = vadd.f32 %v798_v18, %v677_v9  ;;  %v7730_v54 = vld [vmem:[#allocation9_spill] sm:$0xff]  ;;  %vm7731_vm12 = vmmov %vm7729_vm10  ;;  %v7741_v53 = vld [vmem:[#allocation19_spill] sm:$0xff] }
 0x29f   :  { %v676_v22 = vmul.f32 %v7718_v61, %v637_v40  ;;  %v823_v8 = vadd.f32 %v799_v44, %v678_v20  ;;  %v1082_v56 = vsel %vm7729_vm10, %v5620_v58, %v7728_v4  ;;  %v1088_v11 = vsel %vm7731_vm12, %v7730_v54, %v5620_v58  ;;  %v6113_v40 = vpop.permute.xlu0 %720  ;;  %v7732_v44 = vld [vmem:[#allocation36_spill] sm:$0xff]  ;;  %vm7733_vm2 = vmmov %vm7729_vm10  ;;  %v7766_v41 = vld [vmem:[#allocation39_spill] sm:$0xff] }
 0x2a0   :  { %v934_v1 = vmul.f32 %v5641_v63, %v5699_v5  ;;  %v6091_v61 = vadd.f32 %v800_v55, %v679_v30  ;;  %v935_v9 = vmul.f32 %v5641_v63, %v5687_v25  ;;  %v936_v25 = vmul.f32 %v5641_v63, %v5679_v13  ;;  %vm7734_vm3 = vmmov %vm7733_vm2  ;;  %v7735_v20 = vld [vmem:[#allocation100_spill] sm:$0xff] }
 0x2a1   :  { %v6089_v18 = vadd.f32 %v797_v24, %v676_v22  ;;  %v6100_v58 = vpop.permute.xlu1 %1525  ;;  %v1134_v24 = vmul.f32 %v7732_v44, %v1088_v11  ;;  %v1135_v55 = vmul.f32 %v7732_v44, %v1082_v56  ;;  %v1076_v22 = vsel %vm7733_vm2, %v7728_v4, %v5653_v23  ;;  %vm7737_vm6 = vmmov %vm7736_vm5  ;;  %1541 = vrot.lane.b32.xlu0 %v5422_v52, %s3674_s28  ;;  %v7756_v51 = vld [vmem:[#allocation48_spill] sm:$0xff] }
 0x2a2   :  { %v1094_v30 = vsel %vm7734_vm3, %v5653_v23, %v7730_v54  ;;  %v937_v5 = vmul.f32 %v5641_v63, %v5693_v46  ;;  %v958_v13 = vadd.f32 %v934_v1, %v5657_v0  ;;  %v891_v56 = vsel %vm7736_vm5, %v5905_v35, %v7735_v20  ;;  %vm7743_vm7 = vmmov %vm7736_vm5 }
 0x2a3   :  { %v897_v4 = vsel %vm7737_vm6, %v5850_v42, %v5905_v35  ;;  %v959_v23 = vadd.f32 %v935_v9, %v5647_v12  ;;  %v938_v63 = vmul.f32 %v5681_v21, %v5928_v50  ;;  %v939_v0 = vmul.f32 %v5681_v21, %v5911_v38  ;;  %v6156_v1 = vpop.permute.xlu0 %927  ;;  %vm7744_vm8 = vmmov %vm7736_vm5 }
 0x2a4   :  { %v940_v46 = vmul.f32 %v5681_v21, %v5899_v37  ;;  %v6150_v35 = vadd.f32 %v936_v25, %v5655_v49  ;;  %v1133_v11 = vmul.f32 %v7732_v44, %v1094_v30  ;;  %v1136_v12 = vmul.f32 %v7732_v44, %v1076_v22  ;;  %7739 = vst [vmem:[#allocation72_spill] sm:$0xff] %v6156_v1  ;;  %v7740_v37 = vld [vmem:[#allocation12_spill] sm:$0xff]  ;;  %v7742_v25 = vld [vmem:[#allocation14_spill] sm:$0xff] }
 0x2a5   :  { %v6147_v54 = vpop.permute.xlu1 %1549  ;;  %v941_v50 = vmul.f32 %v5681_v21, %v5922_v48  ;;  %v6159_v38 = vadd.f32 %v5514_v34, %v1134_v24  ;;  %v6162_v9 = vadd.f32 %v7740_v37, %v1135_v55  ;;  %v943_v39 = vmul.f32 %v7741_v53, %v897_v4  ;;  %v7746_v55 = vld [vmem:[#allocation66_spill] sm:$0xff] }
 0x2a6   :  { %7738 = vst [vmem:[#allocation25_spill] sm:$0xff] %v6147_v54  ;;  %v944_v49 = vmul.f32 %v7741_v53, %v891_v56  ;;  %v961_v57 = vadd.f32 %v937_v5, %v7742_v25  ;;  %v885_v44 = vsel %vm7743_vm7, %v7735_v20, %v5952_v33  ;;  %v903_v34 = vsel %vm7744_vm8, %v5952_v33, %v5850_v42  ;;  %v7747_v20 = vld [vmem:[#allocation38_spill] sm:$0xff]  ;;  %v7750_v56 = vld [vmem:[#allocation31_spill] sm:$0xff] }
 0x2a7   :  { %v1004_v48 = vsel %vm4786_vm1, %v958_v13, 0.0  ;;  %v6180_v24 = vadd.f32 %v938_v63, %v5852_v27  ;;  %v6183_v5 = vadd.f32 %v939_v0, %v5828_v47  ;;  %v6186_v22 = vadd.f32 %v940_v46, %v7746_v55  ;;  %1227 = vrot.lane.b32.xlu0 %v7747_v20, %s3678_s12  ;;  %v7751_v13 = vld [vmem:[#allocation44_spill] sm:$0xff]  ;;  %v7752_v63 = vld [vmem:[#allocation17_spill] sm:$0xff]  ;;  %843 = vrot.lane.b32.xlu1 %v7747_v20, %s3676_s30 }
 0x2a8   :  { %v1005_v33 = vsel %vm4753_vm0, %v959_v23, 0.0  ;;  %v6195_v4 = vadd.f32 %v7750_v56, %v1133_v11  ;;  %v6198_v27 = vadd.f32 %v7751_v13, %v1136_v12  ;;  %v6201_v47 = vadd.f32 %v941_v50, %v7752_v63  ;;  %v1296_v11 = vpop.permute.xlu0 %1295  ;;  %v7754_v56 = vld [vmem:[#allocation34_spill] sm:$0xff]  ;;  %v7755_v12 = vld [vmem:[#allocation49_spill] sm:$0xff]  ;;  %v7757_v63 = vld [vmem:[#allocation51_spill] sm:$0xff] }
 0x2a9   :  { %v6190_v30 = vpop.permute.xlu1 %1118  ;;  %v1006_v46 = vsel %vm4850_vm14, %v6150_v35, 0.0  ;;  %v6206_v37 = vadd.f32 %v943_v39, %v822_v17  ;;  %v6208_v25 = vadd.f32 %v944_v49, %v823_v8  ;;  %v942_v55 = vmul.f32 %v7741_v53, %v903_v34  ;;  %v7760_v35 = vld [vmem:[#allocation43_spill] sm:$0xff] }
 0x2aa   :  { %7748 = vst [vmem:[#allocation26_spill] sm:$0xff] %v6190_v30  ;;  %v945_v23 = vmul.f32 %v7741_v53, %v885_v44  ;;  %v1318_v31 = vmul.f32 %v1296_v11, %v7754_v56  ;;  %v1319_v13 = vmul.f32 %v1296_v11, %v7755_v12  ;;  %v1320_v50 = vmul.f32 %v1296_v11, %v7756_v51  ;;  %v7758_v53 = vld [vmem:[#allocation59_spill] sm:$0xff]  ;;  %v7761_v44 = vld [vmem:[#allocation20_spill] sm:$0xff]  ;;  %v7763_v56 = vld [vmem:[#allocation110_spill] sm:$0xff] }
 0x2ab   :  { %v1321_v10 = vmul.f32 %v1296_v11, %v7757_v63  ;;  %v1008_v17 = vsel %vm4786_vm1, %v6180_v24, 0.0  ;;  %v1009_v8 = vsel %vm4753_vm0, %v6183_v5, 0.0  ;;  %v1010_v39 = vsel %vm4850_vm14, %v6186_v22, 0.0  ;;  %1251 = vrot.lane.b32.xlu0 %v7760_v35, %s3678_s12  ;;  %v7762_v24 = vld [vmem:[#allocation18_spill] sm:$0xff]  ;;  %855 = vrot.lane.b32.xlu1 %v7766_v41, %s3676_s30  ;;  %v7767_v22 = vld [vmem:[#allocation69_spill] sm:$0xff]  ;;  %v7770_v30 = vld [vmem:[#allocation68_spill] sm:$0xff] }
 0x2ac   :  { %vm7759_vm9 = vnez %v7758_v53  ;;  %v1342_v34 = vadd.f32 %v1318_v31, %v7761_v44  ;;  %v1343_v11 = vadd.f32 %v1319_v13, %v7762_v24  ;;  %v6246_v63 = vadd.f32 %v945_v23, %v6091_v61  ;;  %v1300_v52 = vpop.permute.xlu0 %1299  ;;  %v7769_v61 = vld [vmem:[#allocation13_spill] sm:$0xff] }
 0x2ad   :  { %v1007_v51 = vsel %vm7759_vm9, %v961_v57, 0.0  ;;  %v1011_v49 = vsel %vm7759_vm9, %v6201_v47, 0.0  ;;  %v1345_v5 = vadd.f32 %v1321_v10, %v7763_v56  ;;  %v6237_v12 = vpop.permute.xlu1 %1166  ;;  %v6243_v57 = vadd.f32 %v942_v55, %v6089_v18  ;;  %v7765_v47 = vld [vmem:[#allocation23_spill] sm:$0xff]  ;;  %v3141_v56 = vpop.f32.mrb[12].mxu0 }
 0x2ae   :  { %7764 = vst [vmem:[#allocation63_spill] sm:$0xff] %v6237_v12  ;;  %v1344_v13 = vadd.f32 %v1320_v50, %v7765_v47  ;;  %v1366_v10 = vadd.f32 %v1342_v34, %v1004_v48  ;;  %v1367_v44 = vadd.f32 %v1343_v11, %v1005_v33  ;;  %v1322_v18 = vmul.f32 %v1300_v52, %v7767_v22  ;;  %v7768_v55 = vld [vmem:[#allocation15_spill] sm:$0xff]  ;;  %v3142_v14 = vpop.f32.mrb[13].mxu0  ;;  %v7776_v47 = vld [vmem:[#allocation62_spill] sm:$0xff] }
 0x2af   :  { %v1369_v24 = vadd.f32 %v1345_v5, %v1007_v51  ;;  %v1323_v1 = vmul.f32 %v1300_v52, %v7768_v55  ;;  %v1324_v23 = vmul.f32 %v1300_v52, %v7769_v61  ;;  %v1325_v12 = vmul.f32 %v1300_v52, %v7770_v30  ;;  %1662 = vrot.lane.b32.xlu0 %v7747_v20, %s3679_s13  ;;  %v7774_v5 = vld [vmem:[#allocation4_spill] sm:$0xff]  ;;  %v7777_v55 = vld [vmem:[#allocation65_spill] sm:$0xff] }
 0x2b0   :  { %v3143_v50 = vadd.f32 %v3142_v14, %v3141_v56  ;;  %v7771_v33 = vsel %vm4830_vm13, %v5989_v45, 0.0  ;;  %v7772_v34 = vsel %vm4924_vm4, %v6006_v62, 0.0  ;;  %v7773_v52 = vsel %vm4823_vm15, %v5974_v29, 0.0  ;;  %v7775_v20 = vld [vmem:[#allocation64_spill] sm:$0xff]  ;;  %v1304_v45 = vpop.permute.xlu0 %1303 }
 0x2b1   :  { %v1236_v48 = vpop.permute.xlu1 %1235  ;;  %v1848_v51 = vadd.f32 %v7771_v33, %v1367_v44  ;;  %v1850_v11 = vadd.f32 %v7772_v34, %v1369_v24  ;;  %v1847_v30 = vadd.f32 %v7773_v52, %v1366_v10  ;;  %v1346_v22 = vadd.f32 %v1322_v18, %v7774_v5  ;;  %v7778_v44 = vld [vmem:[#allocation33_spill] sm:$0xff]  ;;  %v7780_v62 = vld [vmem:[#allocation16_spill] sm:$0xff]  ;;  %v3191_v34 = vpop.f32.mrb[12].mxu1  ;;  %v7783_v10 = vld [vmem:[#allocation74_spill] sm:$0xff] }
 0x2b2   :  { %v1347_v14 = vadd.f32 %v1323_v1, %v7775_v20  ;;  %v1348_v56 = vadd.f32 %v1324_v23, %v7776_v47  ;;  %v1349_v61 = vadd.f32 %v1325_v12, %v7777_v55  ;;  %vm7779_vm10 = vcmp.lt.s32.totalorder %v4558_v6, 127  ;;  %v7782_v29 = vld [vmem:[#allocation108_spill] sm:$0xff]  ;;  %v3192_v20 = vpop.f32.mrb[13].mxu1 }
 0x2b3   :  { %v1275_v33 = vsel %vm7779_vm10, %v1236_v48, %v7778_v44  ;;  %vm7781_vm12 = vmmov %vm7779_vm10  ;;  %879 = vrot.lane.b32.xlu1 %v7782_v29, %s3676_s30  ;;  %v6285_v18 = vadd.f32 %v7783_v10, %v1848_v51  ;;  %v6288_v1 = vadd.f32 %v7783_v10, %v1850_v11  ;;  %v1368_v12 = vadd.f32 %v1344_v13, %v1006_v46 }
 0x2b4   :  { %v1281_v24 = vsel %vm7781_vm12, %v7780_v62, %v1236_v48  ;;  %v1370_v23 = vadd.f32 %v1346_v22, %v1008_v17  ;;  %v1371_v52 = vadd.f32 %v1347_v14, %v1009_v8  ;;  %v1372_v5 = vadd.f32 %v1348_v56, %v1010_v39  ;;  %1686 = vrot.lane.b32.xlu0 %v7760_v35, %s3679_s13  ;;  %vm7784_vm2 = vmmov %vm7779_vm10  ;;  %v6299_v17 = vpop.permute.xlu0 %1307 }
 0x2b5   :  { %v1326_v47 = vmul.f32 %v1304_v45, %v1281_v24  ;;  %v1327_v48 = vmul.f32 %v1304_v45, %v1275_v33  ;;  %v3193_v55 = vadd.f32 %v3192_v20, %v3191_v34  ;;  %v1260_v31 = vpop.permute.xlu1 %1259  ;;  %v3062_v54 = vmul.f32 -1.442695, %v6285_v18  ;;  %vm7785_vm3 = vmmov %vm7784_vm2  ;;  %v7790_v33 = vld [vmem:[#allocation67_spill] sm:$0xff] }
 0x2b6   :  { %v1269_v51 = vsel %vm7784_vm2, %v7778_v44, %v1260_v31  ;;  %v1287_v46 = vsel %vm7785_vm3, %v1260_v31, %v7780_v62  ;;  %v3064_v8 = vmul.f32 -1.442695, %v6288_v1  ;;  %v6303_v39 = vadd.f32 %v7783_v10, %v1847_v30  ;;  %v3649_v31 = vld [vmem:[%s7111_s2 + $0x28] sm:$0xff] }
 0x2b7   :  { %v1373_v35 = vadd.f32 %v1349_v61, %v1011_v49  ;;  %v1350_v13 = vadd.f32 %v1326_v47, %v6195_v4  ;;  %v6306_v11 = vadd.f32 %v3193_v55, %v3143_v50  ;;  %v1328_v22 = vmul.f32 %v1304_v45, %v1269_v51  ;;  %1408 = vrot.lane.b32.xlu1 %v5523_v15, %s3677_s11 }
 0x2b8   :  { %v1329_v14 = vmul.f32 %v1304_v45, %v1287_v46  ;;  %1888 = vperm.xlu0 %3417, %v3649_v31   ;;  %3535 = vpow2.f32 %v3062_v54  ;;  %v3061_v56 = vmul.f32 -1.442695, %v6303_v39  ;;  %v7787_v49 = vsel %vm4917_vm11, %v6031_v43, 0.0 }
 0x2b9   :  { %7786 = vst [vmem:[#allocation89_spill] sm:$0xff] %v6306_v11  ;;  %v1849_v4 = vadd.f32 %v7787_v49, %v1368_v12  ;;  %v1351_v50 = vadd.f32 %v1327_v48, %v6159_v38  ;;  %v1352_v30 = vadd.f32 %v1328_v22, %v6162_v9  ;;  %v586_v61 = vpop.permute.xlu1 %585  ;;  %3537 = vpow2.f32 %v3064_v8  ;;  %v6331_v38 = vpop.permute.xlu0 %1658  ;;  %v7793_v12 = vld [vmem:[#allocation47_spill] sm:$0xff]  ;;  %v7800_v8 = vld [vmem:[#allocation37_spill] sm:$0xff] }
 0x2ba   :  { %v7788_v15 = vsel %vm4830_vm13, %v6061_v26, 0.0  ;;  %v1353_v54 = vadd.f32 %v1329_v14, %v6198_v27  ;;  %vm7789_vm5 = vcmp.lt.s32.totalorder %v4558_v6, 17  ;;  %3539 = vpow2.f32 %v3061_v56 }
 0x2bb   :  { %v1852_v45 = vadd.f32 %v7788_v15, %v1371_v52  ;;  %v626_v44 = vsel %vm7789_vm5, %v586_v61, %v6028_v59  ;;  %vm7791_vm6 = vmmov %vm7789_vm5  ;;  %v1012_v9 = vsel %vm4786_vm1, %v6243_v57, 0.0  ;;  %v1015_v26 = vsel %vm7759_vm9, %v6246_v63, 0.0  ;;  %1432 = vrot.lane.b32.xlu1 %v5539_v19, %s3677_s11 }
 0x2bc   :  { %v632_v43 = vsel %vm7791_vm6, %v7790_v33, %v586_v61  ;;  %v7792_v27 = vsel %vm4850_vm14, %v6208_v25, 0.0  ;;  %v6348_v24 = vadd.f32 %v7783_v10, %v1849_v4  ;;  %v6350_v34 = vadd.f32 %v1353_v54, %v1015_v26  ;;  %vm7798_vm7 = vmmov %vm7789_vm5 }
 0x2bd   :  { %v6343_v62 = vadd.f32 %v1352_v30, %v7792_v27  ;;  %v6353_v57 = vadd.f32 %v7793_v12, %v1852_v45  ;;  %v7794_v63 = vsel %vm4924_vm4, %v6065_v32, 0.0  ;;  %v7795_v25 = vsel %vm4823_vm15, %v6052_v28, 0.0  ;;  %v610_v47 = vpop.permute.xlu1 %609  ;;  %vm7799_vm8 = vmmov %vm7789_vm5  ;;  %v6382_v46 = vpop.permute.xlu0 %1682  ;;  %v7804_v45 = vld [vmem:[#allocation6_spill] sm:$0xff] }
 0x2be   :  { %v1854_v52 = vadd.f32 %v7794_v63, %v1373_v35  ;;  %v1851_v20 = vadd.f32 %v7795_v25, %v1370_v23  ;;  %v3063_v19 = vmul.f32 -1.442695, %v6348_v24  ;;  %v7796_v10 = vsel %vm4917_vm11, %v6063_v2, 0.0 }
 0x2bf   :  { %v1853_v48 = vadd.f32 %v7796_v10, %v1372_v5  ;;  %v6368_v55 = vadd.f32 %v1350_v13, %v1012_v9  ;;  %v7797_v32 = vsel %vm4753_vm0, %v6206_v37, 0.0  ;;  %v620_v28 = vsel %vm7798_vm7, %v6028_v59, %v610_v47  ;;  %1529 = vrot.lane.b32.xlu1 %v7800_v8, %s3674_s28  ;;  %v7801_v13 = vld [vmem:[#allocation75_spill] sm:$0xff] }
 0x2c0   :  { %v6374_v51 = vadd.f32 %v1351_v50, %v7797_v32  ;;  %v638_v23 = vsel %vm7799_vm8, %v610_v47, %v7790_v33  ;;  %v3066_v2 = vmul.f32 -1.442695, %v6353_v57  ;;  %v6386_v5 = vadd.f32 %v7793_v12, %v1854_v52  ;;  %v7805_v33 = vld [vmem:[#allocation27_spill] sm:$0xff] }
 0x2c1   :  { %3541 = vpow2.f32 %v3063_v19  ;;  %v6391_v37 = vadd.f32 %v7793_v12, %v1851_v20  ;;  %v6395_v35 = vadd.f32 %v7793_v12, %v1853_v48  ;;  %v681_v22 = vmul.f32 %v7801_v13, %v632_v43  ;;  %v709_v31 = vpop.permute.xlu1 %708  ;;  %v6406_v30 = vpop.permute.xlu0 %1032 }
 0x2c2   :  { %3543 = vpow2.f32 %v3066_v2  ;;  %v3068_v59 = vmul.f32 -1.442695, %v6386_v5  ;;  %v682_v14 = vmul.f32 %v7801_v13, %v626_v44  ;;  %v3536_v49 = vpop.eup %3535  ;;  %vm7802_vm10 = vcmp.lt.s32.totalorder %v4558_v6, 16 }
 0x2c3   :  { %v3065_v56 = vmul.f32 -1.442695, %v6391_v37  ;;  %v747_v4 = vsel %vm7802_vm10, %v709_v31, %v6113_v40  ;;  %vm7803_vm12 = vmmov %vm7802_vm10  ;;  %v3067_v61 = vmul.f32 -1.442695, %v6395_v35  ;;  %v3538_v15 = vpop.eup %3537  ;;  %1553 = vrot.lane.b32.xlu1 %v7805_v33, %s3674_s28  ;;  %v1992_v43 = vadd.f32 1.0, %v3536_v49 }
 0x2c4   :  { %v753_v50 = vsel %vm7803_vm12, %v6067_v7, %v709_v31  ;;  %3545 = vpow2.f32 %v3068_v59  ;;  %v803_v44 = vmul.f32 %v7804_v45, %v747_v4  ;;  %v3540_v9 = vpop.eup %3539  ;;  %v1994_v26 = vadd.f32 1.0, %v3538_v15  ;;  %vm7806_vm2 = vmmov %vm7802_vm10 }
 0x2c5   :  { %v802_v54 = vmul.f32 %v7804_v45, %v753_v50  ;;  %3547 = vpow2.f32 %v3065_v56  ;;  %v733_v63 = vpop.permute.xlu1 %732  ;;  %v1991_v52 = vadd.f32 1.0, %v3540_v9  ;;  %v680_v25 = vmul.f32 %v7801_v13, %v638_v23  ;;  %vm7807_vm3 = vmmov %vm7806_vm2  ;;  %v6424_v19 = vpop.permute.xlu0 %1056 }
 0x2c6   :  { %3549 = vpow2.f32 %v3067_v61  ;;  %v6415_v12 = vadd.f32 %v803_v44, %v682_v14  ;;  %v741_v20 = vsel %vm7806_vm2, %v6113_v40, %v733_v63  ;;  %v759_v47 = vsel %vm7807_vm3, %v733_v63, %v6067_v7 }
 0x2c7   :  { %v6413_v27 = vadd.f32 %v802_v54, %v681_v22  ;;  %3551 = vrcp.f32 %v1992_v43  ;;  %v683_v10 = vmul.f32 %v7801_v13, %v620_v28  ;;  %v801_v48 = vmul.f32 %v7804_v45, %v759_v47  ;;  %1239 = vrot.lane.b32.xlu1 %v7766_v41, %s3678_s12  ;;  %v7809_v54 = vld [vmem:[#allocation24_spill] sm:$0xff] }
 0x2c8   :  { %3553 = vrcp.f32 %v1994_v26  ;;  %v804_v32 = vmul.f32 %v7804_v45, %v741_v20  ;;  %v7808_v45 = vld [vmem:[#allocation105_spill] sm:$0xff]  ;;  %vm7810_vm5 = vcmp.lt.s32.totalorder %v4558_v6, 113  ;;  %v7811_v26 = vld [vmem:[#allocation102_spill] sm:$0xff]  ;;  %vm7814_vm7 = vcmp.lt.s32.totalorder %v4558_v6, 112 }
 0x2c9   :  { %3555 = vrcp.f32 %v1991_v52  ;;  %v6431_v2 = vadd.f32 %v801_v48, %v680_v25  ;;  %v6435_v59 = vpop.permute.xlu1 %1480  ;;  %v6437_v22 = vpop.permute.xlu0 %1311  ;;  %v1444_v44 = vsel %vm7810_vm5, %v7809_v54, %v7808_v45  ;;  %vm7812_vm6 = vmmov %vm7810_vm5  ;;  %v7813_v52 = vld [vmem:[#allocation29_spill] sm:$0xff] }
 0x2ca   :  { %v6433_v40 = vadd.f32 %v804_v32, %v683_v10  ;;  %v1450_v63 = vsel %vm7812_vm6, %v7811_v26, %v7809_v54  ;;  %v1571_v25 = vsel %vm7814_vm7, %v7813_v52, %v6100_v58  ;;  %v7816_v10 = vld [vmem:[#allocation28_spill] sm:$0xff]  ;;  %vm7817_vm8 = vmmov %vm7814_vm7  ;;  %v7818_v48 = vld [vmem:[#allocation25_spill] sm:$0xff] }
 0x2cb   :  { %v3542_v23 = vpop.eup %3541  ;;  %1263 = vrot.lane.b32.xlu1 %v7782_v29, %s3678_s12  ;;  %vm7819_vm10 = vmmov %vm7814_vm7 }
 0x2cc   :  { %v3544_v7 = vpop.eup %3543  ;;  %v1993_v14 = vadd.f32 1.0, %v3542_v23  ;;  %v1559_v32 = vsel %vm7819_vm10, %v7816_v10, %v7818_v48  ;;  %vm7822_vm12 = vmmov %vm7810_vm5  ;;  %vm7837_vm10 = vcmp.lt.s32.totalorder %v4558_v6, 1 }
 0x2cd   :  { %v1996_v28 = vadd.f32 1.0, %v3544_v7  ;;  %v6441_v4 = vpop.permute.xlu1 %1601  ;;  %v6443_v50 = vpop.permute.xlu0 %853  ;;  %v7821_v7 = vld [vmem:[#allocation5_spill] sm:$0xff]  ;;  %vm7823_vm2 = vmmov %vm7810_vm5  ;;  %vm7827_vm5 = vcmp.lt.s32.totalorder %v4558_v6, 111 }
 0x2ce   :  { %v3546_v13 = vpop.eup %3545  ;;  %3557 = vrcp.f32 %v1993_v14  ;;  %v1456_v14 = vsel %vm7823_vm2, %v7821_v7, %v7811_v26  ;;  %vm7824_vm3 = vmmov %vm7814_vm7 }
 0x2cf   :  { %v3548_v31 = vpop.eup %3547  ;;  %3559 = vrcp.f32 %v1996_v28  ;;  %v1998_v56 = vadd.f32 1.0, %v3546_v13  ;;  %1674 = vrot.lane.b32.xlu1 %v7766_v41, %s3679_s13  ;;  %v1565_v41 = vsel %vm7817_vm8, %v6100_v58, %v7816_v10  ;;  %v1577_v58 = vsel %vm7824_vm3, %v7818_v48, %v7813_v52  ;;  %vm7828_vm6 = vmmov %vm7827_vm5 }
 0x2d0   :  { %v3550_v49 = vpop.eup %3549  ;;  %v1995_v61 = vadd.f32 1.0, %v3548_v31  ;;  %v7826_v31 = vld [vmem:[#allocation42_spill] sm:$0xff]  ;;  %vm7832_vm7 = vmmov %vm7827_vm5 }
 0x2d1   :  { %v3552_v15 = vpop.eup %3551  ;;  %3561 = vrcp.f32 %v1998_v56  ;;  %v1997_v43 = vadd.f32 1.0, %v3550_v49  ;;  %v6489_v13 = vpop.permute.xlu0 %877  ;;  %v1616_v56 = vmul.f32 %v7826_v31, %v1571_v25  ;;  %vm7833_vm8 = vmmov %vm7827_vm5 }
 0x2d2   :  { %v3554_v9 = vpop.eup %3553  ;;  %v6460_v20 = vmul.f32 %v3552_v15, %v6285_v18  ;;  %3563 = vrcp.f32 %v1995_v61  ;;  %v1438_v18 = vsel %vm7822_vm12, %v7808_v45, %v7821_v7  ;;  %v1618_v15 = vmul.f32 %v7826_v31, %v1559_v32  ;;  %v7829_v45 = vld [vmem:[#allocation40_spill] sm:$0xff]  ;;  %vm7841_vm3 = vmmov %vm7837_vm10 }
 0x2d3   :  { %v3556_v47 = vpop.eup %3555  ;;  %v6471_v23 = vmul.f32 %v3554_v9, %v6288_v1  ;;  %3565 = vrcp.f32 %v1997_v43  ;;  %v1671_v1 = vpop.permute.xlu1 %1670  ;;  %1698 = vrot.lane.b32.xlu1 %v7782_v29, %s3679_s13  ;;  %v1495_v54 = vmul.f32 %v7829_v45, %v1450_v63  ;;  %v1496_v43 = vmul.f32 %v7829_v45, %v1444_v44 }
 0x2d4   :  { %7815 = vst [vmem:[#allocation73_spill] sm:$0xff] %v6460_v20  ;;  %2216 = vmatprep.mubr.f32.mxu0 %v6460_v20  ;;  %v6487_v28 = vmul.f32 %v3556_v47, %v6303_v39  ;;  %v1710_v49 = vsel %vm7827_vm5, %v1671_v1, %v6382_v46  ;;  %v1716_v61 = vsel %vm7828_vm6, %v6331_v38, %v1671_v1  ;;  %v7830_v47 = vld [vmem:[#allocation98_spill] sm:$0xff]  ;;  %vm7839_vm12 = vcmp.lt.s32.totalorder %v4558_v6, 15  ;;  %vm7842_vm5 = vmmov %vm7841_vm3  ;;  %v7849_v20 = vld [vmem:[#allocation8_spill] sm:$0xff] }
 0x2d5   :  { %7820 = vst [vmem:[#allocation2_spill] sm:$0xff] %v6471_v23  ;;  %2311 = vmatprep.mubr.f32.mxu1 %v6471_v23  ;;  %v1617_v39 = vmul.f32 %v7826_v31, %v1565_v41  ;;  %v1619_v9 = vmul.f32 %v7826_v31, %v1577_v58  ;;  %v1497_v52 = vmul.f32 %v7829_v45, %v1438_v18  ;;  %v6511_v48 = vpop.permute.xlu0 %1406  ;;  %vm7840_vm2 = vmmov %vm7839_vm12 }
 0x2d6   :  { %7825 = vst [vmem:[#allocation71_spill] sm:$0xff] %v6487_v28  ;;  %2217 = vmatmul.mubr.f32.gmra.mrb[14].mxu0 %v6487_v28  ;;  %v1498_v25 = vmul.f32 %v7829_v45, %v1456_v14  ;;  %v1761_v10 = vmul.f32 %v7830_v47, %v1716_v61  ;;  %v1762_v29 = vmul.f32 %v7830_v47, %v1710_v49  ;;  %vm7843_vm6 = vmmov %vm7841_vm3 }
 0x2d7   :  { %v1695_v41 = vpop.permute.xlu1 %1694  ;;  %v1640_v7 = vadd.f32 %v1616_v56, %v1495_v54  ;;  %v1641_v14 = vadd.f32 %v1617_v39, %v1496_v43  ;;  %v1642_v58 = vadd.f32 %v1618_v15, %v1497_v52 }
 0x2d8   :  { %v3558_v26 = vpop.eup %3557  ;;  %v1704_v44 = vsel %vm7832_vm7, %v6382_v46, %v1695_v41  ;;  %v1722_v18 = vsel %vm7833_vm8, %v1695_v41, %v6331_v38  ;;  %v1643_v56 = vadd.f32 %v1619_v9, %v1498_v25  ;;  %vm7850_vm7 = vmmov %vm7840_vm2 }
 0x2d9   :  { %v3560_v32 = vpop.eup %3559  ;;  %v6514_v63 = vmul.f32 %v3558_v26, %v6348_v24  ;;  %v1763_v31 = vmul.f32 %v7830_v47, %v1704_v44  ;;  %v1764_v24 = vmul.f32 %v7830_v47, %v1722_v18  ;;  %v1785_v45 = vadd.f32 %v1761_v10, %v1640_v7  ;;  %vm7851_vm8 = vmmov %vm7840_vm2 }
 0x2da   :  { %v6523_v1 = vmul.f32 %v3560_v32, %v6353_v57  ;;  %v1786_v46 = vadd.f32 %v1762_v29, %v1641_v14  ;;  %v6532_v57 = vpop.permute.xlu0 %1430 }
 0x2db   :  { %7831 = vst [vmem:[#allocation85_spill] sm:$0xff] %v6514_v63  ;;  %v3562_v49 = vpop.eup %3561  ;;  %2312 = vmatmul.mubr.f32.gmra.mrb[14].mxu1 %v6514_v63  ;;  %v1787_v39 = vadd.f32 %v1763_v31, %v1642_v58  ;;  %v1045_v15 = vpop.permute.xlu1 %1044  ;;  %v1788_v43 = vadd.f32 %v1764_v24, %v1643_v56 }
 0x2dc   :  { %7834 = vst [vmem:[#allocation70_spill] sm:$0xff] %v6523_v1  ;;  %v3564_v61 = vpop.eup %3563  ;;  %2221 = vmatprep.mubr.f32.mxu0 %v6523_v1  ;;  %v6530_v38 = vmul.f32 %v3562_v49, %v6386_v5  ;;  %v6540_v26 = vsel %vm7837_vm10, %v1045_v15, %v6424_v19  ;;  %v1831_v5 = vsel %vm4823_vm15, %v1785_v45, 0.0  ;;  %v1832_v25 = vsel %vm4830_vm13, %v1786_v46, 0.0  ;;  %v7846_v1 = vld [vmem:[#allocation81_spill] sm:$0xff] }
 0x2dd   :  { %v3566_v54 = vpop.eup %3565  ;;  %v6535_v9 = vmul.f32 %v3564_v61, %v6391_v37  ;;  %v1833_v37 = vsel %vm4917_vm11, %v1787_v39, 0.0  ;;  %v1834_v47 = vsel %vm4924_vm4, %v1788_v43, 0.0  ;;  %v1856_v41 = vadd.f32 %v1832_v25, %v6374_v51 }
 0x2de   :  { %7835 = vst [vmem:[#allocation87_spill] sm:$0xff] %v6530_v38  ;;  %2316 = vmatprep.mubr.f32.mxu1 %v6530_v38  ;;  %v6544_v52 = vmul.f32 %v3566_v54, %v6395_v35  ;;  %v6556_v29 = vpop.permute.xlu0 %1527  ;;  %v1855_v35 = vadd.f32 %v1831_v5, %v6368_v55  ;;  %v1857_v32 = vadd.f32 %v1833_v37, %v6343_v62  ;;  %vm7854_vm10 = vcmp.lt.s32.totalorder %v4558_v6, 127 }
 0x2df   :  { %7836 = vst [vmem:[#allocation32_spill] sm:$0xff] %v6535_v9  ;;  %2222 = vmatmul.mubr.f32.gmra.mrb[16].mxu0 %v6535_v9  ;;  %v1069_v10 = vpop.permute.xlu1 %1068  ;;  %v1858_v7 = vadd.f32 %v1834_v47, %v6350_v34 }
 0x2e0   :  { %7838 = vst [vmem:[#allocation11_spill] sm:$0xff] %v6544_v52  ;;  %2317 = vmatmul.mubr.f32.gmra.mrb[16].mxu1 %v6544_v52  ;;  %v7847_v52 = vld [vmem:[#allocation10_spill] sm:$0xff] }
 0x2e1   :  { %v1186_v9 = vmul.f32 %v7847_v52, %v7846_v1 }
 0x2e2   :  { %v6562_v18 = vpop.permute.xlu0 %1551 }
 0x2e3   :  { %v1881_v44 = vpop.permute.xlu1 %1880 }
 0x2e4   :  { %v1903_v14 = vadd.f32 %v1881_v44, %v1855_v35  ;;  %v1904_v58 = vadd.f32 %v1881_v44, %v1856_v41  ;;  %v1905_v31 = vadd.f32 %v1881_v44, %v1857_v32  ;;  %v1906_v49 = vadd.f32 %v1881_v44, %v1858_v7 }
 0x2e6   :  { %v3069_v56 = vmul.f32 -1.442695, %v1903_v14  ;;  %v3070_v24 = vmul.f32 -1.442695, %v1904_v58  ;;  %v3071_v61 = vmul.f32 -1.442695, %v1905_v31  ;;  %v6564_v39 = vpop.permute.xlu0 %1225 }
 0x2e7   :  { %v3072_v45 = vmul.f32 -1.442695, %v1906_v49  ;;  %v842_v46 = vpop.permute.xlu1 %841 }
 0x2e8   :  { %3567 = vpow2.f32 %v3069_v56 }
 0x2e9   :  { %3569 = vpow2.f32 %v3070_v24 }
 0x2ea   :  { %3571 = vpow2.f32 %v3071_v61  ;;  %v6566_v34 = vpop.permute.xlu0 %1249 }
 0x2eb   :  { %3573 = vpow2.f32 %v3072_v45  ;;  %v866_v62 = vpop.permute.xlu1 %865  ;;  %v898_v45 = vsel %vm7839_vm12, %v842_v46, %v6443_v50  ;;  %vm7855_vm12 = vmmov %vm7854_vm10 }
 0x2ee   :  { %v6570_v51 = vpop.permute.xlu0 %575 }
 0x2ef   :  { %v6568_v55 = vpop.permute.xlu1 %1394 }
 0x2f2   :  { %v3568_v54 = vpop.eup %3567  ;;  %v6574_v37 = vpop.permute.xlu0 %599 }
 0x2f3   :  { %v3570_v43 = vpop.eup %3569  ;;  %v1999_v5 = vadd.f32 1.0, %v3568_v54  ;;  %v6572_v25 = vpop.permute.xlu1 %1418  ;;  %v904_v54 = vsel %vm7840_vm2, %v6489_v13, %v842_v46  ;;  %vm7856_vm2 = vmmov %vm7854_vm10 }
 0x2f4   :  { %v3572_v47 = vpop.eup %3571  ;;  %v2000_v35 = vadd.f32 1.0, %v3570_v43  ;;  %v1089_v43 = vsel %vm7841_vm3, %v6406_v30, %v1045_v15  ;;  %v7848_v15 = vld [vmem:[#allocation22_spill] sm:$0xff]  ;;  %vm7857_vm3 = vmmov %vm7856_vm2 }
 0x2f5   :  { %v3574_v41 = vpop.eup %3573  ;;  %v2001_v32 = vadd.f32 1.0, %v3572_v47  ;;  %3575 = vrcp.f32 %v1999_v5  ;;  %v1095_v5 = vsel %vm7842_vm5, %v1069_v10, %v6406_v30  ;;  %v1187_v23 = vmul.f32 %v7847_v52, %v7848_v15 }
 0x2f6   :  { %v2002_v7 = vadd.f32 1.0, %v3574_v41  ;;  %3577 = vrcp.f32 %v2000_v35  ;;  %v6578_v56 = vpop.permute.xlu0 %698  ;;  %v1077_v35 = vsel %vm7843_vm6, %v6424_v19, %v1069_v10  ;;  %v7844_v41 = vld [vmem:[#allocation3_spill] sm:$0xff]  ;;  %v1138_v30 = vmul.f32 %v7849_v20, %v1089_v43  ;;  %v7852_v43 = vld [vmem:[#allocation21_spill] sm:$0xff] }
 0x2f7   :  { %3579 = vrcp.f32 %v2001_v32  ;;  %v6576_v44 = vpop.permute.xlu1 %1515  ;;  %v946_v32 = vmul.f32 %v7844_v41, %v904_v54  ;;  %v1137_v19 = vmul.f32 %v7849_v20, %v1095_v5  ;;  %v886_v10 = vsel %vm7850_vm7, %v866_v62, %v6489_v13  ;;  %v7853_v13 = vld [vmem:[#allocation84_spill] sm:$0xff] }
 0x2f8   :  { %3581 = vrcp.f32 %v2002_v7  ;;  %v947_v7 = vmul.f32 %v7844_v41, %v898_v45  ;;  %v892_v45 = vsel %vm7851_vm8, %v6443_v50, %v866_v62  ;;  %v1140_v5 = vmul.f32 %v7849_v20, %v1077_v35 }
 0x2f9   :  { %v970_v50 = vadd.f32 %v946_v32, %v6431_v2  ;;  %vm7858_vm5 = vcmp.lt.s32.totalorder %v4558_v6, 17  ;;  %vm7861_vm8 = vcmp.lt.s32.totalorder %v4558_v6, 16 }
 0x2fa   :  { %v6582_v61 = vpop.permute.xlu0 %722  ;;  %v971_v62 = vadd.f32 %v947_v7, %v6413_v27  ;;  %v1210_v27 = vadd.f32 %v1186_v9, %v1138_v30  ;;  %vm7859_vm6 = vmmov %vm7858_vm5 }
 0x2fb   :  { %v6580_v24 = vpop.permute.xlu1 %1539  ;;  %vm7860_vm7 = vmmov %vm7858_vm5 }
 0x2fc   :  { %v1017_v32 = vsel %vm4753_vm0, %v971_v62, 0.0 }
 0x2fe   :  { %v6617_v54 = vpop.permute.xlu0 %1660 }
 0x2ff   :  { %v3576_v47 = vpop.eup %3575  ;;  %v6601_v38 = vpop.permute.xlu1 %1746 }
 0x300   :  { %7845 = vst [vmem:[#allocation79_spill] sm:$0xff] %v6601_v38  ;;  %v3578_v46 = vpop.eup %3577  ;;  %v6608_v63 = vmul.f32 %v3576_v47, %v1903_v14  ;;  %v1139_v14 = vmul.f32 %v7849_v20, %v6540_v26  ;;  %v1185_v47 = vmul.f32 %v7847_v52, %v7852_v43  ;;  %v1188_v38 = vmul.f32 %v7847_v52, %v7853_v13 }
 0x301   :  { %v3580_v28 = vpop.eup %3579  ;;  %v6619_v1 = vmul.f32 %v3578_v46, %v1904_v58  ;;  %v948_v26 = vmul.f32 %v7844_v41, %v892_v45  ;;  %v949_v43 = vmul.f32 %v7844_v41, %v886_v10  ;;  %v1016_v41 = vsel %vm4786_vm1, %v970_v50, 0.0 }
 0x302   :  { %v3582_v15 = vpop.eup %3581  ;;  %v6626_v11 = vmul.f32 %v3580_v28, %v1905_v31  ;;  %v1209_v2 = vadd.f32 %v1185_v47, %v1137_v19  ;;  %v1212_v35 = vadd.f32 %v1188_v38, %v1140_v5  ;;  %v6652_v9 = vpop.permute.xlu0 %1684 }
 0x303   :  { %2226 = vmatprep.mubr.f32.mxu0 %v6619_v1  ;;  %v6633_v58 = vmul.f32 %v3582_v15, %v1906_v49  ;;  %v1238_v46 = vpop.permute.xlu1 %1237  ;;  %v1211_v49 = vadd.f32 %v1187_v23, %v1139_v14  ;;  %v972_v19 = vadd.f32 %v948_v26, %v6415_v12  ;;  %v973_v45 = vadd.f32 %v949_v43, %v6433_v40 }
 0x304   :  { %v1276_v20 = vsel %vm7854_vm10, %v1238_v46, %v6566_v34  ;;  %v1282_v28 = vsel %vm7855_vm12, %v6564_v39, %v1238_v46  ;;  %2227 = vmatmul.mubr.f32.gmra.mrb[18].mxu0 %v6608_v63  ;;  %vm7862_vm10 = vcmp.lt.s32.totalorder %v4558_v6, 112 }
 0x305   :  { %2321 = vmatprep.mubr.f32.mxu1 %v6633_v58  ;;  %v1330_v52 = vmul.f32 %v6299_v17, %v1282_v28  ;;  %v1331_v31 = vmul.f32 %v6299_v17, %v1276_v20  ;;  %v1018_v40 = vsel %vm4850_vm14, %v972_v19, 0.0  ;;  %vm7865_vm12 = vmmov %vm7862_vm10 }
 0x306   :  { %2322 = vmatmul.mubr.f32.gmra.mrb[18].mxu1 %v6626_v11  ;;  %v6684_v26 = vpop.permute.xlu0 %1034 }
 0x307   :  { %v1354_v7 = vadd.f32 %v1330_v52, %v1209_v2  ;;  %v1355_v10 = vadd.f32 %v1331_v31, %v1210_v27  ;;  %v1262_v30 = vpop.permute.xlu1 %1261  ;;  %v1572_v52 = vsel %vm7862_vm10, %v6576_v44, %v6556_v29  ;;  %v7863_v31 = vld [vmem:[#allocation53_spill] sm:$0xff] }
 0x308   :  { %v1270_v23 = vsel %vm7856_vm2, %v6566_v34, %v1262_v30  ;;  %v1288_v38 = vsel %vm7857_vm3, %v1262_v30, %v6564_v39  ;;  %v1019_v34 = vsel %vm7759_vm9, %v973_v45, 0.0  ;;  %vm7866_vm2 = vmmov %vm7858_vm5  ;;  %vm7867_vm3 = vcmp.lt.s32.totalorder %v4558_v6, 113 }
 0x309   :  { %v6662_v15 = vadd.f32 %v1354_v7, %v1016_v41  ;;  %v6664_v14 = vadd.f32 %v1355_v10, %v1017_v32  ;;  %v1332_v47 = vmul.f32 %v6299_v17, %v1270_v23  ;;  %v1333_v5 = vmul.f32 %v6299_v17, %v1288_v38 }
 0x30a   :  { %v6691_v28 = vpop.permute.xlu0 %1058  ;;  %v1451_v7 = vsel %vm7867_vm3, %v6568_v55, %v6511_v48 }
 0x30b   :  { %v1356_v13 = vadd.f32 %v1332_v47, %v1211_v49  ;;  %v1357_v12 = vadd.f32 %v1333_v5, %v1212_v35  ;;  %v588_v50 = vpop.permute.xlu1 %587  ;;  %v7864_v35 = vld [vmem:[#allocation93_spill] sm:$0xff] }
 0x30c   :  { %v627_v39 = vsel %vm7858_vm5, %v588_v50, %v6574_v37  ;;  %v6678_v62 = vsel %vm7859_vm6, %v6570_v51, %v588_v50  ;;  %vm7868_vm5 = vmmov %vm7867_vm3 }
 0x30d   :  { %v6680_v46 = vadd.f32 %v1356_v13, %v1018_v40  ;;  %v6682_v17 = vadd.f32 %v1357_v12, %v1019_v34  ;;  %v686_v49 = vmul.f32 %v7863_v31, %v627_v39  ;;  %v1445_v19 = vsel %vm7868_vm5, %v6511_v48, %v6572_v25  ;;  %vm7869_vm6 = vmmov %vm7862_vm10  ;;  %v7874_v12 = vld [vmem:[#allocation103_spill] sm:$0xff] }
 0x30e   :  { %v1885_v5 = vpop.permute.xlu0 %1884  ;;  %vm7873_vm10 = vmmov %vm7867_vm3  ;;  %v1499_v50 = vmul.f32 %v7874_v12, %v1451_v7 }
 0x30f   :  { %v612_v43 = vpop.permute.xlu1 %611 }
 0x310   :  { %v6689_v20 = vsel %vm7860_vm7, %v6574_v37, %v612_v43  ;;  %v1566_v37 = vsel %vm7865_vm12, %v6556_v29, %v6580_v24  ;;  %v639_v32 = vsel %vm7866_vm2, %v612_v43, %v6570_v51  ;;  %v1578_v29 = vsel %vm7869_vm6, %v6562_v18, %v6576_v44  ;;  %v7870_v51 = vld [vmem:[#allocation107_spill] sm:$0xff]  ;;  %vm7871_vm7 = vmmov %vm7861_vm8 }
 0x311   :  { %v1620_v45 = vmul.f32 %v7870_v51, %v1572_v52  ;;  %v1621_v47 = vmul.f32 %v7870_v51, %v1566_v37  ;;  %v684_v48 = vmul.f32 %v7863_v31, %v639_v32  ;;  %v1457_v44 = vsel %vm7873_vm10, %v6532_v57, %v6568_v55  ;;  %vm7875_vm12 = vmmov %vm7867_vm3 }
 0x312   :  { %v1439_v40 = vsel %vm7875_vm12, %v6572_v25, %v6532_v57  ;;  %v1623_v39 = vmul.f32 %v7870_v51, %v1578_v29  ;;  %vm7876_vm2 = vcmp.lt.s32.totalorder %v4558_v6, 111  ;;  %v7878_v57 = vld [vmem:[#allocation109_spill] sm:$0xff]  ;;  %v1502_v37 = vmul.f32 %v7874_v12, %v1457_v44  ;;  %v6764_v7 = vpop.permute.xlu0 %867 }
 0x313   :  { %v6693_v27 = vpop.permute.xlu1 %710  ;;  %vm7877_vm3 = vmmov %vm7876_vm2  ;;  %v1644_v52 = vadd.f32 %v1620_v45, %v1499_v50  ;;  %v1501_v32 = vmul.f32 %v7874_v12, %v1439_v40  ;;  %vm7882_vm10 = vcmp.lt.s32.totalorder %v4558_v6, 1  ;;  %vm7883_vm12 = vcmp.lt.s32.totalorder %v4558_v6, 15 }
 0x314   :  { %v748_v2 = vsel %vm7861_vm8, %v6693_v27, %v6582_v61  ;;  %vm7872_vm8 = vmmov %vm7869_vm6 }
 0x315   :  { %v807_v41 = vmul.f32 %v7864_v35, %v748_v2  ;;  %v1560_v38 = vsel %vm7872_vm8, %v6580_v24, %v6562_v18  ;;  %v1500_v18 = vmul.f32 %v7874_v12, %v1445_v19  ;;  %vm7879_vm5 = vmmov %vm7876_vm2 }
 0x316   :  { %v1622_v43 = vmul.f32 %v7870_v51, %v1560_v38  ;;  %vm7880_vm6 = vmmov %vm7876_vm2 }
 0x317   :  { %v6716_v10 = vadd.f32 %v807_v41, %v686_v49  ;;  %v6718_v30 = vpop.permute.xlu1 %734  ;;  %v1645_v49 = vadd.f32 %v1621_v47, %v1500_v18  ;;  %vm7881_vm8 = vmmov %vm7871_vm7 }
 0x318   :  { %v760_v23 = vsel %vm7871_vm7, %v6718_v30, %v6578_v56  ;;  %v1646_v38 = vadd.f32 %v1622_v43, %v1501_v32 }
 0x319   :  { %v805_v13 = vmul.f32 %v7864_v35, %v760_v23  ;;  %v1647_v23 = vadd.f32 %v1623_v39, %v1502_v37 }
 0x31b   :  { %v6750_v24 = vadd.f32 %v805_v13, %v684_v48  ;;  %v1673_v34 = vpop.permute.xlu1 %1672 }
 0x31c   :  { %v1711_v55 = vsel %vm7876_vm2, %v1673_v34, %v6652_v9  ;;  %v1717_v2 = vsel %vm7877_vm3, %v6617_v54, %v1673_v34  ;;  %vm7885_vm2 = vmmov %vm7882_vm10 }
 0x31d   :  { %v1765_v25 = vmul.f32 %v7878_v57, %v1717_v2  ;;  %v1766_v41 = vmul.f32 %v7878_v57, %v1711_v55  ;;  %vm7886_vm3 = vmmov %vm7883_vm12 }
 0x31f   :  { %v1789_v19 = vadd.f32 %v1765_v25, %v1644_v52  ;;  %v1790_v29 = vadd.f32 %v1766_v41, %v1645_v49  ;;  %v1697_v51 = vpop.permute.xlu1 %1696 }
 0x320   :  { %v1705_v45 = vsel %vm7879_vm5, %v6652_v9, %v1697_v51  ;;  %v1723_v47 = vsel %vm7880_vm6, %v1697_v51, %v6617_v54  ;;  %v6780_v54 = vpop.permute.xlu0 %1396  ;;  %vm7887_vm5 = vmmov %vm7885_vm2 }
 0x321   :  { %v1835_v48 = vsel %vm4823_vm15, %v1789_v19, 0.0  ;;  %v1836_v13 = vsel %vm4830_vm13, %v1790_v29, 0.0  ;;  %v1767_v44 = vmul.f32 %v7878_v57, %v1705_v45  ;;  %v1768_v12 = vmul.f32 %v7878_v57, %v1723_v47  ;;  %vm7888_vm6 = vmmov %vm7885_vm2 }
 0x322   :  { %v1859_v50 = vadd.f32 %v1835_v48, %v6662_v15  ;;  %v1860_v40 = vadd.f32 %v1836_v13, %v6664_v14 }
 0x323   :  { %v1791_v18 = vadd.f32 %v1767_v44, %v1646_v38  ;;  %v1792_v9 = vadd.f32 %v1768_v12, %v1647_v23  ;;  %v1047_v34 = vpop.permute.xlu1 %1046 }
 0x324   :  { %v1908_v39 = vadd.f32 %v1885_v5, %v1860_v40  ;;  %v1907_v43 = vadd.f32 %v1885_v5, %v1859_v50  ;;  %v6793_v32 = vpop.permute.xlu0 %1420  ;;  %v3680_v40 = vmov 0.0|0.0  }
 0x325   :  { %v1837_v55 = vsel %vm4917_vm11, %v1791_v18, 0.0  ;;  %v1838_v2 = vsel %vm4924_vm4, %v1792_v9, 0.0  ;;  %3313 = vmatprep.subr.bf16.mxu0 %v3680_v40  ;;  %v754_v9 = vsel %vm7871_vm7, %v6578_v56, %v6693_v27  ;;  %v1084_v56 = vsel %vm7885_vm2, %v1047_v34, %v6691_v28  ;;  %vm7891_vm7 = vmmov %vm7886_vm3 }
 0x326   :  { %v1861_v52 = vadd.f32 %v1837_v55, %v6680_v46  ;;  %v1862_v49 = vadd.f32 %v1838_v2, %v6682_v17  ;;  %v3074_v15 = vmul.f32 -1.442695, %v1908_v39  ;;  %v3073_v57 = vmul.f32 -1.442695, %v1907_v43 }
 0x327   :  { %v1071_v14 = vpop.permute.xlu1 %1070  ;;  %v742_v55 = vsel %vm7881_vm8, %v6582_v61, %v6718_v30  ;;  %vm7892_vm8 = vmmov %vm7886_vm3  ;;  %vm7897_vm2 = vcmp.lt.s32.totalorder %v4558_v6, 112 }
 0x328   :  { %3583 = vpow2.f32 %v3074_v15  ;;  %v6788_v25 = vadd.f32 %v1885_v5, %v1862_v49  ;;  %v6790_v41 = vadd.f32 %v1885_v5, %v1861_v52  ;;  %v6796_v17 = vpop.permute.xlu0 %1517  ;;  %v1090_v52 = vsel %vm7882_vm10, %v6684_v26, %v1047_v34  ;;  %v7884_v15 = vld [vmem:[#allocation63_spill] sm:$0xff] }
 0x329   :  { %3585 = vpow2.f32 %v3073_v57  ;;  %v1190_v57 = vmul.f32 %v7884_v15, %v7800_v8  ;;  %v1078_v8 = vsel %vm7887_vm5, %v6691_v28, %v1071_v14  ;;  %v687_v34 = vmul.f32 %v7863_v31, %v6689_v20 }
 0x32a   :  { %v3076_v37 = vmul.f32 -1.442695, %v6788_v25  ;;  %v3075_v29 = vmul.f32 -1.442695, %v6790_v41  ;;  %vm7895_vm10 = vcmp.lt.s32.totalorder %v4558_v6, 113  ;;  %vm7899_vm5 = vcmp.lt.s32.totalorder %v4558_v6, 127 }
 0x32b   :  { %v844_v19 = vpop.permute.xlu1 %843 }
 0x32c   :  { %3587 = vpow2.f32 %v3076_v37  ;;  %v6798_v13 = vpop.permute.xlu0 %1541  ;;  %v806_v37 = vmul.f32 %v7864_v35, %v754_v9 }
 0x32d   :  { %3589 = vpow2.f32 %v3075_v29  ;;  %v685_v29 = vmul.f32 %v7863_v31, %v6678_v62 }
 0x32f   :  { %v856_v46 = vpop.permute.xlu1 %855 }
 0x330   :  { %v6811_v2 = vpop.permute.xlu0 %1227  ;;  %v899_v49 = vsel %vm7883_vm12, %v844_v19, %v856_v46  ;;  %v893_v28 = vsel %vm7891_vm7, %v856_v46, %v6764_v7  ;;  %vm7896_vm12 = vmmov %vm7895_vm10 }
 0x332   :  { %v3584_v51 = vpop.eup %3583 }
 0x333   :  { %v3586_v23 = vpop.eup %3585  ;;  %v880_v38 = vpop.permute.xlu1 %879  ;;  %v2004_v45 = vadd.f32 1.0, %v3584_v51  ;;  %v808_v51 = vmul.f32 %v7864_v35, %v742_v55 }
 0x334   :  { %v2003_v47 = vadd.f32 1.0, %v3586_v23  ;;  %v905_v61 = vsel %vm7886_vm3, %v880_v38, %v844_v19  ;;  %v1096_v23 = vsel %vm7888_vm6, %v1071_v14, %v6684_v26  ;;  %v7889_v19 = vld [vmem:[#allocation26_spill] sm:$0xff]  ;;  %v830_v26 = vadd.f32 %v806_v37, %v685_v29  ;;  %v1252_v31 = vpop.permute.xlu0 %1251  ;;  %vm7898_vm3 = vmmov %vm7897_vm2 }
 0x335   :  { %3591 = vrcp.f32 %v2004_v45  ;;  %v1143_v62 = vmul.f32 %v7889_v19, %v1084_v56  ;;  %v1141_v14 = vmul.f32 %v7889_v19, %v1096_v23  ;;  %v1144_v20 = vmul.f32 %v7889_v19, %v1078_v8  ;;  %vm7900_vm6 = vmmov %vm7899_vm5 }
 0x336   :  { %v3588_v48 = vpop.eup %3587  ;;  %3593 = vrcp.f32 %v2003_v47  ;;  %v1142_v47 = vmul.f32 %v7889_v19, %v1090_v52  ;;  %v7893_v52 = vld [vmem:[#allocation104_spill] sm:$0xff]  ;;  %v1192_v37 = vmul.f32 %v7884_v15, %v7805_v33  ;;  %v832_v56 = vadd.f32 %v808_v51, %v687_v34 }
 0x337   :  { %v3590_v5 = vpop.eup %3589  ;;  %v1409_v44 = vpop.permute.xlu1 %1408  ;;  %v2006_v12 = vadd.f32 1.0, %v3588_v48  ;;  %v7890_v48 = vld [vmem:[#allocation72_spill] sm:$0xff]  ;;  %v1189_v46 = vmul.f32 %v7884_v15, %v7893_v52 }
 0x338   :  { %v2005_v50 = vadd.f32 1.0, %v3590_v5  ;;  %v951_v5 = vmul.f32 %v7890_v48, %v899_v49  ;;  %v950_v35 = vmul.f32 %v7890_v48, %v905_v61  ;;  %v7894_v49 = vld [vmem:[#allocation106_spill] sm:$0xff]  ;;  %v1452_v51 = vsel %vm7896_vm12, %v6780_v54, %v1409_v44  ;;  %vm7905_vm12 = vmmov %vm7895_vm10 }
 0x339   :  { %3595 = vrcp.f32 %v2006_v12  ;;  %v1213_v33 = vadd.f32 %v1189_v46, %v1141_v14 }
 0x33a   :  { %3597 = vrcp.f32 %v2005_v50 }
 0x33b   :  { %v6801_v18 = vpop.permute.xlu1 %1432 }
 0x33f   :  { %v1530_v27 = vpop.permute.xlu1 %1529  ;;  %v3592_v30 = vpop.eup %3591 }
 0x340   :  { %v3594_v45 = vpop.eup %3593  ;;  %v6839_v12 = vmul.f32 %v3592_v30, %v1908_v39  ;;  %v887_v39 = vsel %vm7892_vm8, %v6764_v7, %v880_v38  ;;  %v1214_v30 = vadd.f32 %v1190_v57, %v1142_v47  ;;  %v952_v7 = vmul.f32 %v7890_v48, %v893_v28 }
 0x341   :  { %v6846_v50 = vmul.f32 %v3594_v45, %v1907_v43  ;;  %v1191_v43 = vmul.f32 %v7884_v15, %v7894_v49  ;;  %v975_v38 = vadd.f32 %v951_v5, %v830_v26  ;;  %v953_v23 = vmul.f32 %v7890_v48, %v887_v39  ;;  %v1663_v5 = vpop.permute.xlu0 %1662 }
 0x342   :  { %2231 = vmatprep.mubr.f32.mxu0 %v6839_v12  ;;  %v974_v45 = vadd.f32 %v950_v35, %v6750_v24  ;;  %v1216_v15 = vadd.f32 %v1192_v37, %v1144_v20  ;;  %v1446_v57 = vsel %vm7895_vm10, %v1409_v44, %v6793_v32  ;;  %v1567_v24 = vsel %vm7897_vm2, %v1530_v27, %v6798_v13 }
 0x343   :  { %v1554_v9 = vpop.permute.xlu1 %1553  ;;  %v3596_v55 = vpop.eup %3595  ;;  %2232 = vmatmul.mubr.f32.gmra.mrb[20].mxu0 %v6846_v50  ;;  %v1215_v8 = vadd.f32 %v1191_v43, %v1143_v62  ;;  %v976_v44 = vadd.f32 %v952_v7, %v6716_v10  ;;  %v1021_v48 = vsel %vm4753_vm0, %v975_v38, 0.0  ;;  %v1503_v26 = vmul.f32 %v6435_v59, %v1452_v51  ;;  %vm7901_vm0 = vmmov %vm7897_vm2  ;;  %v7908_v51 = vld [vmem:[#allocation79_spill] sm:$0xff] }
 0x344   :  { %v3598_v61 = vpop.eup %3597  ;;  %v6863_v29 = vmul.f32 %v3596_v55, %v6788_v25  ;;  %v1020_v35 = vsel %vm4786_vm1, %v974_v45, 0.0  ;;  %v1504_v14 = vmul.f32 %v6435_v59, %v1446_v57  ;;  %v1625_v10 = vmul.f32 %v6441_v4, %v1567_v24  ;;  %vm7902_vm7 = vmmov %vm7901_vm0 }
 0x345   :  { %v6868_v19 = vmul.f32 %v3598_v61, %v6790_v41  ;;  %v1573_v41 = vsel %vm7898_vm3, %v6796_v17, %v1530_v27  ;;  %v977_v27 = vadd.f32 %v953_v23, %v832_v56  ;;  %v1561_v52 = vsel %vm7901_vm0, %v6798_v13, %v1554_v9  ;;  %vm7903_vm1 = vmmov %vm7899_vm5 }
 0x346   :  { %2326 = vmatprep.mubr.f32.mxu1 %v6863_v29  ;;  %v1624_v20 = vmul.f32 %v6441_v4, %v1573_v41  ;;  %v1579_v21 = vsel %vm7902_vm7, %v1554_v9, %v6796_v17  ;;  %vm7904_vm8 = vmmov %vm7903_vm1  ;;  %v1022_v13 = vsel %vm4850_vm14, %v976_v44, 0.0  ;;  %v1440_v17 = vsel %vm7895_vm10, %v6793_v32, %v6801_v18 }
 0x347   :  { %v1240_v25 = vpop.permute.xlu1 %1239  ;;  %2327 = vmatmul.mubr.f32.gmra.mrb[20].mxu1 %v6868_v19  ;;  %v1649_v7 = vadd.f32 %v1625_v10, %v1504_v14  ;;  %v1626_v23 = vmul.f32 %v6441_v4, %v1561_v52  ;;  %v1627_v53 = vmul.f32 %v6441_v4, %v1579_v21  ;;  %vm7906_vm14 = vcmp.lt.s32.totalorder %v4558_v6, 111 }
 0x348   :  { %v1277_v34 = vsel %vm7899_vm5, %v1240_v25, %v1252_v31  ;;  %v1283_v47 = vsel %vm7900_vm6, %v6811_v2, %v1240_v25  ;;  %v1648_v9 = vadd.f32 %v1624_v20, %v1503_v26 }
 0x349   :  { %v1334_v62 = vmul.f32 %v6437_v22, %v1283_v47  ;;  %v1335_v28 = vmul.f32 %v6437_v22, %v1277_v34 }
 0x34b   :  { %v1358_v39 = vadd.f32 %v1334_v62, %v1213_v33  ;;  %v1359_v42 = vadd.f32 %v1335_v28, %v1214_v30  ;;  %v1264_v55 = vpop.permute.xlu1 %1263  ;;  %v1023_v30 = vsel %vm7759_vm9, %v977_v27, 0.0  ;;  %vm7907_vm9 = vmmov %vm7906_vm14 }
 0x34c   :  { %v1271_v46 = vsel %vm7903_vm1, %v1252_v31, %v1264_v55  ;;  %v1289_v49 = vsel %vm7904_vm8, %v1264_v55, %v6811_v2  ;;  %v1458_v2 = vsel %vm7905_vm12, %v6801_v18, %v6780_v54  ;;  %v1687_v31 = vpop.permute.xlu0 %1686  ;;  %vm7909_vm2 = vmmov %vm7907_vm9 }
 0x34d   :  { %v1382_v43 = vadd.f32 %v1358_v39, %v1020_v35  ;;  %v1383_v37 = vadd.f32 %v1359_v42, %v1021_v48  ;;  %v1336_v56 = vmul.f32 %v6437_v22, %v1271_v46  ;;  %v1337_v61 = vmul.f32 %v6437_v22, %v1289_v49  ;;  %vm7910_vm3 = vmmov %vm7909_vm2 }
 0x34f   :  { %v1360_v22 = vadd.f32 %v1336_v56, %v1215_v8  ;;  %v1361_v38 = vadd.f32 %v1337_v61, %v1216_v15  ;;  %v1675_v0 = vpop.permute.xlu1 %1674  ;;  %v1505_v8 = vmul.f32 %v6435_v59, %v1440_v17  ;;  %v1506_v15 = vmul.f32 %v6435_v59, %v1458_v2 }
 0x350   :  { %v1712_v45 = vsel %vm7906_vm14, %v1675_v0, %v1687_v31  ;;  %v1718_v32 = vsel %vm7907_vm9, %v1663_v5, %v1675_v0  ;;  %v1889_v26 = vpop.permute.xlu0 %1888 }
 0x351   :  { %v1384_v33 = vadd.f32 %v1360_v22, %v1022_v13  ;;  %v1385_v57 = vadd.f32 %v1361_v38, %v1023_v30  ;;  %v1769_v54 = vmul.f32 %v7908_v51, %v1718_v32  ;;  %v1770_v18 = vmul.f32 %v7908_v51, %v1712_v45 }
 0x352   :  { %v1650_v4 = vadd.f32 %v1626_v23, %v1505_v8  ;;  %v1651_v34 = vadd.f32 %v1627_v53, %v1506_v15  ;;  %v7911_v15 = vld [vmem:[#allocation89_spill] sm:$0xff] }
 0x353   :  { %v1793_v25 = vadd.f32 %v1769_v54, %v1648_v9  ;;  %v1794_v24 = vadd.f32 %v1770_v18, %v1649_v7  ;;  %v1699_v41 = vpop.permute.xlu1 %1698 }
 0x354   :  { %v1706_v47 = vsel %vm7909_vm2, %v1687_v31, %v1699_v41  ;;  %v1724_v44 = vsel %vm7910_vm3, %v1699_v41, %v1663_v5 }
 0x355   :  { %v1839_v48 = vsel %vm4823_vm15, %v1793_v25, 0.0  ;;  %v1840_v62 = vsel %vm4830_vm13, %v1794_v24, 0.0  ;;  %v1771_v28 = vmul.f32 %v7908_v51, %v1706_v47  ;;  %v1772_v59 = vmul.f32 %v7908_v51, %v1724_v44 }
 0x356   :  { %v1863_v27 = vadd.f32 %v1839_v48, %v1382_v43  ;;  %v1864_v35 = vadd.f32 %v1840_v62, %v1383_v37  ;;  %v2337_v25 = vmul.f32 0.00390625, %v7911_v15  ;;  %vm3681_vm13 = vmmov 0  }
 0x357   :  { %v1795_v14 = vadd.f32 %v1771_v28, %v1650_v4  ;;  %v1796_v20 = vadd.f32 %v1772_v59, %v1651_v34  ;;  %vm2350_vm15 = vcmask 392192  }
 0x358   :  { %v1912_v10 = vadd.f32 %v1889_v26, %v1864_v35  ;;  %v1911_v39 = vadd.f32 %v1889_v26, %v1863_v27  ;;  %v7912_v27 = vmov 0.0  }
 0x359   :  { %v1841_v6 = vsel %vm4917_vm11, %v1795_v14, 0.0  ;;  %v1842_v36 = vsel %vm4924_vm4, %v1796_v20, 0.0  ;;  %v2344_v14 = vld [vmem:[%s7114_s4] sm:$0xff]  ;;  %vm7913_vm4 = vcmask 64512  }
 0x35a   :  { %v1865_v5 = vadd.f32 %v1841_v6, %v1384_v33  ;;  %v1866_v60 = vadd.f32 %v1842_v36, %v1385_v57  ;;  %v3078_v42 = vmul.f32 -1.442695, %v1912_v10  ;;  %v3077_v55 = vmul.f32 -1.442695, %v1911_v39  ;;  %2347 = vperm.xlu1 %3418, %v2344_v14   ;;  %vm7914_vm11 = vmmov %vm7913_vm4 }
 0x35b   :  { %vm7915_vm5 = vmmov %vm7913_vm4 }
 0x35c   :  { %3599 = vpow2.f32 %v3078_v42  ;;  %v1914_v52 = vadd.f32 %v1889_v26, %v1866_v60  ;;  %v1913_v21 = vadd.f32 %v1889_v26, %v1865_v5  ;;  %vm7916_vm6 = vmmov %vm7913_vm4 }
 0x35d   :  { %3601 = vpow2.f32 %v3077_v55  ;;  %vm7917_vm0 = vmmov %vm7913_vm4 }
 0x35e   :  { %v3080_v46 = vmul.f32 -1.442695, %v1914_v52  ;;  %v3079_v49 = vmul.f32 -1.442695, %v1913_v21  ;;  %vm7918_vm7 = vmmov %vm7917_vm0 }
 0x35f   :  { %vm7919_vm1 = vmmov %vm7917_vm0 }
 0x360   :  { %3603 = vpow2.f32 %v3080_v46  ;;  %vm7920_vm8 = vmmov %vm7917_vm0 }
 0x361   :  { %3605 = vpow2.f32 %v3079_v49  ;;  %vm7921_vm10 = vmmov %vm7917_vm0 }
 0x362   :  { %vm7922_vm12 = vmmov %vm7917_vm0 }
 0x363   :  { %vm7923_vm14 = vmmov %vm7917_vm0 }
 0x364   :  { %vm7924_vm9 = vmmov %vm7917_vm0 }
 0x365   :  { %vm7925_vm2 = vmmov %vm7917_vm0 }
 0x366   :  { %v3600_v43 = vpop.eup %3599  ;;  %vm7926_vm3 = vmmov %vm7917_vm0 }
 0x367   :  { %v3602_v37 = vpop.eup %3601  ;;  %v2008_v56 = vadd.f32 1.0, %v3600_v43 }
 0x368   :  { %v2007_v16 = vadd.f32 1.0, %v3602_v37 }
 0x369   :  { %3607 = vrcp.f32 %v2008_v56 }
 0x36a   :  { %v3604_v61 = vpop.eup %3603  ;;  %3609 = vrcp.f32 %v2007_v16 }
 0x36b   :  { %v3606_v3 = vpop.eup %3605  ;;  %v2010_v13 = vadd.f32 1.0, %v3604_v61 }
 0x36c   :  { %v2009_v30 = vadd.f32 1.0, %v3606_v3 }
 0x36d   :  { %3611 = vrcp.f32 %v2010_v13 }
 0x36e   :  { %3613 = vrcp.f32 %v2009_v30 }
 0x373   :  { %v3608_v17 = vpop.eup %3607 }
 0x374   :  { %v3610_v2 = vpop.eup %3609  ;;  %v6949_v31 = vmul.f32 %v3608_v17, %v1912_v10  ;;  %v2431_v17 = vld [vmem:[%s7116_s5] sm:$0xff] }
 0x375   :  { %v6951_v9 = vmul.f32 %v3610_v2, %v1911_v39  ;;  %v2433_v2 = vld [vmem:[%s7116_s5 + $0x10] sm:$0xff] }
 0x376   :  { %2236 = vmatprep.mubr.f32.mxu0 %v6949_v31 }
 0x377   :  { %v3612_v7 = vpop.eup %3611  ;;  %2237 = vmatmul.mubr.f32.gmra.mrb[22].mxu0 %v6951_v9 }
 0x378   :  { %v3614_v22 = vpop.eup %3613  ;;  %v6955_v38 = vmul.f32 %v3612_v7, %v1914_v52  ;;  %3235 = vmatprep.mubr.msk.f32.mxu0 %vm3681_vm13, %v7912_v27  ;;  %v3682_v7 = vmov 2   ;;  %vm7927_vm13 = vmmov %vm7917_vm0 }
 0x379   :  { %v6957_v0 = vmul.f32 %v3614_v22, %v1913_v21  ;;  %3419 = vset.pattern.permute.xlu0 %v3682_v7  ;;  %3420 = vset.pattern.permute.xlu1 %v3682_v7  ;;  %v6983_v22 = vld [vmem:[%s7111_s2] sm:$0xff] }
 0x37a   :  { %2331 = vmatprep.mubr.f32.mxu1 %v6955_v38  ;;  %2438 = vperm.xlu0 %3419, %v6983_v22  }
 0x37b   :  { %2332 = vmatmul.mubr.f32.gmra.mrb[22].mxu1 %v6957_v0 }
 0x37c   :  { %3243 = vmatprep.mubr.msk.f32.mxu1 %vm7914_vm11, %v2433_v2  ;;  %vm7929_vm11 = vmmov %vm7917_vm0 }
 0x3a9   :  { %v3144_v23 = vpop.f32.mrb[14].mxu0 }
 0x3aa   :  { %v3145_v53 = vpop.f32.mrb[15].mxu0 }
 0x3ab   :  { %v3146_v45 = vadd.f32 %v3145_v53, %v3144_v23  ;;  %v3651_v23 = vld [vmem:[%s7111_s2 + $0x8] sm:$0xff]  ;;  %v3652_v53 = vld [vmem:[%s7111_s2 + $0x18] sm:$0xff] }
 0x3ac   :  { %2442 = vperm.xlu1 %3420, %v3651_v23   ;;  %2450 = vperm.xlu0 %3419, %v3652_v53  }
 0x3ae   :  { %v3194_v32 = vpop.f32.mrb[14].mxu1 }
 0x3af   :  { %v3195_v33 = vpop.f32.mrb[15].mxu1 }
 0x3b0   :  { %v3196_v57 = vadd.f32 %v3195_v33, %v3194_v32  ;;  %v3654_v32 = vld [vmem:[%s7111_s2 + $0x28] sm:$0xff]  ;;  %v3655_v33 = vld [vmem:[%s7111_s2 + $0x20] sm:$0xff] }
 0x3b1   :  { %2458 = vperm.xlu0 %3419, %v3654_v32  }
 0x3b2   :  { %v2314_v51 = vadd.f32 %v3196_v57, %v3146_v45  ;;  %v3147_v54 = vpop.f32.mrb[16].mxu0  ;;  %v3653_v45 = vld [vmem:[%s7111_s2 + $0x10] sm:$0xff] }
 0x3b3   :  { %v3197_v18 = vpop.f32.mrb[16].mxu1  ;;  %v3148_v8 = vpop.f32.mrb[17].mxu0  ;;  %2446 = vperm.xlu1 %3420, %v3653_v45  }
 0x3b4   :  { %v2338_v24 = vmul.f32 0.00390625, %v2314_v51  ;;  %v3149_v41 = vadd.f32 %v3148_v8, %v3147_v54  ;;  %v3198_v4 = vpop.f32.mrb[17].mxu1 }
 0x3b5   :  { %v3199_v34 = vadd.f32 %v3198_v4, %v3197_v18  ;;  %v2432_v4 = vld [vmem:[%s7116_s5 + $0x8] sm:$0xff] }
 0x3b6   :  { %v3314_v47 = vpack.c.bf16 %v2338_v24, %v2337_v25 }
 0x3b7   :  { %v2319_v44 = vadd.f32 %v3199_v34, %v3149_v41  ;;  %2454 = vperm.xlu1 %3420, %v3655_v33   ;;  %v2434_v34 = vld [vmem:[%s7116_s5 + $0x18] sm:$0xff] }
 0x3b8   :  { %3315 = vmatpush3.bf16.msra.mxu0 %v3314_v47  ;;  %v2435_v47 = vld [vmem:[%s7116_s5 + $0x20] sm:$0xff] }
 0x3b9   :  { %3316 = vmatprep.subr.bf16.mxu0 %v3680_v40  ;;  %v2339_v10 = vmul.f32 0.00390625, %v2319_v44  ;;  %v2436_v44 = vld [vmem:[%s7116_s5 + $0x28] sm:$0xff] }
 0x3d7   :  { %v3150_v48 = vpop.f32.mrb[18].mxu0 }
 0x3d8   :  { %v3151_v62 = vpop.f32.mrb[19].mxu0 }
 0x3d9   :  { %v3200_v28 = vpop.f32.mrb[18].mxu1  ;;  %v3152_v59 = vadd.f32 %v3151_v62, %v3150_v48  ;;  %v2348_v57 = vpop.permute.xlu1 %2347  ;;  %v2611_v48 = vld [vmem:[%s7117_s7 + $0x8] sm:$0xff]  ;;  %v2613_v62 = vld [vmem:[%s7117_s7 + $0x18] sm:$0xff] }
 0x3da   :  { %v3201_v35 = vpop.f32.mrb[19].mxu1 }
 0x3db   :  { %v3202_v26 = vadd.f32 %v3201_v35, %v3200_v28  ;;  %v2610_v28 = vld [vmem:[%s7117_s7] sm:$0xff] }
 0x3dd   :  { %v2324_v20 = vadd.f32 %v3202_v26, %v3152_v59  ;;  %v2612_v59 = vld [vmem:[%s7117_s7 + $0x10] sm:$0xff] }
 0x3df   :  { %v2340_v39 = vmul.f32 0.00390625, %v2324_v20 }
 0x3e1   :  { %v3317_v6 = vpack.c.bf16 %v2340_v39, %v2339_v10 }
 0x3e3   :  { %3318 = vmatpush3.bf16.msra.mxu0 %v3317_v6 }
 0x3e4   :  { %3319 = vmatprep.subr.bf16.mxu0 %v3680_v40  ;;  %v2343_v40 = vld [vmem:[%s7115_s3] sm:$0xff] }
 0x3f9   :  { %v2439_v26 = vpop.permute.xlu0 %2438 }
 0x416   :  { %v3153_v36 = vpop.f32.mrb[20].mxu0 }
 0x417   :  { %v3154_v5 = vpop.f32.mrb[21].mxu0 }
 0x418   :  { %v3155_v60 = vadd.f32 %v3154_v5, %v3153_v36 }
 0x41a   :  { %v3203_v42 = vpop.f32.mrb[20].mxu1 }
 0x41b   :  { %v3204_v55 = vpop.f32.mrb[21].mxu1 }
 0x41c   :  { %v3205_v52 = vadd.f32 %v3204_v55, %v3203_v42 }
 0x41e   :  { %v2329_v21 = vadd.f32 %v3205_v52, %v3155_v60 }
 0x420   :  { %v2341_v3 = vmul.f32 0.00390625, %v2329_v21 }
 0x42b   :  { %v2443_v35 = vpop.permute.xlu1 %2442  ;;  %v2451_v21 = vpop.permute.xlu0 %2450 }
 0x432   :  { %v2447_v14 = vpop.permute.xlu1 %2446 }
 0x44a   :  { %v3156_v46 = vpop.f32.mrb[22].mxu0 }
 0x44b   :  { %v3157_v49 = vpop.f32.mrb[23].mxu0 }
 0x44c   :  { %v3158_v43 = vadd.f32 %v3157_v49, %v3156_v46 }
 0x44e   :  { %v3206_v37 = vpop.f32.mrb[22].mxu1 }
 0x44f   :  { %v3207_v56 = vpop.f32.mrb[23].mxu1 }
 0x450   :  { %v3208_v16 = vadd.f32 %v3207_v56, %v3206_v37  ;;  %v2455_v37 = vpop.permute.xlu1 %2454 }
 0x452   :  { %v2334_v61 = vadd.f32 %v3208_v16, %v3158_v43 }
 0x454   :  { %v2342_v13 = vmul.f32 0.00390625, %v2334_v61  ;;  %v2459_v61 = vpop.permute.xlu0 %2458 }
 0x456   :  { %v3320_v30 = vpack.c.bf16 %v2342_v13, %v2341_v3 }
 0x458   :  { %3321 = vmatpush3.bf16.msra.mxu0 %v3320_v30 }
 0x45b   :  { %3236 = vmatmul.mubr.msk.f32.vlgmr.msra.gmra.mrb[24].mxu0 %vm2350_vm15, %v2343_v40 }
 0x45c   :  { %3240 = vmatprep.mubr.msk.f32.mxu0 %vm7913_vm4, %v2431_v17  ;;  %vm7928_vm4 = vmmov %vm7917_vm0 }
 0x52e   :  { %v2420_v51 = vpop.f32.mrb[24].mxu0 }
 0x52f   :  { %v2421_v54 = vadd.f32 %v2420_v51, %v2348_v57  ;;  %v3237_v18 = vpop.f32.mrb[25].mxu0 }
 0x531   :  { %v3082_v8 = vmul.f32 -1.442695, %v2421_v54 }
 0x533   :  { %3615 = vpow2.f32 %v3082_v8 }
 0x53d   :  { %v3616_v15 = vpop.eup %3615 }
 0x53e   :  { %v2427_v25 = vadd.f32 1.0, %v3616_v15 }
 0x540   :  { %3617 = vrcp.f32 %v2427_v25 }
 0x54a   :  { %v3618_v24 = vpop.eup %3617 }
 0x54b   :  { %v2430_v41 = vmul.f32 %v3618_v24, %v2421_v54 }
 0x54d   :  { %3238 = vmatprep.subr.mxu0 %v2430_v41  ;;  %3346 = vmatprep.subr.mxu1 %v2430_v41 }
 0x54e   :  { %3239 = vmatpush3.msra.mxu0 %v2430_v41  ;;  %3347 = vmatpush3.msra.mxu1 %v2430_v41 }
 0x54f   :  { %3241 = vmatmul.mubr.msk.f32.vlgmr.msra.gmra.mrb[26].mxu0 %vm7915_vm5, %v2432_v4  ;;  %3244 = vmatmul.mubr.msk.f32.vlgmr.msra.gmra.mrb[24].mxu1 %vm7916_vm6, %v2434_v34  ;;  %vm7930_vm5 = vmmov %vm7917_vm0  ;;  %v3683_v4 = vmov 3  }
 0x550   :  { %3246 = vmatprep.mubr.msk.f32.mxu1 %vm7917_vm0, %v2435_v47  ;;  %2696 = vmatprep.mubr.f32.mxu0 %v7912_v27 }
 0x551   :  { %2632 = vmatprep.subr.mxu0 %v2611_v48  ;;  %2733 = vmatprep.subr.mxu1 %v2613_v62 }
 0x552   :  { %2633 = vmatpush1.msra.mxu0 %v2610_v28  ;;  %2734 = vmatpush1.msra.mxu1 %v2612_v59  ;;  %v7931_v59 = vld [vmem:[#allocation50_spill] sm:$0xff] }
 0x553   :  { %3247 = vmatmul.mubr.msk.f32.gmra.mrb[26].mxu1 %vm7918_vm7, %v2436_v44  ;;  %3421 = vset.pattern.permute.xlu1 %v3683_v4 }
 0x554   :  { %2797 = vmatprep.mubr.f32.mxu1 %v7912_v27  ;;  %3422 = vset.pattern.permute.xlu0 %v3683_v4 }
 0x555   :  { %2860 = vperm.xlu1 %3421, %v6983_v22  }
 0x622   :  { %v3242_v20 = vpop.f32.mrb[26].mxu0  ;;  %v3245_v10 = vpop.f32.mrb[24].mxu1 }
 0x623   :  { %v2545_v39 = vpop.f32.mrb[27].mxu0  ;;  %v2551_v6 = vadd.f32 %v3242_v20, %v2443_v35  ;;  %v2555_v36 = vpop.f32.mrb[25].mxu1  ;;  %v2561_v49 = vadd.f32 %v3245_v10, %v2451_v21  ;;  %v7933_v20 = vld [vmem:[#allocation71_spill] sm:$0xff]  ;;  %v7938_v21 = vld [vmem:[#allocation2_spill] sm:$0xff] }
 0x624   :  { %v2546_v5 = vadd.f32 %v2545_v39, %v2439_v26  ;;  %v2556_v60 = vadd.f32 %v2555_v36, %v2447_v14  ;;  %v7932_v26 = vld [vmem:[#allocation52_spill] sm:$0xff]  ;;  %v7934_v39 = vld [vmem:[#allocation85_spill] sm:$0xff] }
 0x625   :  { %v3090_v42 = vmul.f32 -1.442695, %v2551_v6  ;;  %v3092_v56 = vmul.f32 -1.442695, %v2561_v49 }
 0x626   :  { %v3089_v55 = vmul.f32 -1.442695, %v2546_v5  ;;  %v3248_v52 = vpop.f32.mrb[26].mxu1  ;;  %v3091_v43 = vmul.f32 -1.442695, %v2556_v60  ;;  %v7935_v5 = vld [vmem:[#allocation45_spill] sm:$0xff] }
 0x627   :  { %3619 = vpow2.f32 %v3090_v42  ;;  %v2565_v46 = vpop.f32.mrb[27].mxu1  ;;  %v2571_v3 = vadd.f32 %v3248_v52, %v2459_v61  ;;  %v7936_v42 = vld [vmem:[#allocation46_spill] sm:$0xff] }
 0x628   :  { %3621 = vpow2.f32 %v3089_v55  ;;  %v2566_v16 = vadd.f32 %v2565_v46, %v2455_v37  ;;  %v7937_v55 = vld [vmem:[#allocation73_spill] sm:$0xff] }
 0x629   :  { %3623 = vpow2.f32 %v3091_v43  ;;  %v3094_v2 = vmul.f32 -1.442695, %v2571_v3 }
 0x62a   :  { %3625 = vpow2.f32 %v3092_v56  ;;  %v3093_v13 = vmul.f32 -1.442695, %v2566_v16 }
 0x62c   :  { %3627 = vpow2.f32 %v3093_v13 }
 0x631   :  { %v3620_v30 = vpop.eup %3619 }
 0x632   :  { %v3622_v40 = vpop.eup %3621  ;;  %v2593_v7 = vadd.f32 1.0, %v3620_v30 }
 0x633   :  { %v2592_v17 = vadd.f32 1.0, %v3622_v40  ;;  %v3624_v23 = vpop.eup %3623 }
 0x634   :  { %v2594_v53 = vadd.f32 1.0, %v3624_v23  ;;  %v3626_v45 = vpop.eup %3625 }
 0x635   :  { %3629 = vrcp.f32 %v2592_v17  ;;  %v2595_v32 = vadd.f32 1.0, %v3626_v45  ;;  %v7939_v17 = vld [vmem:[#allocation32_spill] sm:$0xff] }
 0x636   :  { %3631 = vpow2.f32 %v3094_v2  ;;  %v3628_v33 = vpop.eup %3627 }
 0x637   :  { %3633 = vrcp.f32 %v2593_v7  ;;  %v2596_v51 = vadd.f32 1.0, %v3628_v33  ;;  %v7940_v7 = vld [vmem:[#allocation11_spill] sm:$0xff] }
 0x638   :  { %3635 = vrcp.f32 %v2594_v53 }
 0x639   :  { %3637 = vrcp.f32 %v2595_v32 }
 0x63a   :  { %3639 = vrcp.f32 %v2596_v51 }
 0x63f   :  { %v3630_v57 = vpop.eup %3629 }
 0x640   :  { %3095 = vmatmul.mubr.msk.f32.vlgmr.msra.gmra.mrb[28].mxu0 %vm7919_vm1, %v3630_v57  ;;  %3101 = vmatmul.mubr.msk.f32.vlgmr.msra.gmra.mrb[28].mxu1 %vm7920_vm8, %v3630_v57  ;;  %v3632_v54 = vpop.eup %3631  ;;  %v7941_v57 = vld [vmem:[#allocation70_spill] sm:$0xff] }
 0x641   :  { %2702 = vmatprep.mubr.f32.mxu0 %v7912_v27  ;;  %2803 = vmatprep.mubr.f32.mxu1 %v7912_v27  ;;  %v3634_v18 = vpop.eup %3633  ;;  %v2597_v8 = vadd.f32 1.0, %v3632_v54  ;;  %v7942_v54 = vld [vmem:[#allocation87_spill] sm:$0xff] }
 0x642   :  { %v3636_v15 = vpop.eup %3635 }
 0x643   :  { %3641 = vrcp.f32 %v2597_v8  ;;  %v3638_v25 = vpop.eup %3637 }
 0x644   :  { %3096 = vmatmul.mubr.msk.f32.gmra.mrb[30].mxu0 %vm7921_vm10, %v3634_v18  ;;  %3102 = vmatmul.mubr.msk.f32.gmra.mrb[30].mxu1 %vm7922_vm12, %v3634_v18  ;;  %v3640_v24 = vpop.eup %3639 }
 0x645   :  { %2708 = vmatprep.mubr.f32.mxu0 %v7912_v27  ;;  %2809 = vmatprep.mubr.f32.mxu1 %v7912_v27 }
 0x648   :  { %3097 = vmatmul.mubr.msk.f32.gmra.mrb[32].mxu0 %vm7923_vm14, %v3636_v15  ;;  %3103 = vmatmul.mubr.msk.f32.gmra.mrb[32].mxu1 %vm7924_vm9, %v3636_v15 }
 0x649   :  { %2714 = vmatprep.mubr.f32.mxu0 %v7912_v27  ;;  %2815 = vmatprep.mubr.f32.mxu1 %v7912_v27 }
 0x64c   :  { %3098 = vmatmul.mubr.msk.f32.gmra.mrb[34].mxu0 %vm7925_vm2, %v3638_v25  ;;  %3104 = vmatmul.mubr.msk.f32.gmra.mrb[34].mxu1 %vm7926_vm3, %v3638_v25 }
 0x64d   :  { %2720 = vmatprep.mubr.f32.mxu0 %v7912_v27  ;;  %2821 = vmatprep.mubr.f32.mxu1 %v7912_v27  ;;  %v3642_v41 = vpop.eup %3641 }
 0x650   :  { %3099 = vmatmul.mubr.msk.f32.gmra.mrb[36].mxu0 %vm7927_vm13, %v3640_v24  ;;  %3105 = vmatmul.mubr.msk.f32.gmra.mrb[36].mxu1 %vm7928_vm4, %v3640_v24 }
 0x651   :  { %2726 = vmatprep.mubr.f32.mxu0 %v7912_v27  ;;  %2827 = vmatprep.mubr.f32.mxu1 %v7912_v27 }
 0x654   :  { %3100 = vmatmul.mubr.msk.f32.gmra.mrb[38].mxu0 %vm7929_vm11, %v3642_v41  ;;  %3106 = vmatmul.mubr.msk.f32.gmra.mrb[38].mxu1 %vm7930_vm5, %v3642_v41 }
 0x655   :  { %2930 = vmatprep.mubr.f32.mxu0 %v7912_v27  ;;  %3001 = vmatprep.mubr.f32.mxu1 %v7912_v27 }
 0x713   :  { %v2698_v34 = vpop.f32.mrb[28].mxu0  ;;  %v2799_v47 = vpop.f32.mrb[28].mxu1 }
 0x714   :  { %v2700_v44 = vpop.f32.mrb[29].mxu0  ;;  %v2801_v48 = vpop.f32.mrb[29].mxu1  ;;  %v2834_v35 = vmul.f32 %v2698_v34, %v7931_v59  ;;  %v2836_v14 = vmul.f32 %v2799_v47, %v7932_v26 }
 0x715   :  { %v2835_v60 = vmul.f32 %v2700_v44, %v7935_v5  ;;  %v2837_v22 = vmul.f32 %v2801_v48, %v7936_v42  ;;  %v3656_v42 = vld [vmem:[%s7109_s0] sm:$0xff] }
 0x717   :  { %v2704_v62 = vpop.f32.mrb[30].mxu0  ;;  %v2805_v28 = vpop.f32.mrb[30].mxu1 }
 0x718   :  { %v2838_v10 = vmul.f32 %v2704_v62, %v7933_v20  ;;  %v2840_v6 = vmul.f32 %v2805_v28, %v7934_v39  ;;  %v2706_v27 = vpop.f32.mrb[31].mxu0  ;;  %v2807_v36 = vpop.f32.mrb[31].mxu1 }
 0x719   :  { %v2839_v52 = vmul.f32 %v2706_v27, %v7937_v55  ;;  %v2841_v46 = vmul.f32 %v2807_v36, %v7938_v21  ;;  %v3657_v55 = vld [vmem:[%s7109_s0 + $0x10] sm:$0xff]  ;;  %v3658_v21 = vld [vmem:[%s7109_s0 + $0x8] sm:$0xff] }
 0x71a   :  { %v3324_v49 = vpack.c.bf16 %v2838_v10, %v2834_v35  ;;  %v3336_v43 = vpack.c.bf16 %v2840_v6, %v2836_v14 }
 0x71b   :  { %v3322_v37 = vpack.c.bf16 %v2839_v52, %v2835_v60  ;;  %v3334_v56 = vpack.c.bf16 %v2841_v46, %v2837_v22  ;;  %v2710_v16 = vpop.f32.mrb[32].mxu0  ;;  %v2811_v61 = vpop.f32.mrb[32].mxu1 }
 0x71c   :  { %v2712_v3 = vpop.f32.mrb[33].mxu0  ;;  %v2813_v13 = vpop.f32.mrb[33].mxu1  ;;  %v2842_v2 = vmul.f32 %v2710_v16, %v7939_v17  ;;  %v2844_v23 = vmul.f32 %v2811_v61, %v7940_v7 }
 0x71d   :  { %3323 = vmatprep.subr.bf16.mxu0 %v3322_v37  ;;  %3335 = vmatprep.subr.bf16.mxu1 %v3334_v56  ;;  %v2843_v51 = vmul.f32 %v2712_v3, %v7941_v57  ;;  %v2845_v18 = vmul.f32 %v2813_v13, %v7942_v54 }
 0x71e   :  { %3325 = vmatpush1.bf16.msra.mxu0 %v3324_v49  ;;  %3337 = vmatpush1.bf16.msra.mxu1 %v3336_v43  ;;  %v3659_v49 = vld [vmem:[%s7109_s0 + $0x18] sm:$0xff] }
 0x71f   :  { %v2716_v30 = vpop.f32.mrb[34].mxu0  ;;  %v2817_v40 = vpop.f32.mrb[34].mxu1 }
 0x720   :  { %v2846_v53 = vmul.f32 %v2716_v30, %v6608_v63  ;;  %v2848_v45 = vmul.f32 %v2817_v40, %v6626_v11  ;;  %v2718_v32 = vpop.f32.mrb[35].mxu0  ;;  %v2819_v33 = vpop.f32.mrb[35].mxu1 }
 0x721   :  { %v2847_v8 = vmul.f32 %v2718_v32, %v6619_v1  ;;  %v2849_v15 = vmul.f32 %v2819_v33, %v6633_v58 }
 0x722   :  { %v3328_v25 = vpack.c.bf16 %v2846_v53, %v2842_v2  ;;  %v3340_v24 = vpack.c.bf16 %v2848_v45, %v2844_v23 }
 0x723   :  { %v3326_v41 = vpack.c.bf16 %v2847_v8, %v2843_v51  ;;  %v3338_v4 = vpack.c.bf16 %v2849_v15, %v2845_v18  ;;  %v2722_v34 = vpop.f32.mrb[36].mxu0  ;;  %v2823_v47 = vpop.f32.mrb[36].mxu1 }
 0x724   :  { %v2724_v44 = vpop.f32.mrb[37].mxu0  ;;  %v2825_v63 = vpop.f32.mrb[37].mxu1  ;;  %v2850_v62 = vmul.f32 %v2722_v34, %v6846_v50  ;;  %v2852_v1 = vmul.f32 %v2823_v47, %v6868_v19  ;;  %v2858_v19 = vld [vmem:[%s7118_s6] sm:$0xff] }
 0x725   :  { %3327 = vmatprep.subr.bf16.mxu0 %v3326_v41  ;;  %3339 = vmatprep.subr.bf16.mxu1 %v3338_v4  ;;  %v2851_v26 = vmul.f32 %v2724_v44, %v6839_v12  ;;  %v2853_v14 = vmul.f32 %v2825_v63, %v6863_v29  ;;  %v2861_v12 = vpop.permute.xlu1 %2860 }
 0x726   :  { %3329 = vmatpush1.bf16.msra.mxu0 %v3328_v25  ;;  %3341 = vmatpush1.bf16.msra.mxu1 %v3340_v24 }
 0x727   :  { %v2728_v11 = vpop.f32.mrb[38].mxu0  ;;  %v2829_v48 = vpop.f32.mrb[38].mxu1 }
 0x728   :  { %v2854_v58 = vmul.f32 %v2728_v11, %v6951_v9  ;;  %v2856_v28 = vmul.f32 %v2829_v48, %v6957_v0  ;;  %v2730_v59 = vpop.f32.mrb[39].mxu0  ;;  %v2831_v35 = vpop.f32.mrb[39].mxu1 }
 0x729   :  { %v2855_v20 = vmul.f32 %v2730_v59, %v6949_v31  ;;  %v2857_v10 = vmul.f32 %v2831_v35, %v6955_v38 }
 0x72a   :  { %v3332_v39 = vpack.c.bf16 %v2854_v58, %v2850_v62  ;;  %v3344_v6 = vpack.c.bf16 %v2856_v28, %v2852_v1 }
 0x72b   :  { %v3330_v27 = vpack.c.bf16 %v2855_v20, %v2851_v26  ;;  %v3342_v50 = vpack.c.bf16 %v2857_v10, %v2853_v14 }
 0x72d   :  { %3331 = vmatprep.subr.bf16.mxu0 %v3330_v27  ;;  %3343 = vmatprep.subr.bf16.mxu1 %v3342_v50 }
 0x72e   :  { %3333 = vmatpush1.bf16.msra.mxu0 %v3332_v39  ;;  %3345 = vmatpush1.bf16.msra.mxu1 %v3344_v6 }
 0x731   :  { %3107 = vmatmul.mubr.msk.f32.vlgmr.msra.gmra.mrb[40].mxu0 %vm2350_vm15, %v2858_v19  ;;  %3108 = vmatmul.mubr.msk.f32.vlgmr.msra.gmra.mrb[40].mxu1 %vm2350_vm15, %v2858_v19 }
 0x804   :  { %v2932_v29 = vpop.f32.mrb[40].mxu0  ;;  %v3003_v31 = vpop.f32.mrb[40].mxu1 }
 0x805   :  { %v2933_v9 = vadd.f32 %v2932_v29, %v2861_v12  ;;  %v3004_v38 = vadd.f32 %v3003_v31, %v2861_v12  ;;  %v2934_v0 = vpop.f32.mrb[41].mxu0  ;;  %v3005_v36 = vpop.f32.mrb[41].mxu1 }
 0x806   :  { %v2935_v5 = vadd.f32 %v2934_v0, %v2861_v12  ;;  %v3006_v60 = vadd.f32 %v3005_v36, %v2861_v12 }
 0x807   :  { %v3008_v22 = vadd.f32 %v3656_v42, %v2933_v9  ;;  %v3010_v52 = vadd.f32 %v3657_v55, %v3004_v38 }
 0x808   :  { %v3009_v46 = vadd.f32 %v3658_v21, %v2935_v5  ;;  %v3011_v43 = vadd.f32 %v3659_v49, %v3006_v60 }
 0x809   :  { %3012 = vst [vmem:[%s7119_s10] sm:$0xff] %v3008_v22  ;;  %3014 = vst [vmem:[%s7119_s10 + $0x10] sm:$0xff] %v3010_v52 }
 0x80a   :  { %3013 = vst [vmem:[%s7119_s10 + $0x8] sm:$0xff] %v3009_v46  ;;  %3015 = vst [vmem:[%s7119_s10 + $0x18] sm:$0xff] %v3011_v43 }

</bundles_post_ra>
